<compile_context>
chip_gen: v7x
topology: tpu7x:2x2x1
jax: 0.10.0
libtpu: 0.0.40
codegen_flags: <defaults>
</compile_context>

<pallas_src>
import math
from functools import partial

import jax
import jax.numpy as jnp
from jax.experimental import pallas as pl
from jax.experimental.pallas import tpu as pltpu

EPS = 1e-5  # LayerNorm eps (matches the reference LayerNorm)


def _round_up(x, m):
    return (x + m - 1) // m * m


# ---------------------------------------------------------------------------
# in-kernel helpers
# ---------------------------------------------------------------------------
def _layer_norm(x, scale, shift):
    # matches torch: mean / var(unbiased=False) over last dim
    mean = jnp.mean(x, axis=-1, keepdims=True)
    var = jnp.mean((x - mean) ** 2, axis=-1, keepdims=True)
    return (x - mean) * jax.lax.rsqrt(var + EPS) * scale + shift


def _gelu(x):
    # tanh-approximation GELU (the book's custom GELU module)
    return 0.5 * x * (1.0 + jnp.tanh(
        math.sqrt(2.0 / math.pi) * (x + 0.044715 * x ** 3)))


# ---------------------------------------------------------------------------
# Transformer block kernel: norm1 -> MHA -> +res -> norm2 -> FF -> +res
# grid = (batch, query_tile). Weights are already (in, out) bf16.
# ---------------------------------------------------------------------------
def transformer_block_kernel(xq_ref, xf_ref, ln1s_ref, ln1b_ref,
                             wqT_ref, wkT_ref, wvT_ref, woT_ref, bo_ref,
                             ln2s_ref, ln2b_ref, w1T_ref, b1_ref, w2T_ref,
                             b2_ref, o_ref, *, num_heads, q_tile):
    qt = pl.program_id(1)

    x_tile = xq_ref[0]            # (TQ, D) query rows for this step (f32)
    x_full = xf_ref[0]            # (T,  D) full sequence for K/V      (f32)
    TQ, D = x_tile.shape
    T = x_full.shape[0]
    hd = D // num_heads
    inv_scale = 1.0 / math.sqrt(hd)

    # --- attention sub-block ---------------------------------------------
    shortcut = x_tile
    xq_n = _layer_norm(x_tile, ln1s_ref[...], ln1b_ref[...]).astype(jnp.bfloat16)
    xf_n = _layer_norm(x_full, ln1s_ref[...], ln1b_ref[...]).astype(jnp.bfloat16)

    # bf16 MXU matmuls, f32 accumulation, no in-kernel transposes.
    q = jnp.dot(xq_n, wqT_ref[...], preferred_element_type=jnp.float32)
    k = jnp.dot(xf_n, wkT_ref[...], preferred_element_type=jnp.float32)
    v = jnp.dot(xf_n, wvT_ref[...], preferred_element_type=jnp.float32)

    q = q.astype(jnp.bfloat16).reshape(TQ, num_heads, hd)
    k = k.astype(jnp.bfloat16).reshape(T, num_heads, hd)
    v = v.astype(jnp.bfloat16).reshape(T, num_heads, hd)

    # causal mask (global query index = qt * q_tile + local row)
    row = jax.lax.broadcasted_iota(jnp.int32, (TQ, T), 0) + qt * q_tile
    col = jax.lax.broadcasted_iota(jnp.int32, (TQ, T), 1)
    causal = col > row                       # True => masked (future position)

    # head-batched attention: scores (H, TQ, T)
    s = jnp.einsum('qhd,khd->hqk', q, k,
                   preferred_element_type=jnp.float32) * inv_scale
    s = jnp.where(causal[None, :, :], -jnp.inf, s)
    m = jnp.max(s, axis=-1, keepdims=True)
    p = jnp.exp(s - m)
    p = p / jnp.sum(p, axis=-1, keepdims=True)
    # attention dropout is identity in eval mode

    ctx = jnp.einsum('hqk,khd->qhd', p.astype(jnp.bfloat16), v,
                     preferred_element_type=jnp.float32)        # (TQ, H, hd)
    ctx = ctx.reshape(TQ, D)

    att = jnp.dot(ctx.astype(jnp.bfloat16), woT_ref[...],
                  preferred_element_type=jnp.float32) + bo_ref[...]
    # drop_skip_layer is identity in eval mode
    x = att + shortcut

    # --- feed-forward sub-block -------------------------------------------
    shortcut = x
    xn = _layer_norm(x, ln2s_ref[...], ln2b_ref[...]).astype(jnp.bfloat16)
    h1 = jnp.dot(xn, w1T_ref[...], preferred_element_type=jnp.float32) + b1_ref[...]
    h1 = _gelu(h1).astype(jnp.bfloat16)
    ff = jnp.dot(h1, w2T_ref[...], preferred_element_type=jnp.float32) + b2_ref[...]
    o_ref[0] = ff + shortcut


def transformer_block(x, p, num_heads):
    B, T, D = x.shape
    H4 = p['w1_t'].shape[1]
    TQ = T if T <= 256 else 256
    assert T % TQ == 0, "sequence length must be a multiple of the query tile"
    nq = T // TQ

    def const(shape):
        zeros = (0,) * len(shape)
        return pl.BlockSpec(shape, lambda b, q: zeros)

    # advisory cost estimate (bf16 weights, f32 activations)
    flops = int(B * (2 * T * D * D                       # q proj
                     + nq * 4 * T * D * D                # k/v proj per q-tile
                     + 4 * T * T * D                     # scores + p@v
                     + 2 * T * D * D                     # out proj
                     + 4 * T * D * H4))                  # feed-forward
    transcend = int(B * (num_heads * T * T + T * H4))
    w_bytes = (4 * D * D + 2 * D * H4) * 2 + (6 * D + H4) * 4
    bytes_accessed = int(B * nq * (TQ * D * 4 + T * D * 4 + w_bytes)
                         + B * T * D * 4)

    # VMEM budget: double-buffered input blocks + output + headroom.
    blk_bytes = (TQ * D * 4 + T * D * 4
                 + (4 * D * D + 2 * D * H4) * 2
                 + (6 * D + H4) * 4
                 + TQ * D * 4)
    vmem_limit = int(min(max(3 * blk_bytes + (8 << 20), 32 << 20), 64 << 20))

    return pl.pallas_call(
        partial(transformer_block_kernel, num_heads=num_heads, q_tile=TQ),
        out_shape=jax.ShapeDtypeStruct((B, T, D), jnp.float32),
        grid=(B, nq),
        in_specs=[
            pl.BlockSpec((1, TQ, D), lambda b, q: (b, q, 0)),   # x (query tile)
            pl.BlockSpec((1, T, D), lambda b, q: (b, 0, 0)),    # x (full seq, K/V)
            const((1, D)), const((1, D)),                       # ln1 scale/shift
            const((D, D)), const((D, D)), const((D, D)),        # WqT, WkT, WvT
            const((D, D)), const((1, D)),                       # WoT, bo
            const((1, D)), const((1, D)),                       # ln2 scale/shift
            const((D, H4)), const((1, H4)),                     # W1T, b1
            const((H4, D)), const((1, D)),                      # W2T, b2
        ],
        out_specs=pl.BlockSpec((1, TQ, D), lambda b, q: (b, q, 0)),
        compiler_params=pltpu.CompilerParams(
            dimension_semantics=("parallel", "parallel"),
            vmem_limit_bytes=vmem_limit),
        cost_estimate=pl.CostEstimate(flops=flops, transcendentals=transcend,
                                      bytes_accessed=bytes_accessed),
    )(x, x, p['ln1_s'], p['ln1_b'], p['wq_t'], p['wk_t'], p['wv_t'],
      p['wo_t'], p['bo'], p['ln2_s'], p['ln2_b'],
      p['w1_t'], p['b1'], p['w2_t'], p['b2'])


# ---------------------------------------------------------------------------
# Final-norm + LM-head kernel, tiled over the vocab dimension
# ---------------------------------------------------------------------------
def head_kernel(x_ref, gs_ref, gb_ref, wT_ref, o_ref):
    xn = _layer_norm(x_ref[0], gs_ref[...], gb_ref[...]).astype(jnp.bfloat16)
    o_ref[0] = jnp.dot(xn, wT_ref[...], preferred_element_type=jnp.float32)


def final_head(x, scale, shift, w_out_t, vocab_size, v_tile):
    B, T, D = x.shape
    Vp = w_out_t.shape[1]
    TV = v_tile
    assert Vp % TV == 0
    nv = Vp // TV

    flops = int(2 * B * T * D * Vp)
    bytes_accessed = int(B * T * D * 4 + D * Vp * 2 + B * T * Vp * 4)
    blk_bytes = T * D * 4 + D * TV * 2 + T * TV * 4
    vmem_limit = int(min(max(3 * blk_bytes + (8 << 20), 32 << 20), 64 << 20))

    logits = pl.pallas_call(
        head_kernel,
        out_shape=jax.ShapeDtypeStruct((B, T, Vp), jnp.float32),
        grid=(B, nv),
        in_specs=[
            pl.BlockSpec((1, T, D), lambda b, v: (b, 0, 0)),
            pl.BlockSpec((1, D), lambda b, v: (0, 0)),
            pl.BlockSpec((1, D), lambda b, v: (0, 0)),
            pl.BlockSpec((D, TV), lambda b, v: (0, v)),
        ],
        out_specs=pl.BlockSpec((1, T, TV), lambda b, v: (b, 0, v)),
        compiler_params=pltpu.CompilerParams(
            dimension_semantics=("parallel", "parallel"),
            vmem_limit_bytes=vmem_limit),
        cost_estimate=pl.CostEstimate(flops=flops, transcendentals=0,
                                      bytes_accessed=bytes_accessed),
    )(x, scale, shift, w_out_t)
    return logits[:, :, :vocab_size]


# ---------------------------------------------------------------------------
# parameter init (PyTorch layout, f32) + one-time kernel-layout preparation
# ---------------------------------------------------------------------------
def init_params(cfg, key):
    D, V, C = cfg['emb_dim'], cfg['vocab_size'], cfg['context_length']
    H4 = 4 * D
    keys = jax.random.split(key, 3 + cfg['n_layers'])

    def nrm(k, shape):
        return (0.02 * jax.random.normal(k, shape)).astype(jnp.float32)

    params = {
        'tok_emb': nrm(keys[0], (V, D)),
        'pos_emb': nrm(keys[1], (C, D)),
        'fn_s': jnp.ones((D,), jnp.float32),
        'fn_b': jnp.zeros((D,), jnp.float32),
        'out_w': nrm(keys[2], (V, D)),        # out_head: Linear(D, V, bias=False)
        'blocks': [],
    }
    for i in range(cfg['n_layers']):
        k = jax.random.split(keys[3 + i], 6)
        params['blocks'].append({
            'ln1_s': jnp.ones((D,), jnp.float32),
            'ln1_b': jnp.zeros((D,), jnp.float32),
            'wq': nrm(k[0], (D, D)),          # qkv_bias=False
            'wk': nrm(k[1], (D, D)),
            'wv': nrm(k[2], (D, D)),
            'wo': nrm(k[3], (D, D)),
            'bo': jnp.zeros((D,), jnp.float32),
            'ln2_s': jnp.ones((D,), jnp.float32),
            'ln2_b': jnp.zeros((D,), jnp.float32),
            'w1': nrm(k[4], (H4, D)),
            'b1': jnp.zeros((H4,), jnp.float32),
            'w2': nrm(k[5], (D, H4)),
            'b2': jnp.zeros((D,), jnp.float32),
        })
    return params


def prepare_params(params, cfg):
    """One-time conversion to kernel-friendly layout:
    - Linear weights transposed to (in_features, out_features) and cast to bf16
      (no in-kernel transpose; MXU fed bf16, HBM traffic halved).
    - LayerNorm scale/shift and biases kept f32, shaped (1, N) for broadcast.
    - LM-head weight padded along vocab to a multiple of the vocab tile.
    """
    V = cfg['vocab_size']
    TV = 512 if V >= 512 else _round_up(V, 128)
    Vp = _round_up(V, TV)

    def row(v):
        return v.reshape(1, -1).astype(jnp.float32)

    out_w_t = params['out_w'].T.astype(jnp.bfloat16)            # (D, V)
    out_w_t = jnp.pad(out_w_t, ((0, 0), (0, Vp - V)))

    prepped = {
        'tok_emb': params['tok_emb'],
        'pos_emb': params['pos_emb'],
        'fn_s': row(params['fn_s']),
        'fn_b': row(params['fn_b']),
        'out_w_t': out_w_t,
        'v_tile': TV,
        'vocab_size': V,
        'blocks': [],
    }
    for bp in params['blocks']:
        prepped['blocks'].append({
            'ln1_s': row(bp['ln1_s']), 'ln1_b': row(bp['ln1_b']),
            'wq_t': bp['wq'].T.astype(jnp.bfloat16),
            'wk_t': bp['wk'].T.astype(jnp.bfloat16),
            'wv_t': bp['wv'].T.astype(jnp.bfloat16),
            'wo_t': bp['wo'].T.astype(jnp.bfloat16),
            'bo': row(bp['bo']),
            'ln2_s': row(bp['ln2_s']), 'ln2_b': row(bp['ln2_b']),
            'w1_t': bp['w1'].T.astype(jnp.bfloat16), 'b1': row(bp['b1']),
            'w2_t': bp['w2'].T.astype(jnp.bfloat16), 'b2': row(bp['b2']),
        })
    return prepped


def gpt_forward(in_idx, prepped, cfg):
    B, T = in_idx.shape
    tok = jnp.take(prepped['tok_emb'], in_idx, axis=0)   # embedding gather (glue)
    pos = prepped['pos_emb'][:T]                         # (T, D)
    x = (tok + pos[None, :, :]).astype(jnp.float32)
    # drop_emb is identity in eval mode
    for bp in prepped['blocks']:
        x = transformer_block(x, bp, cfg['n_heads'])
    return final_head(x, prepped['fn_s'], prepped['fn_b'], prepped['out_w_t'],
                      prepped['vocab_size'], prepped['v_tile'])


if __name__ == "__main__":
    # Small but hardware-tile-aligned shapes: D multiple of 128 lanes,
    # head_dim = 128, T multiple of 8 sublanes, vocab multiple of 128.
    cfg = dict(vocab_size=256, context_length=16, emb_dim=256, n_heads=2,
               n_layers=2, drop_rate=0.0, qkv_bias=False)
    key = jax.random.PRNGKey(0)
    kp, kx = jax.random.split(key)
    params = prepare_params(init_params(cfg, kp), cfg)
    in_idx = jax.random.randint(kx, (2, cfg['context_length']),
                                0, cfg['vocab_size'], dtype=jnp.int32)
    logits = gpt_forward(in_idx, params, cfg)
    jax.block_until_ready(logits)
    assert logits.shape == (2, cfg['context_length'], cfg['vocab_size'])
    assert bool(jnp.all(jnp.isfinite(logits)))
    print("KERNEL_OK")
</pallas_src>

<mosaic_0001>
module attributes {stable_mosaic.version = 11 : i64} {
  func.func @transformer_block_kernel(%arg0: i32, %arg1: i32, %arg2: memref<1x16x256xf32, #tpu.memory_space<vmem>>, %arg3: memref<1x16x256xf32, #tpu.memory_space<vmem>>, %arg4: memref<1x256xf32, #tpu.memory_space<vmem>>, %arg5: memref<1x256xf32, #tpu.memory_space<vmem>>, %arg6: memref<256x256xbf16, #tpu.memory_space<vmem>>, %arg7: memref<256x256xbf16, #tpu.memory_space<vmem>>, %arg8: memref<256x256xbf16, #tpu.memory_space<vmem>>, %arg9: memref<256x256xbf16, #tpu.memory_space<vmem>>, %arg10: memref<1x256xf32, #tpu.memory_space<vmem>>, %arg11: memref<1x256xf32, #tpu.memory_space<vmem>>, %arg12: memref<1x256xf32, #tpu.memory_space<vmem>>, %arg13: memref<256x1024xbf16, #tpu.memory_space<vmem>>, %arg14: memref<1x1024xf32, #tpu.memory_space<vmem>>, %arg15: memref<1024x256xbf16, #tpu.memory_space<vmem>>, %arg16: memref<1x256xf32, #tpu.memory_space<vmem>>, %arg17: memref<1x16x256xf32, #tpu.memory_space<vmem>>) attributes {dimension_semantics = [#tpu.dimension_semantics<parallel>, #tpu.dimension_semantics<parallel>], iteration_bounds = array<i64: 2, 1>, scalar_prefetch = 0 : i64, scratch_operands = 0 : i64, tpu.core_type = #tpu.core_type<tc>, window_params = [{transform_indices = @transform_0, window_bounds = array<i64: 1, 16, 256>}, {transform_indices = @transform_1, window_bounds = array<i64: 1, 16, 256>}, {pipeline_mode = #tpu.pipeline_mode<synchronous>, transform_indices = @transform_2, window_bounds = array<i64: 1, 256>}, {pipeline_mode = #tpu.pipeline_mode<synchronous>, transform_indices = @transform_3, window_bounds = array<i64: 1, 256>}, {pipeline_mode = #tpu.pipeline_mode<synchronous>, transform_indices = @transform_4, window_bounds = array<i64: 256, 256>}, {pipeline_mode = #tpu.pipeline_mode<synchronous>, transform_indices = @transform_5, window_bounds = array<i64: 256, 256>}, {pipeline_mode = #tpu.pipeline_mode<synchronous>, transform_indices = @transform_6, window_bounds = array<i64: 256, 256>}, {pipeline_mode = #tpu.pipeline_mode<synchronous>, transform_indices = @transform_7, window_bounds = array<i64: 256, 256>}, {pipeline_mode = #tpu.pipeline_mode<synchronous>, transform_indices = @transform_8, window_bounds = array<i64: 1, 256>}, {pipeline_mode = #tpu.pipeline_mode<synchronous>, transform_indices = @transform_9, window_bounds = array<i64: 1, 256>}, {pipeline_mode = #tpu.pipeline_mode<synchronous>, transform_indices = @transform_10, window_bounds = array<i64: 1, 256>}, {pipeline_mode = #tpu.pipeline_mode<synchronous>, transform_indices = @transform_11, window_bounds = array<i64: 256, 1024>}, {pipeline_mode = #tpu.pipeline_mode<synchronous>, transform_indices = @transform_12, window_bounds = array<i64: 1, 1024>}, {pipeline_mode = #tpu.pipeline_mode<synchronous>, transform_indices = @transform_13, window_bounds = array<i64: 1024, 256>}, {pipeline_mode = #tpu.pipeline_mode<synchronous>, transform_indices = @transform_14, window_bounds = array<i64: 1, 256>}, {transform_indices = @transform_15, window_bounds = array<i64: 1, 16, 256>}]} {
    %c0 = arith.constant 0 : index
    %c0_0 = arith.constant 0 : index
    %c0_1 = arith.constant 0 : index
    %0 = vector.load %arg2[%c0, %c0_0, %c0_1] : memref<1x16x256xf32, #tpu.memory_space<vmem>>, vector<1x16x256xf32>
    %1 = vector.shape_cast %0 : vector<1x16x256xf32> to vector<16x256xf32>
    %c0_2 = arith.constant 0 : index
    %c0_3 = arith.constant 0 : index
    %c0_4 = arith.constant 0 : index
    %2 = vector.load %arg3[%c0_2, %c0_3, %c0_4] : memref<1x16x256xf32, #tpu.memory_space<vmem>>, vector<1x16x256xf32>
    %3 = vector.shape_cast %2 : vector<1x16x256xf32> to vector<16x256xf32>
    %c0_5 = arith.constant 0 : index
    %c0_6 = arith.constant 0 : index
    %4 = vector.load %arg4[%c0_5, %c0_6] : memref<1x256xf32, #tpu.memory_space<vmem>>, vector<1x256xf32>
    %c0_7 = arith.constant 0 : index
    %c0_8 = arith.constant 0 : index
    %5 = vector.load %arg5[%c0_7, %c0_8] : memref<1x256xf32, #tpu.memory_space<vmem>>, vector<1x256xf32>
    %cst = arith.constant dense<0.000000e+00> : vector<16xf32>
    %6 = vector.multi_reduction <add>, %1, %cst [1] : vector<16x256xf32> to vector<16xf32>
    %7 = vector.shape_cast %6 : vector<16xf32> to vector<16x1xf32>
    %cst_9 = arith.constant 2.560000e+02 : f32
    %8 = vector.broadcast %cst_9 : f32 to vector<16x1xf32>
    %9 = arith.divf %7, %8 : vector<16x1xf32>
    %10 = vector.broadcast %9 : vector<16x1xf32> to vector<16x256xf32>
    %11 = arith.subf %1, %10 : vector<16x256xf32>
    %12 = arith.mulf %11, %11 : vector<16x256xf32>
    %cst_10 = arith.constant dense<0.000000e+00> : vector<16xf32>
    %13 = vector.multi_reduction <add>, %12, %cst_10 [1] : vector<16x256xf32> to vector<16xf32>
    %14 = vector.shape_cast %13 : vector<16xf32> to vector<16x1xf32>
    %cst_11 = arith.constant 2.560000e+02 : f32
    %15 = vector.broadcast %cst_11 : f32 to vector<16x1xf32>
    %16 = arith.divf %14, %15 : vector<16x1xf32>
    %17 = vector.broadcast %9 : vector<16x1xf32> to vector<16x256xf32>
    %18 = arith.subf %1, %17 : vector<16x256xf32>
    %cst_12 = arith.constant 9.99999974E-6 : f32
    %19 = vector.broadcast %cst_12 : f32 to vector<16x1xf32>
    %20 = arith.addf %16, %19 : vector<16x1xf32>
    %21 = math.rsqrt %20 : vector<16x1xf32>
    %22 = vector.broadcast %21 : vector<16x1xf32> to vector<16x256xf32>
    %23 = arith.mulf %18, %22 : vector<16x256xf32>
    %24 = vector.broadcast %4 : vector<1x256xf32> to vector<16x256xf32>
    %25 = arith.mulf %23, %24 : vector<16x256xf32>
    %26 = vector.broadcast %5 : vector<1x256xf32> to vector<16x256xf32>
    %27 = arith.addf %25, %26 : vector<16x256xf32>
    %28 = arith.truncf %27 : vector<16x256xf32> to vector<16x256xbf16>
    %c0_13 = arith.constant 0 : index
    %c0_14 = arith.constant 0 : index
    %29 = vector.load %arg4[%c0_13, %c0_14] : memref<1x256xf32, #tpu.memory_space<vmem>>, vector<1x256xf32>
    %c0_15 = arith.constant 0 : index
    %c0_16 = arith.constant 0 : index
    %30 = vector.load %arg5[%c0_15, %c0_16] : memref<1x256xf32, #tpu.memory_space<vmem>>, vector<1x256xf32>
    %cst_17 = arith.constant dense<0.000000e+00> : vector<16xf32>
    %31 = vector.multi_reduction <add>, %3, %cst_17 [1] : vector<16x256xf32> to vector<16xf32>
    %32 = vector.shape_cast %31 : vector<16xf32> to vector<16x1xf32>
    %cst_18 = arith.constant 2.560000e+02 : f32
    %33 = vector.broadcast %cst_18 : f32 to vector<16x1xf32>
    %34 = arith.divf %32, %33 : vector<16x1xf32>
    %35 = vector.broadcast %34 : vector<16x1xf32> to vector<16x256xf32>
    %36 = arith.subf %3, %35 : vector<16x256xf32>
    %37 = arith.mulf %36, %36 : vector<16x256xf32>
    %cst_19 = arith.constant dense<0.000000e+00> : vector<16xf32>
    %38 = vector.multi_reduction <add>, %37, %cst_19 [1] : vector<16x256xf32> to vector<16xf32>
    %39 = vector.shape_cast %38 : vector<16xf32> to vector<16x1xf32>
    %cst_20 = arith.constant 2.560000e+02 : f32
    %40 = vector.broadcast %cst_20 : f32 to vector<16x1xf32>
    %41 = arith.divf %39, %40 : vector<16x1xf32>
    %42 = vector.broadcast %34 : vector<16x1xf32> to vector<16x256xf32>
    %43 = arith.subf %3, %42 : vector<16x256xf32>
    %cst_21 = arith.constant 9.99999974E-6 : f32
    %44 = vector.broadcast %cst_21 : f32 to vector<16x1xf32>
    %45 = arith.addf %41, %44 : vector<16x1xf32>
    %46 = math.rsqrt %45 : vector<16x1xf32>
    %47 = vector.broadcast %46 : vector<16x1xf32> to vector<16x256xf32>
    %48 = arith.mulf %43, %47 : vector<16x256xf32>
    %49 = vector.broadcast %29 : vector<1x256xf32> to vector<16x256xf32>
    %50 = arith.mulf %48, %49 : vector<16x256xf32>
    %51 = vector.broadcast %30 : vector<1x256xf32> to vector<16x256xf32>
    %52 = arith.addf %50, %51 : vector<16x256xf32>
    %53 = arith.truncf %52 : vector<16x256xf32> to vector<16x256xbf16>
    %c0_22 = arith.constant 0 : index
    %c0_23 = arith.constant 0 : index
    %54 = vector.load %arg6[%c0_22, %c0_23] : memref<256x256xbf16, #tpu.memory_space<vmem>>, vector<256x256xbf16>
    %cst_24 = arith.constant dense<0.000000e+00> : vector<16x256xf32>
    %55 = tpu.matmul %28, %54, %cst_24 {dimension_numbers = #tpu.dot_dimension_numbers<[1], [0], [0], [1], [0, 0, 1, 1], [], []>} : vector<16x256xbf16>, vector<256x256xbf16>, vector<16x256xf32> -> vector<16x256xf32>
    %c0_25 = arith.constant 0 : index
    %c0_26 = arith.constant 0 : index
    %56 = vector.load %arg7[%c0_25, %c0_26] : memref<256x256xbf16, #tpu.memory_space<vmem>>, vector<256x256xbf16>
    %cst_27 = arith.constant dense<0.000000e+00> : vector<16x256xf32>
    %57 = tpu.matmul %53, %56, %cst_27 {dimension_numbers = #tpu.dot_dimension_numbers<[1], [0], [0], [1], [0, 0, 1, 1], [], []>} : vector<16x256xbf16>, vector<256x256xbf16>, vector<16x256xf32> -> vector<16x256xf32>
    %c0_28 = arith.constant 0 : index
    %c0_29 = arith.constant 0 : index
    %58 = vector.load %arg8[%c0_28, %c0_29] : memref<256x256xbf16, #tpu.memory_space<vmem>>, vector<256x256xbf16>
    %cst_30 = arith.constant dense<0.000000e+00> : vector<16x256xf32>
    %59 = tpu.matmul %53, %58, %cst_30 {dimension_numbers = #tpu.dot_dimension_numbers<[1], [0], [0], [1], [0, 0, 1, 1], [], []>} : vector<16x256xbf16>, vector<256x256xbf16>, vector<16x256xf32> -> vector<16x256xf32>
    %60 = arith.truncf %55 : vector<16x256xf32> to vector<16x256xbf16>
    %61 = vector.shape_cast %60 : vector<16x256xbf16> to vector<16x2x128xbf16>
    %62 = arith.truncf %57 : vector<16x256xf32> to vector<16x256xbf16>
    %63 = vector.shape_cast %62 : vector<16x256xbf16> to vector<16x2x128xbf16>
    %64 = arith.truncf %59 : vector<16x256xf32> to vector<16x256xbf16>
    %65 = vector.shape_cast %64 : vector<16x256xbf16> to vector<16x2x128xbf16>
    %66 = tpu.iota {dimensions = array<i32: 0>} : vector<16x16xi32>
    %c16_i32 = arith.constant 16 : i32
    %67 = arith.muli %arg1, %c16_i32 : i32
    %68 = vector.broadcast %67 : i32 to vector<16x16xi32>
    %69 = arith.addi %66, %68 : vector<16x16xi32>
    %70 = tpu.iota {dimensions = array<i32: 1>} : vector<16x16xi32>
    %71 = arith.cmpi sgt, %70, %69 : vector<16x16xi32>
    "tpu.trace_start"() <{level = 10 : i32, message = "qhd,khd->hqk"}> : () -> ()
    %cst_31 = arith.constant dense<0.000000e+00> : vector<2x16x16xf32>
    %72 = tpu.matmul %61, %63, %cst_31 {dimension_numbers = #tpu.dot_dimension_numbers<[2], [2], [0], [0], [0, 1, 0, 0, 1, 0], [1], [1]>} : vector<16x2x128xbf16>, vector<16x2x128xbf16>, vector<2x16x16xf32> -> vector<2x16x16xf32>
    "tpu.trace_stop"() : () -> ()
    %cst_32 = arith.constant 0.0883883461 : f32
    %73 = vector.broadcast %cst_32 : f32 to vector<2x16x16xf32>
    %74 = arith.mulf %72, %73 : vector<2x16x16xf32>
    %75 = vector.shape_cast %71 : vector<16x16xi1> to vector<1x16x16xi1>
    %cst_33 = arith.constant 0xFF800000 : f32
    %76 = vector.shape_cast %75 : vector<1x16x16xi1> to vector<1x16x16xi1>
    %77 = vector.broadcast %76 : vector<1x16x16xi1> to vector<2x16x16xi1>
    %78 = vector.broadcast %cst_33 : f32 to vector<2x16x16xf32>
    %79 = arith.select %77, %78, %74 : vector<2x16x16xi1>, vector<2x16x16xf32>
    %cst_34 = arith.constant dense<0xFF800000> : vector<2x16xf32>
    %80 = vector.multi_reduction <maximumf>, %79, %cst_34 [2] : vector<2x16x16xf32> to vector<2x16xf32>
    %81 = vector.shape_cast %80 : vector<2x16xf32> to vector<2x16x1xf32>
    %82 = vector.broadcast %81 : vector<2x16x1xf32> to vector<2x16x16xf32>
    %83 = arith.subf %79, %82 : vector<2x16x16xf32>
    %84 = math.exp %83 : vector<2x16x16xf32>
    %cst_35 = arith.constant dense<0.000000e+00> : vector<2x16xf32>
    %85 = vector.multi_reduction <add>, %84, %cst_35 [2] : vector<2x16x16xf32> to vector<2x16xf32>
    %86 = vector.shape_cast %85 : vector<2x16xf32> to vector<2x16x1xf32>
    %87 = vector.broadcast %86 : vector<2x16x1xf32> to vector<2x16x16xf32>
    %88 = arith.divf %84, %87 : vector<2x16x16xf32>
    %89 = arith.truncf %88 : vector<2x16x16xf32> to vector<2x16x16xbf16>
    "tpu.trace_start"() <{level = 10 : i32, message = "hqk,khd->qhd"}> : () -> ()
    %cst_36 = arith.constant dense<0.000000e+00> : vector<2x128x16xf32>
    %90 = tpu.matmul %65, %89, %cst_36 {dimension_numbers = #tpu.dot_dimension_numbers<[0], [2], [2], [1], [0, 1, 0, 2, 1, 1], [1], [0]>} : vector<16x2x128xbf16>, vector<2x16x16xbf16>, vector<2x128x16xf32> -> vector<2x128x16xf32>
    %91 = tpu.transpose %90, [2, 0, 1] : vector<2x128x16xf32> -> vector<16x2x128xf32>
    "tpu.trace_stop"() : () -> ()
    %92 = vector.shape_cast %91 : vector<16x2x128xf32> to vector<16x256xf32>
    %93 = arith.truncf %92 : vector<16x256xf32> to vector<16x256xbf16>
    %c0_37 = arith.constant 0 : index
    %c0_38 = arith.constant 0 : index
    %94 = vector.load %arg9[%c0_37, %c0_38] : memref<256x256xbf16, #tpu.memory_space<vmem>>, vector<256x256xbf16>
    %cst_39 = arith.constant dense<0.000000e+00> : vector<16x256xf32>
    %95 = tpu.matmul %93, %94, %cst_39 {dimension_numbers = #tpu.dot_dimension_numbers<[1], [0], [0], [1], [0, 0, 1, 1], [], []>} : vector<16x256xbf16>, vector<256x256xbf16>, vector<16x256xf32> -> vector<16x256xf32>
    %c0_40 = arith.constant 0 : index
    %c0_41 = arith.constant 0 : index
    %96 = vector.load %arg10[%c0_40, %c0_41] : memref<1x256xf32, #tpu.memory_space<vmem>>, vector<1x256xf32>
    %97 = vector.broadcast %96 : vector<1x256xf32> to vector<16x256xf32>
    %98 = arith.addf %95, %97 : vector<16x256xf32>
    %99 = arith.addf %98, %1 : vector<16x256xf32>
    %c0_42 = arith.constant 0 : index
    %c0_43 = arith.constant 0 : index
    %100 = vector.load %arg11[%c0_42, %c0_43] : memref<1x256xf32, #tpu.memory_space<vmem>>, vector<1x256xf32>
    %c0_44 = arith.constant 0 : index
    %c0_45 = arith.constant 0 : index
    %101 = vector.load %arg12[%c0_44, %c0_45] : memref<1x256xf32, #tpu.memory_space<vmem>>, vector<1x256xf32>
    %cst_46 = arith.constant dense<0.000000e+00> : vector<16xf32>
    %102 = vector.multi_reduction <add>, %99, %cst_46 [1] : vector<16x256xf32> to vector<16xf32>
    %103 = vector.shape_cast %102 : vector<16xf32> to vector<16x1xf32>
    %cst_47 = arith.constant 2.560000e+02 : f32
    %104 = vector.broadcast %cst_47 : f32 to vector<16x1xf32>
    %105 = arith.divf %103, %104 : vector<16x1xf32>
    %106 = vector.broadcast %105 : vector<16x1xf32> to vector<16x256xf32>
    %107 = arith.subf %99, %106 : vector<16x256xf32>
    %108 = arith.mulf %107, %107 : vector<16x256xf32>
    %cst_48 = arith.constant dense<0.000000e+00> : vector<16xf32>
    %109 = vector.multi_reduction <add>, %108, %cst_48 [1] : vector<16x256xf32> to vector<16xf32>
    %110 = vector.shape_cast %109 : vector<16xf32> to vector<16x1xf32>
    %cst_49 = arith.constant 2.560000e+02 : f32
    %111 = vector.broadcast %cst_49 : f32 to vector<16x1xf32>
    %112 = arith.divf %110, %111 : vector<16x1xf32>
    %113 = vector.broadcast %105 : vector<16x1xf32> to vector<16x256xf32>
    %114 = arith.subf %99, %113 : vector<16x256xf32>
    %cst_50 = arith.constant 9.99999974E-6 : f32
    %115 = vector.broadcast %cst_50 : f32 to vector<16x1xf32>
    %116 = arith.addf %112, %115 : vector<16x1xf32>
    %117 = math.rsqrt %116 : vector<16x1xf32>
    %118 = vector.broadcast %117 : vector<16x1xf32> to vector<16x256xf32>
    %119 = arith.mulf %114, %118 : vector<16x256xf32>
    %120 = vector.broadcast %100 : vector<1x256xf32> to vector<16x256xf32>
    %121 = arith.mulf %119, %120 : vector<16x256xf32>
    %122 = vector.broadcast %101 : vector<1x256xf32> to vector<16x256xf32>
    %123 = arith.addf %121, %122 : vector<16x256xf32>
    %124 = arith.truncf %123 : vector<16x256xf32> to vector<16x256xbf16>
    %c0_51 = arith.constant 0 : index
    %c0_52 = arith.constant 0 : index
    %125 = vector.load %arg13[%c0_51, %c0_52] : memref<256x1024xbf16, #tpu.memory_space<vmem>>, vector<256x1024xbf16>
    %cst_53 = arith.constant dense<0.000000e+00> : vector<16x1024xf32>
    %126 = tpu.matmul %124, %125, %cst_53 {dimension_numbers = #tpu.dot_dimension_numbers<[1], [0], [0], [1], [0, 0, 1, 1], [], []>} : vector<16x256xbf16>, vector<256x1024xbf16>, vector<16x1024xf32> -> vector<16x1024xf32>
    %c0_54 = arith.constant 0 : index
    %c0_55 = arith.constant 0 : index
    %127 = vector.load %arg14[%c0_54, %c0_55] : memref<1x1024xf32, #tpu.memory_space<vmem>>, vector<1x1024xf32>
    %128 = vector.broadcast %127 : vector<1x1024xf32> to vector<16x1024xf32>
    %129 = arith.addf %126, %128 : vector<16x1024xf32>
    %cst_56 = arith.constant 5.000000e-01 : f32
    %130 = vector.broadcast %cst_56 : f32 to vector<16x1024xf32>
    %131 = arith.mulf %130, %129 : vector<16x1024xf32>
    %132 = arith.mulf %129, %129 : vector<16x1024xf32>
    %133 = arith.mulf %129, %132 : vector<16x1024xf32>
    %cst_57 = arith.constant 4.471500e-02 : f32
    %134 = vector.broadcast %cst_57 : f32 to vector<16x1024xf32>
    %135 = arith.mulf %134, %133 : vector<16x1024xf32>
    %136 = arith.addf %129, %135 : vector<16x1024xf32>
    %cst_58 = arith.constant 0.797884583 : f32
    %137 = vector.broadcast %cst_58 : f32 to vector<16x1024xf32>
    %138 = arith.mulf %137, %136 : vector<16x1024xf32>
    %139 = math.tanh %138 : vector<16x1024xf32>
    %cst_59 = arith.constant 1.000000e+00 : f32
    %140 = vector.broadcast %cst_59 : f32 to vector<16x1024xf32>
    %141 = arith.addf %140, %139 : vector<16x1024xf32>
    %142 = arith.mulf %131, %141 : vector<16x1024xf32>
    %143 = arith.truncf %142 : vector<16x1024xf32> to vector<16x1024xbf16>
    %c0_60 = arith.constant 0 : index
    %c0_61 = arith.constant 0 : index
    %144 = vector.load %arg15[%c0_60, %c0_61] : memref<1024x256xbf16, #tpu.memory_space<vmem>>, vector<1024x256xbf16>
    %cst_62 = arith.constant dense<0.000000e+00> : vector<16x256xf32>
    %145 = tpu.matmul %143, %144, %cst_62 {dimension_numbers = #tpu.dot_dimension_numbers<[1], [0], [0], [1], [0, 0, 1, 1], [], []>} : vector<16x1024xbf16>, vector<1024x256xbf16>, vector<16x256xf32> -> vector<16x256xf32>
    %c0_63 = arith.constant 0 : index
    %c0_64 = arith.constant 0 : index
    %146 = vector.load %arg16[%c0_63, %c0_64] : memref<1x256xf32, #tpu.memory_space<vmem>>, vector<1x256xf32>
    %147 = vector.broadcast %146 : vector<1x256xf32> to vector<16x256xf32>
    %148 = arith.addf %145, %147 : vector<16x256xf32>
    %149 = arith.addf %148, %99 : vector<16x256xf32>
    %c0_65 = arith.constant 0 : index
    %c0_66 = arith.constant 0 : index
    %c0_67 = arith.constant 0 : index
    %150 = vector.load %arg17[%c0_65, %c0_66, %c0_67] : memref<1x16x256xf32, #tpu.memory_space<vmem>>, vector<1x16x256xf32>
    %151 = vector.shape_cast %150 : vector<1x16x256xf32> to vector<16x256xf32>
    %152 = vector.shape_cast %149 : vector<16x256xf32> to vector<1x16x256xf32>
    tpu.vector_store %arg17[%c0_65, %c0_66, %c0_67], %152 {strides = array<i32>} : memref<1x16x256xf32, #tpu.memory_space<vmem>>, vector<1x16x256xf32>,
    return
  }
  func.func @transform_0(%arg0: i32, %arg1: i32) -> (i32, i32, i32) {
    %c0_i32 = arith.constant 0 : i32
    %c0_i32_0 = arith.constant 0 : i32
    return %arg0, %arg1, %c0_i32 : i32, i32, i32
  }
  func.func @transform_1(%arg0: i32, %arg1: i32) -> (i32, i32, i32) {
    %c0_i32 = arith.constant 0 : i32
    %c0_i32_0 = arith.constant 0 : i32
    %c0_i32_1 = arith.constant 0 : i32
    return %arg0, %c0_i32, %c0_i32_0 : i32, i32, i32
  }
  func.func @transform_2(%arg0: i32, %arg1: i32) -> (i32, i32) {
    %c0_i32 = arith.constant 0 : i32
    %c0_i32_0 = arith.constant 0 : i32
    %c0_i32_1 = arith.constant 0 : i32
    return %c0_i32, %c0_i32_0 : i32, i32
  }
  func.func @transform_3(%arg0: i32, %arg1: i32) -> (i32, i32) {
    %c0_i32 = arith.constant 0 : i32
    %c0_i32_0 = arith.constant 0 : i32
    %c0_i32_1 = arith.constant 0 : i32
    return %c0_i32, %c0_i32_0 : i32, i32
  }
  func.func @transform_4(%arg0: i32, %arg1: i32) -> (i32, i32) {
    %c0_i32 = arith.constant 0 : i32
    %c0_i32_0 = arith.constant 0 : i32
    %c0_i32_1 = arith.constant 0 : i32
    return %c0_i32, %c0_i32_0 : i32, i32
  }
  func.func @transform_5(%arg0: i32, %arg1: i32) -> (i32, i32) {
    %c0_i32 = arith.constant 0 : i32
    %c0_i32_0 = arith.constant 0 : i32
    %c0_i32_1 = arith.constant 0 : i32
    return %c0_i32, %c0_i32_0 : i32, i32
  }
  func.func @transform_6(%arg0: i32, %arg1: i32) -> (i32, i32) {
    %c0_i32 = arith.constant 0 : i32
    %c0_i32_0 = arith.constant 0 : i32
    %c0_i32_1 = arith.constant 0 : i32
    return %c0_i32, %c0_i32_0 : i32, i32
  }
  func.func @transform_7(%arg0: i32, %arg1: i32) -> (i32, i32) {
    %c0_i32 = arith.constant 0 : i32
    %c0_i32_0 = arith.constant 0 : i32
    %c0_i32_1 = arith.constant 0 : i32
    return %c0_i32, %c0_i32_0 : i32, i32
  }
  func.func @transform_8(%arg0: i32, %arg1: i32) -> (i32, i32) {
    %c0_i32 = arith.constant 0 : i32
    %c0_i32_0 = arith.constant 0 : i32
    %c0_i32_1 = arith.constant 0 : i32
    return %c0_i32, %c0_i32_0 : i32, i32
  }
  func.func @transform_9(%arg0: i32, %arg1: i32) -> (i32, i32) {
    %c0_i32 = arith.constant 0 : i32
    %c0_i32_0 = arith.constant 0 : i32
    %c0_i32_1 = arith.constant 0 : i32
    return %c0_i32, %c0_i32_0 : i32, i32
  }
  func.func @transform_10(%arg0: i32, %arg1: i32) -> (i32, i32) {
    %c0_i32 = arith.constant 0 : i32
    %c0_i32_0 = arith.constant 0 : i32
    %c0_i32_1 = arith.constant 0 : i32
    return %c0_i32, %c0_i32_0 : i32, i32
  }
  func.func @transform_11(%arg0: i32, %arg1: i32) -> (i32, i32) {
    %c0_i32 = arith.constant 0 : i32
    %c0_i32_0 = arith.constant 0 : i32
    %c0_i32_1 = arith.constant 0 : i32
    return %c0_i32, %c0_i32_0 : i32, i32
  }
  func.func @transform_12(%arg0: i32, %arg1: i32) -> (i32, i32) {
    %c0_i32 = arith.constant 0 : i32
    %c0_i32_0 = arith.constant 0 : i32
    %c0_i32_1 = arith.constant 0 : i32
    return %c0_i32, %c0_i32_0 : i32, i32
  }
  func.func @transform_13(%arg0: i32, %arg1: i32) -> (i32, i32) {
    %c0_i32 = arith.constant 0 : i32
    %c0_i32_0 = arith.constant 0 : i32
    %c0_i32_1 = arith.constant 0 : i32
    return %c0_i32, %c0_i32_0 : i32, i32
  }
  func.func @transform_14(%arg0: i32, %arg1: i32) -> (i32, i32) {
    %c0_i32 = arith.constant 0 : i32
    %c0_i32_0 = arith.constant 0 : i32
    %c0_i32_1 = arith.constant 0 : i32
    return %c0_i32, %c0_i32_0 : i32, i32
  }
  func.func @transform_15(%arg0: i32, %arg1: i32) -> (i32, i32, i32) {
    %c0_i32 = arith.constant 0 : i32
    %c0_i32_0 = arith.constant 0 : i32
    return %arg0, %arg1, %c0_i32 : i32, i32, i32
  }
}

</mosaic_0001>

<bundles_post_ra>
// kernel: tpu_custom_call.1
= control target key start
LH: loop header
LB: loop body
LE: loop exit
PB: predicated region body
PF: predicated region fallthrough
CT: control target
= control target key end

     0   :  { %s7252_s0 = inlined_call_operand.hbm [shape: f32[2,16,256], index: 0, kind: input, shape index: {}]   ;;  %s7253_s1 = inlined_call_operand.hbm [shape: f32[2,16,256], index: 1, kind: input, shape index: {}]   ;;  %s7254_s2 = inlined_call_operand.vmem [shape: f32[1,256], index: 2, kind: input, shape index: {}]   ;;  %s7255_s3 = inlined_call_operand.vmem [shape: f32[1,256], index: 3, kind: input, shape index: {}]   ;;  %s7256_s4 = inlined_call_operand.hbm [shape: bf16[256,256], index: 4, kind: input, shape index: {}]   ;;  %s7257_s5 = inlined_call_operand.hbm [shape: bf16[256,256], index: 5, kind: input, shape index: {}]   ;;  %s7258_s6 = inlined_call_operand.hbm [shape: bf16[256,256], index: 6, kind: input, shape index: {}]   ;;  %s7259_s7 = inlined_call_operand.hbm [shape: bf16[256,256], index: 7, kind: input, shape index: {}]   ;;  %s7260_s8 = inlined_call_operand.vmem [shape: f32[1,256], index: 8, kind: input, shape index: {}]   ;;  %s7261_s9 = inlined_call_operand.vmem [shape: f32[1,256], index: 9, kind: input, shape index: {}]   ;;  %s7262_s10 = inlined_call_operand.vmem [shape: f32[1,256], index: 10, kind: input, shape index: {}]   ;;  %s7263_s11 = inlined_call_operand.hbm [shape: bf16[256,1024], index: 11, kind: input, shape index: {}]   ;;  %s7264_s12 = inlined_call_operand.vmem [shape: f32[1,1024], index: 12, kind: input, shape index: {}]   ;;  %s7265_s13 = inlined_call_operand.hbm [shape: bf16[1024,256], index: 13, kind: input, shape index: {}]   ;;  %s7266_s14 = inlined_call_operand.vmem [shape: f32[1,256], index: 14, kind: input, shape index: {}]   ;;  %s7267_s15 = inlined_call_operand.hbm [shape: f32[2,16,256], index: 15, kind: output, shape index: {}]  }
   0x1   :  { %7274 = sst [smem:[#allocation25_spill]] %s7252_s0 }
   0x2   :  { %7275 = sst [smem:[#allocation26_spill]] %s7254_s2 }
   0x3   :  { %7276 = sst [smem:[#allocation27_spill]] %s7255_s3 }
   0x4   :  { %7277 = sst [smem:[#allocation28_spill]] %s7256_s4 }
   0x5   :  { %7278 = sst [smem:[#allocation29_spill]] %s7257_s5 }
   0x6   :  { %7279 = sst [smem:[#allocation30_spill]] %s7258_s6 }
   0x7   :  { %7280 = sst [smem:[#allocation31_spill]] %s7259_s7 }
   0x8   :  { %7281 = sst [smem:[#allocation32_spill]] %s7260_s8 }
   0x9   :  { %7282 = sst [smem:[#allocation33_spill]] %s7261_s9 }
   0xa   :  { %7283 = sst [smem:[#allocation34_spill]] %s7262_s10 }
   0xb   :  { %7284 = sst [smem:[#allocation35_spill]] %s7264_s12 }
   0xc   :  { %7285 = sst [smem:[#allocation36_spill]] %s7266_s14 }
   0xd   :  { %7286 = sst [smem:[#allocation37_spill]] %s7267_s15 }
   0xe   :  { %20 = vsyncpa [#allocation3], 0 }
   0xf   :  { %22 = vsyncpa [#allocation3 + $0x1], 0 }
  0x10   :  { %23 = vsyncpa [#allocation6], 0 }
  0x11   :  { %25 = vsyncpa [#allocation6 + $0x1], 0 }
  0x12   :  { %26 = vsyncpa [#allocation9], 0 }
  0x13   :  { %27 = vsyncpa [#allocation12], 0 }
  0x14   :  { %28 = vsyncpa [#allocation15], 0 }
  0x15   :  { %29 = vsyncpa [#allocation4], 0 }
  0x16   :  { %31 = vsyncpa [#allocation4 + $0x1], 0  ;;  %s6437_s18 = smov 0   ;;  %s6439_s19 = smov 0  }
  0x17   :  { %s6441_s20 = smov 0   ;;  %s6443_s21 = smov 0  }
  0x18   :  { %s6445_s22 = smov 0   ;;  %s6447_s23 = smov 0  }
  0x19 LB: > { %7287 = sst [smem:[#allocation24_spill]] %s6326_s21  ;;  %s6468_s24 = sadd.s32 4294967295, %s6334_s23   ;;  %s6334_s23 = sphi %s6447_s23, %s37_s23   ;;  %s6330_s22 = sphi %s6445_s22, %s7329_s22   ;;  %s6326_s21 = sphi %s6443_s21, %s7328_s21   ;;  %s6322_s20 = sphi %s6441_s20, %s7327_s20   ;;  %s6318_s19 = sphi %s6439_s19, %s7326_s19   ;;  %s6314_s18 = sphi %s6437_s18, %s7325_s18  }
  0x1a   : > { %p4849_p0 = scmp.ge.s32.totalorder %s6334_s23, 1  ;;  %p7269_p1 = scmp.eq.s32.totalorder %s6468_s24, 0 }
  0x1b   : > { %p409_p2 = scmp.lt.s32.totalorder %s6334_s23, 3  ;;  %s6336_s26 = smov [#allocation7]  }
  0x1c   : > { %s427_s27 = sshll.u32 %s6336_s26, 4  ;;  %s6337_s29 = smov [#allocation8]   ;;  %s6477_s27 = int_to_ptr.vmem [resolvable:$true] %s427_s27 }
  0x1d   : > { %p6473_p3 = pnand %p4849_p0, %p409_p2  ;;  %s440_s30 = sshll.u32 %s6337_s29, 4  ;;  %s6488_s30 = int_to_ptr.vmem [resolvable:$true] %s440_s30 }
  0x1e   : > { %s6338_s16 = smov [#allocation11]   ;;  %s7290_s4 = sld [smem:[#allocation28_spill]] }
  0x1f   : > { %s7288_s25 = scalar_select %p6473_p3, 1, 0 }
  0x20   : > { %p5445_p4 = pneg %p6473_p3  ;;  %s6490_s17 = sshll.u32 %s6338_s16, 4  ;;  %s467_s17 = int_to_ptr.vmem [resolvable:$true] %s6490_s17 }
  0x22   : > { %p6484_p6 = pnand %p5445_p4, %p7269_p1 }
  0x24   : > { %s6004_s14 = scalar_lea.hbm %s7290_s4, 4096  ;;  %p6500_p8 = pneg %p6484_p6 }
  0x25   : > { %p6005_p7 = scmp.ne.s32.totalorder %s7290_s4, %s6004_s14  ;;  %p6011_p11 = scmp.lt.u32.totalorder %s6004_s14, %s7290_s4 }
  0x27   : > { %p6007_p9 = pnand %p6500_p8, %p6005_p7 }
  0x29   : > { %p6008_p10 = pneg %p6007_p9 }
  0x2b   : > { %p6013_p12 = pnand %p6011_p11, %p6008_p10 }
  0x2d   : > { %6016 = shalt.err (!%p6013_p12)
}
  0x2e   : > { %s6017_s12 = scalar_lea.vmem %s6477_s27, 4096  ;;  %p6025_p4 = scmp.lt.s32.totalorder %s6477_s27, %s6477_s27 }
  0x2f   : > { %p6018_p13 = scmp.ne.s32.totalorder %s6477_s27, %s6017_s12  ;;  %p6026_p5 = scmp.lt.s32.totalorder %s6017_s12, %s6017_s12 }
  0x31   : > { %p6020_p0 = pnand %p6018_p13, %p6500_p8  ;;  %p6027_p7 = por %p6026_p5, %p6025_p4 }
  0x33   : > { %p6021_p2 = pneg %p6020_p0 }
  0x35   : > { %p6028_p9 = pnand %p6027_p7, %p6021_p2 }
  0x37   : > { %6031 = shalt.err (!%p6028_p9)
}
  0x38   : > { %s7271_s15 = smov 128   ;;  %s6340_s14 = smov 8  }
  0x39   : > { %5448 = dma.hbm_to_vmem [thread:$0]  (!%p6484_p6), %s7290_s4, 4096, %s6477_s27, [#allocation6], %s7271_s15, %s7271_s15, %s6340_s14  }
  0x3a   : > { %s7292_s5 = sld [smem:[#allocation29_spill]] }
  0x40   : > { %s6032_s12 = scalar_lea.hbm %s7292_s5, 4096 }
  0x41   : > { %p6033_p5 = scmp.ne.s32.totalorder %s7292_s5, %s6032_s12  ;;  %p6039_p12 = scmp.lt.u32.totalorder %s6032_s12, %s7292_s5 }
  0x43   : > { %p6035_p10 = pnand %p6033_p5, %p6500_p8 }
  0x45   : > { %p6036_p11 = pneg %p6035_p10 }
  0x47   : > { %p6041_p13 = pnand %p6039_p12, %p6036_p11 }
  0x49   : > { %6044 = shalt.err (!%p6041_p13)
}
  0x4a   : > { %s6045_s27 = scalar_lea.vmem %s6488_s30, 4096  ;;  %p6053_p7 = scmp.lt.s32.totalorder %s6488_s30, %s6488_s30 }
  0x4b   : > { %p6046_p0 = scmp.ne.s32.totalorder %s6488_s30, %s6045_s27  ;;  %p6054_p9 = scmp.lt.s32.totalorder %s6045_s27, %s6045_s27 }
  0x4d   : > { %p6048_p2 = pnand %p6046_p0, %p6500_p8  ;;  %p6055_p5 = por %p6054_p9, %p6053_p7 }
  0x4f   : > { %p6049_p4 = pneg %p6048_p2 }
  0x51   : > { %p6056_p10 = pnand %p6055_p5, %p6049_p4 }
  0x53   : > { %6059 = shalt.err (!%p6056_p10)
}
  0x54   : > { %5451 = dma.hbm_to_vmem [thread:$0]  (!%p6484_p6), %s7292_s5, 4096, %s6488_s30, [#allocation9], %s7271_s15, %s7271_s15, %s6340_s14  }
  0x55   : > { %s7293_s7 = sld [smem:[#allocation31_spill]] }
  0x5b   : > { %s6060_s21 = scalar_lea.hbm %s7293_s7, 4096 }
  0x5c   : > { %p6061_p11 = scmp.ne.s32.totalorder %s7293_s7, %s6060_s21  ;;  %p6067_p0 = scmp.lt.u32.totalorder %s6060_s21, %s7293_s7 }
  0x5e   : > { %p6063_p12 = pnand %p6061_p11, %p6500_p8 }
  0x60   : > { %p6064_p13 = pneg %p6063_p12 }
  0x62   : > { %p6069_p2 = pnand %p6067_p0, %p6064_p13 }
  0x64   : > { %6072 = shalt.err (!%p6069_p2)
}
  0x65   : > { %s6073_s27 = scalar_lea.vmem %s467_s17, 4096  ;;  %p6081_p5 = scmp.lt.s32.totalorder %s467_s17, %s467_s17 }
  0x66   : > { %p6074_p4 = scmp.ne.s32.totalorder %s467_s17, %s6073_s27  ;;  %p6082_p10 = scmp.lt.s32.totalorder %s6073_s27, %s6073_s27 }
  0x68   : > { %p6076_p7 = pnand %p6074_p4, %p6500_p8  ;;  %p6083_p1 = por %p6082_p10, %p6081_p5 }
  0x6a   : > { %p6077_p9 = pneg %p6076_p7 }
  0x6c   : > { %p6084_p3 = pnand %p6083_p1, %p6077_p9 }
  0x6e   : > { %6087 = shalt.err (!%p6084_p3)
}
  0x6f   : > { %5457 = dma.hbm_to_vmem [thread:$0]  (!%p6484_p6), %s7293_s7, 4096, %s467_s17, [#allocation12], %s7271_s15, %s7271_s15, %s6340_s14  }
  0x70   : > { %s6341_s3 = smov [#allocation10]   ;;  %s6342_s9 = smov [#allocation13]  }
  0x71   : > { %s453_s8 = sshll.u32 %s6341_s3, 4  ;;  %s488_s21 = sshll.u32 %s6342_s9, 4  ;;  %s454_s8 = int_to_ptr.vmem [resolvable:$true] %s453_s8  ;;  %s489_s21 = int_to_ptr.vmem [resolvable:$true] %s488_s21 }
  0x72   : > { %s7294_s6 = sld [smem:[#allocation30_spill]] }
  0x78   : > { %s6088_s16 = scalar_lea.hbm %s7294_s6, 4096 }
  0x79   : > { %p6089_p1 = scmp.ne.s32.totalorder %s7294_s6, %s6088_s16  ;;  %p6095_p12 = scmp.lt.u32.totalorder %s6088_s16, %s7294_s6 }
  0x7b   : > { %p6091_p3 = pnand %p6089_p1, %p6500_p8 }
  0x7d   : > { %p6092_p11 = pneg %p6091_p3 }
  0x7f   : > { %p6097_p13 = pnand %p6095_p12, %p6092_p11 }
  0x81   : > { %6100 = shalt.err (!%p6097_p13)
}
  0x82   : > { %s6101_s17 = scalar_lea.vmem %s454_s8, 4096  ;;  %p6109_p7 = scmp.lt.s32.totalorder %s454_s8, %s454_s8 }
  0x83   : > { %p6102_p0 = scmp.ne.s32.totalorder %s454_s8, %s6101_s17  ;;  %p6110_p9 = scmp.lt.s32.totalorder %s6101_s17, %s6101_s17 }
  0x85   : > { %p6104_p2 = pnand %p6102_p0, %p6500_p8  ;;  %p6111_p5 = por %p6110_p9, %p6109_p7 }
  0x87   : > { %p6105_p4 = pneg %p6104_p2 }
  0x89   : > { %p6112_p10 = pnand %p6111_p5, %p6105_p4 }
  0x8b   : > { %6115 = shalt.err (!%p6112_p10)
}
  0x8c   : > { %5454 = dma.hbm_to_vmem [thread:$0]  (!%p6484_p6), %s7294_s6, 4096, %s454_s8, [#allocation9], %s7271_s15, %s7271_s15, %s6340_s14  }
  0x8d   : > { %s6116_s26 = scalar_lea.hbm %s7263_s11, 16384 }
  0x8e   : > { %p6117_p1 = scmp.ne.s32.totalorder %s7263_s11, %s6116_s26  ;;  %p6123_p12 = scmp.lt.u32.totalorder %s6116_s26, %s7263_s11 }
  0x90   : > { %p6119_p3 = pnand %p6117_p1, %p6500_p8 }
  0x92   : > { %p6120_p11 = pneg %p6119_p3 }
  0x94   : > { %p6125_p13 = pnand %p6123_p12, %p6120_p11 }
  0x96   : > { %6128 = shalt.err (!%p6125_p13)
}
  0x97   : > { %s6129_s30 = scalar_lea.vmem %s489_s21, 16384  ;;  %p6137_p7 = scmp.lt.s32.totalorder %s489_s21, %s489_s21 }
  0x98   : > { %p6130_p0 = scmp.ne.s32.totalorder %s489_s21, %s6129_s30  ;;  %p6138_p9 = scmp.lt.s32.totalorder %s6129_s30, %s6129_s30 }
  0x9a   : > { %p6132_p2 = pnand %p6130_p0, %p6500_p8  ;;  %p6139_p5 = por %p6138_p9, %p6137_p7 }
  0x9c   : > { %p6133_p4 = pneg %p6132_p2 }
  0x9e   : > { %p6140_p10 = pnand %p6139_p5, %p6133_p4 }
  0xa0   : > { %6143 = shalt.err (!%p6140_p10)
}
  0xa1   : > { %s6343_s8 = smov 512   ;;  %s6344_s17 = smov 32  }
  0xa2   : > { %5460 = dma.hbm_to_vmem [thread:$0]  (!%p6484_p6), %s7263_s11, 16384, %s489_s21, [#allocation12], %s6343_s8, %s6343_s8, %s6344_s17  }
  0xa3   : > { %s6345_s3 = smov [#allocation14]   ;;  %s6144_s16 = scalar_lea.hbm %s7265_s13, 16384 }
  0xa4   : > { %s504_s9 = sshll.u32 %s6345_s3, 4  ;;  %p6145_p1 = scmp.ne.s32.totalorder %s7265_s13, %s6144_s16  ;;  %s505_s9 = int_to_ptr.vmem [resolvable:$true] %s504_s9 }
  0xa5   : > { %p6151_p12 = scmp.lt.u32.totalorder %s6144_s16, %s7265_s13 }
  0xa6   : > { %p6147_p3 = pnand %p6145_p1, %p6500_p8 }
  0xa8   : > { %p6148_p11 = pneg %p6147_p3 }
  0xaa   : > { %p6153_p13 = pnand %p6151_p12, %p6148_p11 }
  0xac   : > { %6156 = shalt.err (!%p6153_p13)
}
  0xad   : > { %s6157_s21 = scalar_lea.vmem %s505_s9, 16384  ;;  %p6165_p7 = scmp.lt.s32.totalorder %s505_s9, %s505_s9 }
  0xae   : > { %p6158_p0 = scmp.ne.s32.totalorder %s505_s9, %s6157_s21  ;;  %p6166_p9 = scmp.lt.s32.totalorder %s6157_s21, %s6157_s21 }
  0xb0   : > { %p6160_p2 = pnand %p6158_p0, %p6500_p8  ;;  %p6167_p5 = por %p6166_p9, %p6165_p7 }
  0xb2   : > { %p6161_p4 = pneg %p6160_p2 }
  0xb4   : > { %p6168_p10 = pnand %p6167_p5, %p6161_p4 }
  0xb6   : > { %6171 = shalt.err (!%p6168_p10)
}
  0xb7   : > { %s7295_s8 = smov 128   ;;  %s4848_s10 = sadd.s32 4294967294, %s6334_s23  }
  0xb8   : > { %5463 = dma.hbm_to_vmem [thread:$0]  (!%p6484_p6), %s7265_s13, 16384, %s505_s9, [#allocation15], %s7295_s8, %s7295_s8, %s6340_s14  }
  0xb9   : > { %s49_s28 = sadd.s32 1, %s6330_s22  ;;  %s58_s4 = sadd.s32 1, %s6322_s20 }
  0xba   : > { %p51_p8 = scmp.ge.s32.totalorder %s49_s28, 2  ;;  %p65_p1 = scmp.ne.s32.totalorder %s6322_s20, %s6318_s19 }
  0xbb   : > { %p66_p3 = scmp.eq.s32.totalorder %s6334_s23, 0  ;;  %p71_p12 = scmp.ne.s32.totalorder %s6318_s19, %s6314_s18 }
  0xbc   : > { %s7331_s28 = smov (%p51_p8, %s49_s28), 0  ;;  %p396_p6 = scmp.eq.s32.totalorder %s6468_s24, 1 }
  0xbd   : > { %p6640_p11 = por %p66_p3, %p65_p1  ;;  %s53_s14 = ssub.s32 %s6330_s22, %s7331_s28 }
  0xbe   : > { %p56_p13 = scmp.eq.s32.totalorder %s53_s14, 0  ;;  %p7297_p0 = scmp.eq.s32.totalorder %s6468_s24, 0 }
  0xbf   : > { %p6655_p4 = por %p396_p6, %p65_p1  ;;  %p402_p7 = scmp.eq.s32.totalorder %s4848_s10, 1 }
  0xc0   : > { %p6651_p2 = por %p7297_p0, %p71_p12  ;;  %p5481_p5 = scmp.lt.s32.totalorder %s6334_s23, 2 }
  0xc1   : > { %s7299_s9 = scalar_select %p6655_p4, 1, 0 }
  0xc2   : > { %s6660_s26 = scalar_select %p56_p13, %s6322_s20, %s58_s4  }
  0xc3   : > { %p6662_p9 = por %p402_p7, %p71_p12  ;;  %s521_s16 = sand.u32 1, %s6322_s20  }
  0xc4   : > { %s7272_s12 = sshll.u32 %s6330_s22, 9  ;;  %s6669_s27 = sshll.u32 %s521_s16, 5 }
  0xc5   : > { %s7300_s29 = scalar_select %p6662_p9, 1, 0 }
  0xc6   : > { %s7301_s0 = sld [smem:[#allocation25_spill]]  ;;  %s525_s15 = scalar_lea.vmem [#allocation2], %s6669_s27 }
  0xc7   : > { %s535_s17 = sshll.u32 %s525_s15, 4  ;;  %p6681_p10 = pnand %p5481_p5, %p6640_p11  ;;  %s6685_s17 = int_to_ptr.vmem [resolvable:$true] %s535_s17 }
  0xc8   : > { %s6687_s4 = scalar_lea.sflag [#allocation3], %s521_s16 }
  0xc9   : > { %p6174_p1 = pneg %p6681_p10 }
  0xcc   : > { %s6676_s8 = scalar_lea.hbm %s7301_s0, %s7272_s12  ;;  %s6177_s21 = scalar_lea.hbm %s7301_s0, 1024 }
  0xcd   : > { %s6172_s14 = scalar_lea.hbm %s6676_s8, 512  ;;  %p6178_p11 = scmp.lt.u32.totalorder %s6676_s8, %s7301_s0 }
  0xce   : > { %p6173_p8 = scmp.ne.s32.totalorder %s6676_s8, %s6172_s14  ;;  %p6179_p6 = scmp.lt.u32.totalorder %s6177_s21, %s6172_s14 }
  0xcf   : > { %p6181_p0 = scmp.lt.u32.totalorder %s6172_s14, %s6676_s8 }
  0xd0   : > { %p6175_p3 = pnand %p6174_p1, %p6173_p8  ;;  %p6180_p13 = por %p6179_p6, %p6178_p11 }
  0xd2   : > { %p6176_p12 = pneg %p6175_p3  ;;  %p6182_p7 = por %p6181_p0, %p6180_p13 }
  0xd4   : > { %p6183_p5 = pnand %p6182_p7, %p6176_p12 }
  0xd6   : > { %6186 = shalt.err (!%p6183_p5)
}
  0xd7   : > { %s6187_s16 = scalar_lea.vmem %s6685_s17, 512  ;;  %s6346_s30 = smov [#allocation2]  }
  0xd8   : > { %p6188_p8 = scmp.ne.s32.totalorder %s6685_s17, %s6187_s16  ;;  %s6192_s2 = sshll.u32 %s6346_s30, 4  ;;  %s6193_s2 = int_to_ptr.vmem [resolvable:$false] %s6192_s2 }
  0xd9   : > { %s6194_s12 = scalar_lea.vmem %s6193_s2, 1024  ;;  %p6195_p4 = scmp.lt.s32.totalorder %s6685_s17, %s6193_s2 }
  0xda   : > { %p6190_p3 = pnand %p6188_p8, %p6174_p1  ;;  %p6196_p11 = scmp.lt.s32.totalorder %s6194_s12, %s6187_s16 }
  0xdc   : > { %p6191_p9 = pneg %p6190_p3  ;;  %p6197_p6 = por %p6196_p11, %p6195_p4 }
  0xde   : > { %p6198_p13 = pnand %p6197_p6, %p6191_p9 }
  0xe0   : > { %6201 = shalt.err (!%p6198_p13)
}
  0xe1   : > { %s6347_s14 = smov 256   ;;  %s6348_s21 = smov 16  }
  0xe2   : > { %5467 = dma.hbm_to_vmem [thread:$0]  (!%p6681_p10), %s6676_s8, 512, %s6685_s17, %s6687_s4, %s6347_s14, %s6347_s14, %s6348_s21  }
  0xe3   : > { %s7303_s15 = sshll.u32 %s6330_s22, 9  ;;  %s549_s12 = scalar_lea.vmem [#allocation5], %s6669_s27 }
  0xe4   : > { %s6723_s2 = scalar_lea.hbm %s7253_s1, %s7303_s15  ;;  %s556_s0 = sshll.u32 %s549_s12, 4  ;;  %s6727_s0 = int_to_ptr.vmem [resolvable:$true] %s556_s0 }
  0xe5   : > { %s545_s5 = sand.u32 1, %s6334_s23   ;;  %s6202_s7 = scalar_lea.hbm %s6723_s2, 512 }
  0xe6   : > { %s6729_s6 = scalar_lea.sflag [#allocation6], %s545_s5  ;;  %p6203_p4 = scmp.ne.s32.totalorder %s6723_s2, %s6202_s7 }
  0xe7   : > { %s6207_s4 = scalar_lea.hbm %s7253_s1, 1024  ;;  %p6208_p0 = scmp.lt.u32.totalorder %s6723_s2, %s7253_s1 }
  0xe8   : > { %p6205_p9 = pnand %p6203_p4, %p6174_p1  ;;  %p6209_p7 = scmp.lt.u32.totalorder %s6207_s4, %s6202_s7 }
  0xe9   : > { %p6211_p8 = scmp.lt.u32.totalorder %s6202_s7, %s6723_s2 }
  0xea   : > { %p6206_p12 = pneg %p6205_p9  ;;  %p6210_p5 = por %p6209_p7, %p6208_p0 }
  0xec   : > { %p6212_p3 = por %p6211_p8, %p6210_p5 }
  0xee   : > { %p6213_p11 = pnand %p6212_p3, %p6206_p12 }
  0xf0   : > { %6216 = shalt.err (!%p6213_p11)
}
  0xf1   : > { %s6217_s5 = scalar_lea.vmem %s6727_s0, 512  ;;  %s6349_s27 = smov [#allocation5]  }
  0xf2   : > { %p6218_p6 = scmp.ne.s32.totalorder %s6727_s0, %s6217_s5  ;;  %s6222_s30 = sshll.u32 %s6349_s27, 4  ;;  %s6223_s30 = int_to_ptr.vmem [resolvable:$false] %s6222_s30 }
  0xf3   : > { %s6224_s12 = scalar_lea.vmem %s6223_s30, 1024  ;;  %p6225_p9 = scmp.lt.s32.totalorder %s6727_s0, %s6223_s30 }
  0xf4   : > { %p6220_p13 = pnand %p6218_p6, %p6174_p1  ;;  %p6226_p0 = scmp.lt.s32.totalorder %s6224_s12, %s6217_s5 }
  0xf6   : > { %p6221_p4 = pneg %p6220_p13  ;;  %p6227_p7 = por %p6226_p0, %p6225_p9 }
  0xf8   : > { %p6228_p5 = pnand %p6227_p7, %p6221_p4 }
  0xfa   : > { %6231 = shalt.err (!%p6228_p5)
}
  0xfb   : > { %5470 = dma.hbm_to_vmem [thread:$0]  (!%p6681_p10), %s6723_s2, 512, %s6727_s0, %s6729_s6, %s6347_s14, %s6347_s14, %s6348_s21  }
  0xfc   : > { %p7304_p1 = scmp.ne.s32.totalorder %s7288_s25, 0 }
  0xfd   : > { %s6761_s7 = sand.u32 (!%p7304_p1), 1, %s6318_s19  }
  0xfe   : > { %568 = sbr.rel (%p7304_p1) target bundleno = 3139 (0xc43), region = 80  ;;  %s6764_s8 = sshll.u32 (!%p7304_p1), %s6761_s7, 5 }
  0xff   : > { %s571_s10 = scalar_lea.sflag (!%p7304_p1), [#allocation3], %s6761_s7  ;;  %s6768_s17 = scalar_lea.vmem (!%p7304_p1), [#allocation2], %s6764_s8 }
 0x105   : > { %6285 = dma.done.wait (%p6651_p2), %s571_s10, 512  }
 0x106   : > { %6287 = vsyncadd (%p6651_p2), %s571_s10, 4294966784  ;;  %s579_s0 = sand.u32 1, %s6468_s24   ;;  %s583_s25 = scalar_lea.vmem [#allocation5], %s6764_s8 }
 0x107   : > { %s580_s6 = scalar_lea.sflag [#allocation6], %s579_s0 }
 0x108   : > { %6289 = dma.done.wait (%p6651_p2), %s580_s6, 512  }
 0x109   : > { %6291 = vsyncadd (%p6651_p2), %s580_s6, 4294966784  ;;  %p7305_p10 = scmp.eq.s32.totalorder %s6468_s24, 0 }
 0x10b   : > { %6293 = dma.done.wait (%p7305_p10), [#allocation6], 4096   ;;  %p7306_p12 = pmov %p7305_p10 }
 0x10c   : > { %p7307_p8 = pmov %p7305_p10 }
 0x10d   : > { %6295 = vsyncadd (%p7306_p12), [#allocation6], 4294963200 }
 0x10e   : > { %6297 = dma.done.wait (%p7307_p8), [#allocation9], 8192   ;;  %p7308_p3 = pmov %p7307_p8 }
 0x110   : > { %6299 = vsyncadd (%p7308_p3), [#allocation9], 4294959104  ;;  %p7309_p11 = pmov %p7308_p3 }
 0x111   : > { %p7310_p6 = pmov %p7308_p3 }
 0x112   : > { %6301 = dma.done.wait (%p7309_p11), [#allocation12], 20480  }
 0x113   : > { %6303 = vsyncadd (%p7310_p6), [#allocation12], 4294946816  ;;  %p7311_p2 = pmov %p7308_p3 }
 0x115   : > { %6305 = dma.done.wait (%p7311_p2), [#allocation15], 16384   ;;  %p7312_p13 = pmov %p7311_p2 }
 0x116   : > { %v662_v0 = vld [vmem:[%s6768_s17] sm:$0xff]  ;;  %v663_v1 = vld [vmem:[%s6768_s17 + $0x8] sm:$0xff]  ;;  %v6799_v5 = vld [vmem:[%s6768_s17 + $0x10] sm:$0xff]  ;;  %s7313_s14 = sld [smem:[#allocation26_spill]]  ;;  %s7314_s4 = sld [smem:[#allocation27_spill]]  ;;  %vm6351_vm0 = vmmov 0  }
 0x117   : > { %6307 = vsyncadd (%p7312_p13), [#allocation15], 4294950912  ;;  %v666_v2 = vld [vmem:[%s583_s25] sm:$0xff]  ;;  %v672_v3 = vadd.f32 %v663_v1, %v662_v0  ;;  %v667_v4 = vld [vmem:[%s583_s25 + $0x8] sm:$0xff]  ;;  %vm1627_vm2 = vcmask 130048   ;;  %s7315_s5 = sld [smem:[#allocation32_spill]] }
 0x118   : > { %v6802_v6 = vld [vmem:[%s6768_s17 + $0x18] sm:$0xff]  ;;  %v737_v7 = vadd.f32 %v667_v4, %v666_v2  ;;  %v6804_v8 = vld [vmem:[%s583_s25 + $0x10] sm:$0xff]  ;;  %v5556_v12 = vld [vmem:[#allocation7 + $0x4] ss:$8 sps:$4 sm:$0xff]   ;;  %s7316_s12 = sld [smem:[#allocation33_spill]]  ;;  %s7317_s0 = sld [smem:[#allocation34_spill]] }
 0x119   : > { %v6806_v9 = vld [vmem:[%s583_s25 + $0x18] sm:$0xff]  ;;  %673 = vadd.xlane.f32.xlu0 %v672_v3  ;;  %v675_v10 = vadd.f32 %v6802_v6, %v6799_v5  ;;  %v5558_v13 = vld [vmem:[#allocation7] ss:$8 sps:$4 sm:$0xff]   ;;  %971 = vmatprep.subr.bf16.mxu0 %v5556_v12  ;;  %v5562_v16 = vld [vmem:[#allocation7 + $0x24] ss:$8 sps:$4 sm:$0xff]   ;;  %v706_v12 = vlaneseq  ;;  %s7318_s24 = sld [smem:[#allocation35_spill]] }
 0x11a   : > { %738 = vadd.xlane.f32.xlu1 %v737_v7  ;;  %v740_v11 = vadd.f32 %v6806_v9, %v6804_v8  ;;  %v5559_v14 = vld [vmem:[#allocation7 + $0x14] ss:$8 sps:$4 sm:$0xff]   ;;  %972 = vmatpush1.bf16.msra.mxu0 %v5558_v13  ;;  %v5561_v15 = vld [vmem:[#allocation7 + $0x10] ss:$8 sps:$4 sm:$0xff]   ;;  %v5564_v17 = vld [vmem:[#allocation7 + $0x20] ss:$8 sps:$4 sm:$0xff]  }
 0x11b   : > { %973 = vmatprep.subr.bf16.mxu0 %v5559_v14  ;;  %v5565_v18 = vld [vmem:[#allocation7 + $0x34] ss:$8 sps:$4 sm:$0xff]   ;;  %v5567_v19 = vld [vmem:[#allocation7 + $0x30] ss:$8 sps:$4 sm:$0xff]   ;;  %v5568_v20 = vld [vmem:[#allocation7 + $0x44] ss:$8 sps:$4 sm:$0xff]  }
 0x11c   : > { %v5570_v21 = vld [vmem:[#allocation7 + $0x40] ss:$8 sps:$4 sm:$0xff]   ;;  %v5571_v22 = vld [vmem:[#allocation7 + $0x54] ss:$8 sps:$4 sm:$0xff]   ;;  %v5573_v23 = vld [vmem:[#allocation7 + $0x50] ss:$8 sps:$4 sm:$0xff]  }
 0x11d   : > { %676 = vadd.xlane.f32.xlu0 %v675_v10  ;;  %v5574_v24 = vld [vmem:[#allocation7 + $0x64] ss:$8 sps:$4 sm:$0xff]   ;;  %v5576_v25 = vld [vmem:[#allocation7 + $0x60] ss:$8 sps:$4 sm:$0xff]   ;;  %v5577_v26 = vld [vmem:[#allocation7 + $0x74] ss:$8 sps:$4 sm:$0xff]  }
 0x11e   : > { %741 = vadd.xlane.f32.xlu1 %v740_v11  ;;  %974 = vmatpush1.bf16.msra.mxu0 %v5561_v15  ;;  %v5579_v27 = vld [vmem:[#allocation7 + $0x70] ss:$8 sps:$4 sm:$0xff]   ;;  %v5580_v28 = vld [vmem:[#allocation7 + $0x84] ss:$8 sps:$4 sm:$0xff]   ;;  %v5582_v29 = vld [vmem:[#allocation7 + $0x80] ss:$8 sps:$4 sm:$0xff]  }
 0x11f   : > { %975 = vmatprep.subr.bf16.mxu0 %v5562_v16  ;;  %v5583_v30 = vld [vmem:[#allocation7 + $0x94] ss:$8 sps:$4 sm:$0xff]   ;;  %v5585_v59 = vld [vmem:[#allocation7 + $0x90] ss:$8 sps:$4 sm:$0xff]   ;;  %v5586_v60 = vld [vmem:[#allocation7 + $0xa4] ss:$8 sps:$4 sm:$0xff]  }
 0x120   : > { %v5588_v61 = vld [vmem:[#allocation7 + $0xa0] ss:$8 sps:$4 sm:$0xff]   ;;  %v5589_v62 = vld [vmem:[#allocation7 + $0xb4] ss:$8 sps:$4 sm:$0xff]   ;;  %v5591_v63 = vld [vmem:[#allocation7 + $0xb0] ss:$8 sps:$4 sm:$0xff]  }
 0x121   : > { %v5597_v3 = vld [vmem:[#allocation7 + $0xd0] ss:$8 sps:$4 sm:$0xff]   ;;  %s7319_s3 = sld [smem:[#allocation24_spill]]  ;;  %s7320_s2 = sld [smem:[#allocation36_spill]] }
 0x122   : > { %976 = vmatpush1.bf16.msra.mxu0 %v5564_v17  ;;  %v5603_v7 = vld [vmem:[#allocation7 + $0xf0] ss:$8 sps:$4 sm:$0xff]   ;;  %s7321_s27 = sld [smem:[#allocation37_spill]]  ;;  %p7322_p9 = scmp.ne.s32.totalorder %s7299_s9, 0 }
 0x123   : > { %977 = vmatprep.subr.bf16.mxu0 %v5565_v18 }
 0x126   : > { %978 = vmatpush1.bf16.msra.mxu0 %v5567_v19  ;;  %v6849_v19 = vshrl.u32 %v706_v12, 7 }
 0x127   : > { %979 = vmatprep.subr.bf16.mxu0 %v5568_v20  ;;  %s5284_s16 = sshll.u32 %s7319_s3, 9 }
 0x128   : > { %s7202_s30 = scalar_lea.hbm %s7321_s27, %s5284_s16 }
 0x12a   : > { %980 = vmatpush1.bf16.msra.mxu0 %v5570_v21 }
 0x12b   : > { %981 = vmatprep.subr.bf16.mxu0 %v5571_v22 }
 0x12e   : > { %982 = vmatpush1.bf16.msra.mxu0 %v5573_v23  ;;  %v6852_v23 = vsub.s32 0, %v6849_v19 }
 0x12f   : > { %983 = vmatprep.subr.bf16.mxu0 %v5574_v24  ;;  %v6855_v24 = vsub.s32 1, %v6849_v19 }
 0x132   : > { %984 = vmatpush1.bf16.msra.mxu0 %v5576_v25  ;;  %v670_v25 = vld [vmem:[%s7313_s14] sm:$0x3] }
 0x133   : > { %985 = vmatprep.subr.bf16.mxu0 %v5577_v26 }
 0x136   : > { %986 = vmatpush1.bf16.msra.mxu0 %v5579_v27  ;;  %v709_v27 = vrot.slane %v670_v25, %v6852_v23 }
 0x137   : > { %987 = vmatprep.subr.bf16.mxu0 %v5580_v28  ;;  %v713_v28 = vrot.slane %v670_v25, %v6855_v24  ;;  %v5637_v25 = vld [vmem:[#allocation8 + $0xb0] ss:$8 sps:$4 sm:$0xff]  }
 0x13a   : > { %988 = vmatpush1.bf16.msra.mxu0 %v5582_v29  ;;  %v671_v29 = vld [vmem:[%s7314_s4] sm:$0x3]  ;;  %s658_s4 = scalar_lea.vmem [#allocation16], %s6764_s8 }
 0x13b   : > { %989 = vmatprep.subr.bf16.mxu0 %v5583_v30  ;;  %s4680_s15 = sshll.u32 %s658_s4, 4  ;;  %s7195_s15 = int_to_ptr.vmem [resolvable:$true] %s4680_s15 }
 0x13c   : > { %s6232_s10 = scalar_lea.vmem %s7195_s15, 512 }
 0x13d   : > { %p6233_p4 = scmp.ne.s32.totalorder %s7195_s15, %s6232_s10 }
 0x13e   : > { %990 = vmatpush1.bf16.msra.mxu0 %v5585_v59 }
 0x13f   : > { %991 = vmatprep.subr.bf16.mxu0 %v5586_v60  ;;  %p6234_p0 = pnand %p6233_p4, %p7322_p9 }
 0x141   : > { %p6235_p7 = pneg %p6234_p0 }
 0x142   : > { %992 = vmatpush1.bf16.msra.mxu0 %v5588_v61 }
 0x143   : > { %993 = vmatprep.subr.bf16.mxu0 %v5589_v62 }
 0x146   : > { %994 = vmatpush1.bf16.msra.mxu0 %v5591_v63 }
 0x1a6   : > { %v674_v31 = vpop.xlane.xlu0 %673 }
 0x1a7   : > { %v679_v32 = vmul.f32 0.00390625, %v674_v31  ;;  %v739_v33 = vpop.xlane.xlu1 %738 }
 0x1a8   : > { %v743_v34 = vmul.f32 0.00390625, %v739_v33 }
 0x1a9   : > { %v6812_v35 = vsub.f32 %v662_v0, %v679_v32  ;;  %v6814_v36 = vsub.f32 %v663_v1, %v679_v32  ;;  %v5592_v0 = vld [vmem:[#allocation7 + $0xc4] ss:$8 sps:$4 sm:$0xff]   ;;  %v5594_v1 = vld [vmem:[#allocation7 + $0xc0] ss:$8 sps:$4 sm:$0xff]  }
 0x1aa   : > { %v6816_v37 = vsub.f32 %v666_v2, %v743_v34  ;;  %v6818_v38 = vsub.f32 %v667_v4, %v743_v34  ;;  %v677_v39 = vpop.xlane.xlu0 %676  ;;  %995 = vmatprep.subr.bf16.mxu0 %v5592_v0  ;;  %v5595_v2 = vld [vmem:[#allocation7 + $0xd4] ss:$8 sps:$4 sm:$0xff]   ;;  %v5598_v4 = vld [vmem:[#allocation7 + $0xe4] ss:$8 sps:$4 sm:$0xff]   ;;  %v724_v34 = vrot.slane %v671_v29, %v6852_v23 }
 0x1ab   : > { %v680_v40 = vmul.f32 0.00390625, %v677_v39  ;;  %v742_v41 = vpop.xlane.xlu1 %741  ;;  %v685_v42 = vmul.f32 %v6812_v35, %v6812_v35  ;;  %v686_v43 = vmul.f32 %v6814_v36, %v6814_v36  ;;  %996 = vmatpush1.bf16.msra.mxu0 %v5594_v1  ;;  %v728_v39 = vrot.slane %v671_v29, %v6855_v24  ;;  %v5607_v1 = vld [vmem:[#allocation8 + $0x10] ss:$8 sps:$4 sm:$0xff]  }
 0x1ac   : > { %v744_v44 = vmul.f32 0.00390625, %v742_v41  ;;  %v749_v45 = vmul.f32 %v6816_v37, %v6816_v37  ;;  %v750_v46 = vmul.f32 %v6818_v38, %v6818_v38  ;;  %997 = vmatprep.subr.bf16.mxu0 %v5595_v2  ;;  %v5643_v29 = vld [vmem:[#allocation8 + $0xd0] ss:$8 sps:$4 sm:$0xff]  }
 0x1ad   : > { %v6829_v47 = vsub.f32 %v6799_v5, %v680_v40  ;;  %v6832_v48 = vsub.f32 %v6802_v6, %v680_v40  ;;  %v689_v49 = vadd.f32 %v686_v43, %v685_v42  ;;  %v5600_v5 = vld [vmem:[#allocation7 + $0xe0] ss:$8 sps:$4 sm:$0xff]   ;;  %v5601_v6 = vld [vmem:[#allocation7 + $0xf4] ss:$8 sps:$4 sm:$0xff]  }
 0x1ae   : > { %v6835_v50 = vsub.f32 %v6804_v8, %v744_v44  ;;  %v6838_v51 = vsub.f32 %v6806_v9, %v744_v44  ;;  %v753_v52 = vadd.f32 %v750_v46, %v749_v45  ;;  %v5606_v8 = vld [vmem:[#allocation8 + $0x4] ss:$8 sps:$4 sm:$0xff]  }
 0x1af   : > { %690 = vadd.xlane.f32.xlu0 %v689_v49  ;;  %v687_v53 = vmul.f32 %v6829_v47, %v6829_v47  ;;  %v688_v54 = vmul.f32 %v6832_v48, %v6832_v48  ;;  %998 = vmatpush1.bf16.msra.mxu0 %v5597_v3  ;;  %v5610_v3 = vld [vmem:[#allocation8 + $0x20] ss:$8 sps:$4 sm:$0xff]  }
 0x1b0   : > { %v751_v55 = vmul.f32 %v6835_v50, %v6835_v50  ;;  %v752_v56 = vmul.f32 %v6838_v51, %v6838_v51  ;;  %999 = vmatprep.subr.bf16.mxu0 %v5598_v4  ;;  %v5615_v4 = vld [vmem:[#allocation8 + $0x34] ss:$8 sps:$4 sm:$0xff]  }
 0x1b1   : > { %v692_v57 = vadd.f32 %v688_v54, %v687_v53 }
 0x1b2   : > { %v756_v58 = vadd.f32 %v752_v56, %v751_v55 }
 0x1b3   : > { %754 = vadd.xlane.f32.xlu0 %v753_v52  ;;  %693 = vadd.xlane.f32.xlu1 %v692_v57 }
 0x1b4   : > { %1000 = vmatpush1.bf16.msra.mxu0 %v5600_v5  ;;  %v5613_v5 = vld [vmem:[#allocation8 + $0x30] ss:$8 sps:$4 sm:$0xff]  }
 0x1b5   : > { %1001 = vmatprep.subr.bf16.mxu0 %v5601_v6  ;;  %v5618_v6 = vld [vmem:[#allocation8 + $0x44] ss:$8 sps:$4 sm:$0xff]  }
 0x1b7   : > { %757 = vadd.xlane.f32.xlu1 %v756_v58 }
 0x1b8   : > { %1002 = vmatpush1.bf16.msra.mxu0 %v5603_v7  ;;  %v5616_v7 = vld [vmem:[#allocation8 + $0x40] ss:$8 sps:$4 sm:$0xff]  }
 0x1b9   : > { %1206 = vmatprep.subr.bf16.mxu0 %v5606_v8  ;;  %v5621_v8 = vld [vmem:[#allocation8 + $0x54] ss:$8 sps:$4 sm:$0xff]  }
 0x23c   : > { %v691_v9 = vpop.xlane.xlu0 %690 }
 0x23d   : > { %v695_v10 = vmul.f32 0.00390625, %v691_v9  ;;  %v5619_v9 = vld [vmem:[#allocation8 + $0x50] ss:$8 sps:$4 sm:$0xff]  }
 0x23f   : > { %v697_v11 = vadd.f32 1e-05, %v695_v10  ;;  %v5624_v10 = vld [vmem:[#allocation8 + $0x64] ss:$8 sps:$4 sm:$0xff]  }
 0x240   : > { %v694_v13 = vpop.xlane.xlu1 %693  ;;  %v755_v14 = vpop.xlane.xlu0 %754 }
 0x241   : > { %5940 = vrsqrt.f32 %v697_v11  ;;  %v696_v15 = vmul.f32 0.00390625, %v694_v13  ;;  %v759_v16 = vmul.f32 0.00390625, %v755_v14  ;;  %v5622_v11 = vld [vmem:[#allocation8 + $0x60] ss:$8 sps:$4 sm:$0xff]   ;;  %v5627_v13 = vld [vmem:[#allocation8 + $0x74] ss:$8 sps:$4 sm:$0xff]  }
 0x242   : > { %v5625_v14 = vld [vmem:[#allocation8 + $0x70] ss:$8 sps:$4 sm:$0xff]  }
 0x243   : > { %v698_v17 = vadd.f32 1e-05, %v696_v15  ;;  %v761_v18 = vadd.f32 1e-05, %v759_v16  ;;  %v5630_v15 = vld [vmem:[#allocation8 + $0x84] ss:$8 sps:$4 sm:$0xff]  }
 0x244   : > { %v758_v20 = vpop.xlane.xlu1 %757  ;;  %v5628_v16 = vld [vmem:[#allocation8 + $0x80] ss:$8 sps:$4 sm:$0xff]  }
 0x245   : > { %5942 = vrsqrt.f32 %v698_v17  ;;  %v760_v21 = vmul.f32 0.00390625, %v758_v20  ;;  %v5633_v17 = vld [vmem:[#allocation8 + $0x94] ss:$8 sps:$4 sm:$0xff]   ;;  %v5636_v20 = vld [vmem:[#allocation8 + $0xa4] ss:$8 sps:$4 sm:$0xff]  }
 0x246   : > { %5944 = vrsqrt.f32 %v761_v18  ;;  %v5631_v18 = vld [vmem:[#allocation8 + $0x90] ss:$8 sps:$4 sm:$0xff]  }
 0x247   : > { %v762_v22 = vadd.f32 1e-05, %v760_v21  ;;  %v5634_v21 = vld [vmem:[#allocation8 + $0xa0] ss:$8 sps:$4 sm:$0xff]  }
 0x249   : > { %5946 = vrsqrt.f32 %v762_v22  ;;  %v5639_v22 = vld [vmem:[#allocation8 + $0xb4] ss:$8 sps:$4 sm:$0xff]  }
 0x24b   : > { %v5941_v26 = vpop.eup %5940 }
 0x24c   : > { %v702_v30 = vmul.f32 %v5941_v26, %v6814_v36  ;;  %v701_v31 = vmul.f32 %v5941_v26, %v6812_v35  ;;  %v5642_v26 = vld [vmem:[#allocation8 + $0xc4] ss:$8 sps:$4 sm:$0xff]  }
 0x24e   : > { %v717_v33 = vmul.f32 %v713_v28, %v702_v30  ;;  %v716_v40 = vmul.f32 %v709_v27, %v701_v31  ;;  %v5648_v30 = vld [vmem:[#allocation8 + $0xe4] ss:$8 sps:$4 sm:$0xff]   ;;  %v5646_v31 = vld [vmem:[#allocation8 + $0xe0] ss:$8 sps:$4 sm:$0xff]  }
 0x24f   : > { %v5943_v32 = vpop.eup %5942 }
 0x250   : > { %v5945_v41 = vpop.eup %5944  ;;  %v704_v42 = vmul.f32 %v5943_v32, %v6832_v48  ;;  %v703_v43 = vmul.f32 %v5943_v32, %v6829_v47  ;;  %v732_v35 = vadd.f32 %v728_v39, %v717_v33  ;;  %v731_v52 = vadd.f32 %v724_v34, %v716_v40  ;;  %v5604_v47 = vld [vmem:[#allocation8] ss:$8 sps:$4 sm:$0xff]   ;;  %v5651_v32 = vld [vmem:[#allocation8 + $0xf4] ss:$8 sps:$4 sm:$0xff]   ;;  %v5649_v33 = vld [vmem:[#allocation8 + $0xf0] ss:$8 sps:$4 sm:$0xff]  }
 0x251   : > { %v765_v44 = vmul.f32 %v5945_v41, %v6816_v37  ;;  %v766_v45 = vmul.f32 %v5945_v41, %v6818_v38  ;;  %v5609_v38 = vld [vmem:[#allocation8 + $0x14] ss:$8 sps:$4 sm:$0xff]   ;;  %v5655_v41 = vld [vmem:[#allocation10 + $0x10] ss:$8 sps:$4 sm:$0xff]  }
 0x252   : > { %v719_v46 = vmul.f32 %v713_v28, %v704_v42  ;;  %v718_v36 = vmul.f32 %v709_v27, %v703_v43  ;;  %v5657_v40 = vld [vmem:[#allocation10 + $0x14] ss:$8 sps:$4 sm:$0xff]   ;;  %v5660_v42 = vld [vmem:[#allocation10 + $0x24] ss:$8 sps:$4 sm:$0xff]   ;;  %v5658_v43 = vld [vmem:[#allocation10 + $0x20] ss:$8 sps:$4 sm:$0xff]  }
 0x253   : > { %v5947_v49 = vpop.eup %5946  ;;  %v770_v53 = vmul.f32 %v766_v45, %v713_v28  ;;  %v769_v54 = vmul.f32 %v765_v44, %v709_v27  ;;  %v5663_v44 = vld [vmem:[#allocation10 + $0x34] ss:$8 sps:$4 sm:$0xff]   ;;  %v5661_v45 = vld [vmem:[#allocation10 + $0x30] ss:$8 sps:$4 sm:$0xff]  }
 0x254   : > { %v767_v55 = vmul.f32 %v5947_v49, %v6835_v50  ;;  %v734_v56 = vadd.f32 %v728_v39, %v719_v46  ;;  %v733_v57 = vadd.f32 %v724_v34, %v718_v36  ;;  %v768_v58 = vmul.f32 %v5947_v49, %v6838_v51  ;;  %v5612_v51 = vld [vmem:[#allocation8 + $0x24] ss:$8 sps:$4 sm:$0xff]   ;;  %v5664_v36 = vld [vmem:[#allocation10 + $0x40] ss:$8 sps:$4 sm:$0xff]   ;;  %v5669_v49 = vld [vmem:[#allocation10 + $0x54] ss:$8 sps:$4 sm:$0xff]  }
 0x255   : > { %v773_v48 = vadd.f32 %v769_v54, %v724_v34  ;;  %v774_v62 = vadd.f32 %v770_v53, %v728_v39  ;;  %v5666_v46 = vld [vmem:[#allocation10 + $0x44] ss:$8 sps:$4 sm:$0xff]   ;;  %v5670_v53 = vld [vmem:[#allocation10 + $0x60] ss:$8 sps:$4 sm:$0xff]   ;;  %v5675_v54 = vld [vmem:[#allocation10 + $0x74] ss:$8 sps:$4 sm:$0xff]  }
 0x256   : > { %v736_v59 = vpack.c.bf16 %v734_v56, %v732_v35  ;;  %v735_v60 = vpack.c.bf16 %v733_v57, %v731_v52  ;;  %v772_v37 = vmul.f32 %v768_v58, %v713_v28  ;;  %v771_v61 = vmul.f32 %v767_v55, %v709_v27  ;;  %v5640_v27 = vld [vmem:[#allocation8 + $0xc0] ss:$8 sps:$4 sm:$0xff]   ;;  %v5645_v28 = vld [vmem:[#allocation8 + $0xd4] ss:$8 sps:$4 sm:$0xff]   ;;  %v5667_v35 = vld [vmem:[#allocation10 + $0x50] ss:$8 sps:$4 sm:$0xff]  }
 0x257   : > { %v5672_v52 = vld [vmem:[#allocation10 + $0x64] ss:$8 sps:$4 sm:$0xff]   ;;  %v5673_v55 = vld [vmem:[#allocation10 + $0x70] ss:$8 sps:$4 sm:$0xff]   ;;  %v5676_v57 = vld [vmem:[#allocation10 + $0x80] ss:$8 sps:$4 sm:$0xff]  }
 0x258   : > { %1003 = vmatprep.mubr.bf16.mxu0 %v736_v59  ;;  %v776_v63 = vadd.f32 %v772_v37, %v728_v39  ;;  %v775_v0 = vadd.f32 %v771_v61, %v724_v34  ;;  %v5654_v34 = vld [vmem:[#allocation10 + $0x4] ss:$8 sps:$4 sm:$0xff]   ;;  %v5652_v39 = vld [vmem:[#allocation10] ss:$8 sps:$4 sm:$0xff]   ;;  %v5681_v58 = vld [vmem:[#allocation10 + $0x94] ss:$8 sps:$4 sm:$0xff]  }
 0x259   : > { %1004 = vmatmul.mubr.bf16.vlgmr.msra.gmra.mrb[0].mxu0 %v735_v60  ;;  %v5678_v56 = vld [vmem:[#allocation10 + $0x84] ss:$8 sps:$4 sm:$0xff]   ;;  %v5687_v60 = vld [vmem:[#allocation10 + $0xb4] ss:$8 sps:$4 sm:$0xff]   ;;  %v5685_v37 = vld [vmem:[#allocation10 + $0xb0] ss:$8 sps:$4 sm:$0xff]  }
 0x25a   : > { %1207 = vmatpush1.bf16.msra.mxu0 %v5604_v47  ;;  %v6875_v2 = vpack.c.bf16 %v776_v63, %v774_v62  ;;  %v6877_v50 = vpack.c.bf16 %v775_v0, %v773_v48  ;;  %v5679_v48 = vld [vmem:[#allocation10 + $0x90] ss:$8 sps:$4 sm:$0xff]   ;;  %v5684_v59 = vld [vmem:[#allocation10 + $0xa4] ss:$8 sps:$4 sm:$0xff]   ;;  %v5682_v47 = vld [vmem:[#allocation10 + $0xa0] ss:$8 sps:$4 sm:$0xff]  }
 0x25b   : > { %1208 = vmatprep.subr.bf16.mxu0 %v5609_v38  ;;  %v5690_v61 = vld [vmem:[#allocation10 + $0xc4] ss:$8 sps:$4 sm:$0xff]   ;;  %v5688_v38 = vld [vmem:[#allocation10 + $0xc0] ss:$8 sps:$4 sm:$0xff]   ;;  %v5693_v62 = vld [vmem:[#allocation10 + $0xd4] ss:$8 sps:$4 sm:$0xff]  }
 0x25c   : > { %1238 = vmatprep.mubr.bf16.mxu0 %v6875_v2  ;;  %v5691_v63 = vld [vmem:[#allocation10 + $0xd0] ss:$8 sps:$4 sm:$0xff]   ;;  %v5696_v0 = vld [vmem:[#allocation10 + $0xe4] ss:$8 sps:$4 sm:$0xff]  }
 0x25e   : > { %1209 = vmatpush1.bf16.msra.mxu0 %v5607_v1  ;;  %v5694_v1 = vld [vmem:[#allocation10 + $0xe0] ss:$8 sps:$4 sm:$0xff]  }
 0x25f   : > { %1210 = vmatprep.subr.bf16.mxu0 %v5612_v51  ;;  %v5697_v51 = vld [vmem:[#allocation10 + $0xf0] ss:$8 sps:$4 sm:$0xff]  }
 0x262   : > { %1211 = vmatpush1.bf16.msra.mxu0 %v5610_v3 }
 0x263   : > { %1212 = vmatprep.subr.bf16.mxu0 %v5615_v4 }
 0x266   : > { %1213 = vmatpush1.bf16.msra.mxu0 %v5613_v5 }
 0x267   : > { %1214 = vmatprep.subr.bf16.mxu0 %v5618_v6 }
 0x26a   : > { %1215 = vmatpush1.bf16.msra.mxu0 %v5616_v7 }
 0x26b   : > { %1216 = vmatprep.subr.bf16.mxu0 %v5621_v8 }
 0x26e   : > { %1217 = vmatpush1.bf16.msra.mxu0 %v5619_v9  ;;  %v6350_v9 = vmov 0.0  }
 0x26f   : > { %1218 = vmatprep.subr.bf16.mxu0 %v5624_v10  ;;  %5341 = vmatprep.subr.bf16.mxu1 %v6350_v9 }
 0x270   : > { %5357 = vmatprep.mubr.msk.bf16.mxu1 %vm6351_vm0, %v6350_v9 }
 0x272   : > { %1219 = vmatpush1.bf16.msra.mxu0 %v5622_v11 }
 0x273   : > { %1220 = vmatprep.subr.bf16.mxu0 %v5627_v13 }
 0x276   : > { %1221 = vmatpush1.bf16.msra.mxu0 %v5625_v14 }
 0x277   : > { %1222 = vmatprep.subr.bf16.mxu0 %v5630_v15 }
 0x27a   : > { %1223 = vmatpush1.bf16.msra.mxu0 %v5628_v16 }
 0x27b   : > { %1224 = vmatprep.subr.bf16.mxu0 %v5633_v17 }
 0x27e   : > { %1225 = vmatpush1.bf16.msra.mxu0 %v5631_v18 }
 0x27f   : > { %1226 = vmatprep.subr.bf16.mxu0 %v5636_v20 }
 0x282   : > { %1227 = vmatpush1.bf16.msra.mxu0 %v5634_v21 }
 0x283   : > { %1228 = vmatprep.subr.bf16.mxu0 %v5639_v22 }
 0x286   : > { %1229 = vmatpush1.bf16.msra.mxu0 %v5637_v25 }
 0x287   : > { %1230 = vmatprep.subr.bf16.mxu0 %v5642_v26 }
 0x28a   : > { %1231 = vmatpush1.bf16.msra.mxu0 %v5640_v27 }
 0x28b   : > { %1232 = vmatprep.subr.bf16.mxu0 %v5645_v28 }
 0x28e   : > { %1233 = vmatpush1.bf16.msra.mxu0 %v5643_v29 }
 0x28f   : > { %1234 = vmatprep.subr.bf16.mxu0 %v5648_v30 }
 0x292   : > { %1235 = vmatpush1.bf16.msra.mxu0 %v5646_v31 }
 0x293   : > { %1236 = vmatprep.subr.bf16.mxu0 %v5651_v32 }
 0x296   : > { %1237 = vmatpush1.bf16.msra.mxu0 %v5649_v33 }
 0x297   : > { %1441 = vmatprep.subr.bf16.mxu0 %v5654_v34 }
 0x299   : > { %1239 = vmatmul.mubr.bf16.vlgmr.msra.gmra.mrb[4].mxu0 %v6877_v50 }
 0x29a   : > { %1442 = vmatpush1.bf16.msra.mxu0 %v5652_v39  ;;  %1473 = vmatprep.mubr.bf16.mxu0 %v6875_v2  ;;  %v5699_v2 = vld [vmem:[#allocation10 + $0xf4] ss:$8 sps:$4 sm:$0xff]  }
 0x29b   : > { %1443 = vmatprep.subr.bf16.mxu0 %v5657_v40 }
 0x29e   : > { %1444 = vmatpush1.bf16.msra.mxu0 %v5655_v41 }
 0x29f   : > { %1445 = vmatprep.subr.bf16.mxu0 %v5660_v42 }
 0x2a2   : > { %1446 = vmatpush1.bf16.msra.mxu0 %v5658_v43 }
 0x2a3   : > { %1447 = vmatprep.subr.bf16.mxu0 %v5663_v44 }
 0x2a6   : > { %1448 = vmatpush1.bf16.msra.mxu0 %v5661_v45  ;;  %v1498_v45 = vand.u32 127, %v706_v12 }
 0x2a7   : > { %1449 = vmatprep.subr.bf16.mxu0 %v5666_v46  ;;  %v1492_v46 = vadd.s32 8, %v6849_v19 }
 0x2a8   : > { %vm1499_vm1 = vcmp.gt.s32.totalorder %v1498_v45, %v6849_v19 }
 0x2a9   : > { %vm1500_vm3 = vcmp.gt.s32.totalorder %v1498_v45, %v1492_v46 }
 0x2aa   : > { %1450 = vmatpush1.bf16.msra.mxu0 %v5664_v36 }
 0x2ab   : > { %1451 = vmatprep.subr.bf16.mxu0 %v5669_v49 }
 0x2ae   : > { %1452 = vmatpush1.bf16.msra.mxu0 %v5667_v35 }
 0x2af   : > { %1453 = vmatprep.subr.bf16.mxu0 %v5672_v52 }
 0x2b2   : > { %1454 = vmatpush1.bf16.msra.mxu0 %v5670_v53 }
 0x2b3   : > { %1455 = vmatprep.subr.bf16.mxu0 %v5675_v54 }
 0x2b6   : > { %1456 = vmatpush1.bf16.msra.mxu0 %v5673_v55 }
 0x2b7   : > { %1457 = vmatprep.subr.bf16.mxu0 %v5678_v56 }
 0x2ba   : > { %1458 = vmatpush1.bf16.msra.mxu0 %v5676_v57 }
 0x2bb   : > { %1459 = vmatprep.subr.bf16.mxu0 %v5681_v58 }
 0x2be   : > { %1460 = vmatpush1.bf16.msra.mxu0 %v5679_v48 }
 0x2bf   : > { %1461 = vmatprep.subr.bf16.mxu0 %v5684_v59 }
 0x2c2   : > { %1462 = vmatpush1.bf16.msra.mxu0 %v5682_v47 }
 0x2c3   : > { %1463 = vmatprep.subr.bf16.mxu0 %v5687_v60 }
 0x2c6   : > { %1464 = vmatpush1.bf16.msra.mxu0 %v5685_v37 }
 0x2c7   : > { %1465 = vmatprep.subr.bf16.mxu0 %v5690_v61 }
 0x2ca   : > { %1466 = vmatpush1.bf16.msra.mxu0 %v5688_v38 }
 0x2cb   : > { %1467 = vmatprep.subr.bf16.mxu0 %v5693_v62 }
 0x2ce   : > { %1468 = vmatpush1.bf16.msra.mxu0 %v5691_v63 }
 0x2cf   : > { %1469 = vmatprep.subr.bf16.mxu0 %v5696_v0 }
 0x2d2   : > { %1470 = vmatpush1.bf16.msra.mxu0 %v5694_v1 }
 0x2d3   : > { %1471 = vmatprep.subr.bf16.mxu0 %v5699_v2 }
 0x2d6   : > { %1472 = vmatpush1.bf16.msra.mxu0 %v5697_v51 }
 0x2d7   : > { %5321 = vmatprep.subr.bf16.mxu0 %v6350_v9 }
 0x2d9   : > { %1474 = vmatmul.mubr.bf16.vlgmr.msra.gmra.mrb[8].mxu0 %v6877_v50 }
 0x2da   : > { %5337 = vmatprep.mubr.msk.bf16.mxu0 %vm6351_vm0, %v6350_v9 }
 0x32c   : > { %v6883_v3 = vpop.f32.mrb[0].mxu0 }
 0x32d   : > { %v6885_v4 = vpop.f32.mrb[1].mxu0 }
 0x32e   : > { %v6887_v5 = vpop.f32.mrb[2].mxu0 }
 0x32f   : > { %v1484_v6 = vpack.c.bf16 %v6887_v5, %v6883_v3  ;;  %v6891_v7 = vpop.f32.mrb[3].mxu0 }
 0x330   : > { %v1485_v8 = vpack.c.bf16 %v6891_v7, %v6885_v4 }
 0x36c   : > { %v1240_v50 = vpop.f32.mrb[4].mxu0 }
 0x36d   : > { %v1242_v10 = vpop.f32.mrb[5].mxu0 }
 0x36e   : > { %v1244_v11 = vpop.f32.mrb[6].mxu0 }
 0x36f   : > { %v1486_v13 = vpack.c.bf16 %v1244_v11, %v1240_v50  ;;  %v1246_v14 = vpop.f32.mrb[7].mxu0 }
 0x370   : > { %v1487_v15 = vpack.c.bf16 %v1246_v14, %v1242_v10 }
 0x371   : > { %1501 = vxpose.xlu0.c.b16.start.end [1/1] (short) %v1486_v13, 128 }
 0x372   : > { %1517 = vxpose.xlu1.c.b16.start.end [1/1] (short) %v1487_v15, 128 }
 0x3ac   : > { %v6899_v16 = vpop.f32.mrb[8].mxu0 }
 0x3ad   : > { %v6901_v17 = vpop.f32.mrb[9].mxu0 }
 0x3ae   : > { %v6903_v18 = vpop.f32.mrb[10].mxu0 }
 0x3af   : > { %v1488_v20 = vpack.c.bf16 %v6903_v18, %v6899_v16  ;;  %v6907_v21 = vpop.f32.mrb[11].mxu0 }
 0x3b0   : > { %v1489_v22 = vpack.c.bf16 %v6907_v21, %v6901_v17 }
 0x3d7   : > { %v1509_v25 = vpop.trf.xlu0 }
 0x3d8   : > { %5322 = vmatpush3.bf16.msra.mxu0 %v1509_v25  ;;  %v1525_v26 = vpop.trf.xlu1 }
 0x3d9   : > { %5342 = vmatpush3.bf16.msra.mxu1 %v1525_v26  ;;  %5323 = vmatprep.subr.bf16.mxu0 %v6350_v9 }
 0x3da   : > { %5343 = vmatprep.subr.bf16.mxu1 %v6350_v9 }
 0x3db   : > { %v1510_v27 = vpop.trf.xlu0 }
 0x3dc   : > { %5324 = vmatpush3.bf16.msra.mxu0 %v1510_v27  ;;  %v1526_v28 = vpop.trf.xlu1 }
 0x3dd   : > { %5344 = vmatpush3.bf16.msra.mxu1 %v1526_v28  ;;  %5325 = vmatprep.subr.bf16.mxu0 %v6350_v9 }
 0x3de   : > { %5345 = vmatprep.subr.bf16.mxu1 %v6350_v9 }
 0x3df   : > { %v1511_v29 = vpop.trf.xlu0 }
 0x3e0   : > { %5326 = vmatpush3.bf16.msra.mxu0 %v1511_v29  ;;  %v1527_v30 = vpop.trf.xlu1 }
 0x3e1   : > { %5346 = vmatpush3.bf16.msra.mxu1 %v1527_v30  ;;  %5327 = vmatprep.subr.bf16.mxu0 %v6350_v9 }
 0x3e2   : > { %5347 = vmatprep.subr.bf16.mxu1 %v6350_v9 }
 0x3e3   : > { %v1512_v31 = vpop.trf.xlu0 }
 0x3e4   : > { %5328 = vmatpush3.bf16.msra.mxu0 %v1512_v31  ;;  %v1528_v32 = vpop.trf.xlu1 }
 0x3e5   : > { %5348 = vmatpush3.bf16.msra.mxu1 %v1528_v32  ;;  %5329 = vmatprep.subr.bf16.mxu0 %v6350_v9 }
 0x3e6   : > { %5349 = vmatprep.subr.bf16.mxu1 %v6350_v9 }
 0x3e7   : > { %v1513_v33 = vpop.trf.xlu0 }
 0x3e8   : > { %5330 = vmatpush3.bf16.msra.mxu0 %v1513_v33  ;;  %v1529_v34 = vpop.trf.xlu1 }
 0x3e9   : > { %5350 = vmatpush3.bf16.msra.mxu1 %v1529_v34  ;;  %5331 = vmatprep.subr.bf16.mxu0 %v6350_v9 }
 0x3ea   : > { %5351 = vmatprep.subr.bf16.mxu1 %v6350_v9 }
 0x3eb   : > { %v1514_v39 = vpop.trf.xlu0 }
 0x3ec   : > { %5332 = vmatpush3.bf16.msra.mxu0 %v1514_v39  ;;  %v1530_v40 = vpop.trf.xlu1 }
 0x3ed   : > { %5352 = vmatpush3.bf16.msra.mxu1 %v1530_v40  ;;  %5333 = vmatprep.subr.bf16.mxu0 %v6350_v9 }
 0x3ee   : > { %5353 = vmatprep.subr.bf16.mxu1 %v6350_v9 }
 0x3ef   : > { %v1515_v41 = vpop.trf.xlu0 }
 0x3f0   : > { %5334 = vmatpush3.bf16.msra.mxu0 %v1515_v41  ;;  %v1531_v42 = vpop.trf.xlu1 }
 0x3f1   : > { %5354 = vmatpush3.bf16.msra.mxu1 %v1531_v42  ;;  %5335 = vmatprep.subr.bf16.mxu0 %v6350_v9 }
 0x3f2   : > { %5355 = vmatprep.subr.bf16.mxu1 %v6350_v9 }
 0x3f3   : > { %v1516_v43 = vpop.trf.xlu0 }
 0x3f4   : > { %5336 = vmatpush3.bf16.msra.mxu0 %v1516_v43  ;;  %v1532_v44 = vpop.trf.xlu1 }
 0x3f5   : > { %5356 = vmatpush3.bf16.msra.mxu1 %v1532_v44 }
 0x3f7   : > { %5338 = vmatmul.mubr.bf16.vlgmr.msra.gmra.mrb[12].mxu0 %v1484_v6 }
 0x3f8   : > { %5358 = vmatmul.mubr.bf16.vlgmr.msra.gmra.mrb[0].mxu1 %v1485_v8 }
 0x4ca   : > { %v1567_v36 = vpop.f32.mrb[12].mxu0 }
 0x4cb   : > { %v1615_v49 = vmul.f32 0.088388346, %v1567_v36  ;;  %v5339_v35 = vpop.f32.mrb[13].mxu0  ;;  %v1608_v52 = vpop.f32.mrb[0].mxu1 }
 0x4cc   : > { %v1617_v53 = vmul.f32 0.088388346, %v1608_v52  ;;  %v1570_v54 = vpop.f32.mrb[14].mxu0  ;;  %v5359_v55 = vpop.f32.mrb[1].mxu1 }
 0x4cd   : > { %v1616_v56 = vmul.f32 0.088388346, %v1570_v54  ;;  %v5340_v57 = vpop.f32.mrb[15].mxu0  ;;  %v1611_v58 = vpop.f32.mrb[2].mxu1  ;;  %v1623_v48 = vsel %vm1499_vm1, -inf, %v1615_v49 }
 0x4ce   : > { %v1618_v12 = vmul.f32 0.088388346, %v1611_v58  ;;  %v5360_v59 = vpop.f32.mrb[3].mxu1  ;;  %v1628_v47 = vsel %vm1627_vm2, %v1623_v48, -inf  ;;  %v1625_v37 = vsel %vm1499_vm1, -inf, %v1617_v53 }
 0x4cf   : > { %1629 = vmax.xlane.f32.xlu0 %v1628_v47  ;;  %v1624_v60 = vsel %vm1500_vm3, -inf, %v1616_v56  ;;  %v1634_v62 = vsel %vm1627_vm2, %v1625_v37, -inf  ;;  %v5700_v59 = vld [vmem:[#allocation11] ss:$8 sps:$4 sm:$0xff]   ;;  %v5702_v47 = vld [vmem:[#allocation11 + $0x4] ss:$8 sps:$4 sm:$0xff]  }
 0x4d0   : > { %v1631_v61 = vsel %vm1627_vm2, %v1624_v60, -inf  ;;  %v1626_v38 = vsel %vm1500_vm3, -inf, %v1618_v12 }
 0x4d1   : > { %1632 = vmax.xlane.f32.xlu1 %v1631_v61  ;;  %v1637_v63 = vsel %vm1627_vm2, %v1626_v38, -inf  ;;  %v5708_v61 = vld [vmem:[#allocation11 + $0x24] ss:$8 sps:$4 sm:$0xff]  }
 0x4d3   : > { %1635 = vmax.xlane.f32.xlu0 %v1634_v62  ;;  %v5711_v62 = vld [vmem:[#allocation11 + $0x34] ss:$8 sps:$4 sm:$0xff]  }
 0x4d5   : > { %1638 = vmax.xlane.f32.xlu1 %v1637_v63  ;;  %v5709_v63 = vld [vmem:[#allocation11 + $0x30] ss:$8 sps:$4 sm:$0xff]  }
 0x55c   : > { %v1630_v0 = vpop.xlane.xlu0 %1629 }
 0x55d   : > { %v1640_v1 = vsub.f32 %v1623_v48, %v1630_v0  ;;  %v5714_v0 = vld [vmem:[#allocation11 + $0x44] ss:$8 sps:$4 sm:$0xff]  }
 0x55e   : > { %v1633_v2 = vpop.xlane.xlu1 %1632 }
 0x55f   : > { %v1644_v51 = vmul.f32 1.442695, %v1640_v1  ;;  %v1641_v3 = vsub.f32 %v1624_v60, %v1633_v2  ;;  %v5705_v60 = vld [vmem:[#allocation11 + $0x14] ss:$8 sps:$4 sm:$0xff]   ;;  %v5712_v1 = vld [vmem:[#allocation11 + $0x40] ss:$8 sps:$4 sm:$0xff]  }
 0x560   : > { %v1636_v4 = vpop.xlane.xlu0 %1635  ;;  %v5717_v2 = vld [vmem:[#allocation11 + $0x54] ss:$8 sps:$4 sm:$0xff]  }
 0x561   : > { %5948 = vpow2.f32 %v1644_v51  ;;  %v1646_v5 = vmul.f32 1.442695, %v1641_v3  ;;  %v1642_v6 = vsub.f32 %v1625_v37, %v1636_v4  ;;  %v5703_v37 = vld [vmem:[#allocation11 + $0x10] ss:$8 sps:$4 sm:$0xff]   ;;  %v5720_v3 = vld [vmem:[#allocation11 + $0x64] ss:$8 sps:$4 sm:$0xff]  }
 0x562   : > { %v1639_v7 = vpop.xlane.xlu1 %1638  ;;  %v5715_v51 = vld [vmem:[#allocation11 + $0x50] ss:$8 sps:$4 sm:$0xff]   ;;  %v5718_v4 = vld [vmem:[#allocation11 + $0x60] ss:$8 sps:$4 sm:$0xff]  }
 0x563   : > { %5950 = vpow2.f32 %v1646_v5  ;;  %v1648_v8 = vmul.f32 1.442695, %v1642_v6  ;;  %v1643_v50 = vsub.f32 %v1626_v38, %v1639_v7  ;;  %v5706_v38 = vld [vmem:[#allocation11 + $0x20] ss:$8 sps:$4 sm:$0xff]   ;;  %v5723_v5 = vld [vmem:[#allocation11 + $0x74] ss:$8 sps:$4 sm:$0xff]  }
 0x564   : > { %v5721_v6 = vld [vmem:[#allocation11 + $0x70] ss:$8 sps:$4 sm:$0xff]   ;;  %v5726_v7 = vld [vmem:[#allocation11 + $0x84] ss:$8 sps:$4 sm:$0xff]  }
 0x565   : > { %5952 = vpow2.f32 %v1648_v8  ;;  %v1650_v10 = vmul.f32 1.442695, %v1643_v50  ;;  %v5724_v8 = vld [vmem:[#allocation11 + $0x80] ss:$8 sps:$4 sm:$0xff]   ;;  %v5729_v50 = vld [vmem:[#allocation11 + $0x94] ss:$8 sps:$4 sm:$0xff]  }
 0x567   : > { %5954 = vpow2.f32 %v1650_v10  ;;  %v5727_v10 = vld [vmem:[#allocation11 + $0x90] ss:$8 sps:$4 sm:$0xff]  }
 0x56b   : > { %v5949_v11 = vpop.eup %5948 }
 0x56c   : > { %v1652_v13 = vsel %vm1627_vm2, %v5949_v11, 0.0 }
 0x56d   : > { %v5951_v14 = vpop.eup %5950  ;;  %1653 = vadd.xlane.f32.xlu0 %v1652_v13 }
 0x56e   : > { %v1655_v15 = vsel %vm1627_vm2, %v5951_v14, 0.0 }
 0x56f   : > { %v5953_v25 = vpop.eup %5952  ;;  %1656 = vadd.xlane.f32.xlu1 %v1655_v15 }
 0x570   : > { %v1658_v26 = vsel %vm1627_vm2, %v5953_v25, 0.0 }
 0x571   : > { %v5955_v27 = vpop.eup %5954  ;;  %1659 = vadd.xlane.f32.xlu0 %v1658_v26 }
 0x572   : > { %v1661_v28 = vsel %vm1627_vm2, %v5955_v27, 0.0 }
 0x573   : > { %1662 = vadd.xlane.f32.xlu1 %v1661_v28  ;;  %v5732_v28 = vld [vmem:[#allocation11 + $0xa4] ss:$8 sps:$4 sm:$0xff]  }
 0x59e   : > { %1674 = vxpose.xlu0.c.b16.start.end [1/1] (short) %v1488_v20, 128 }
 0x5a0   : > { %1690 = vxpose.xlu1.c.b16.start.end [1/1] (short) %v1489_v22, 128 }
 0x5fa   : > { %v1654_v29 = vpop.xlane.xlu0 %1653 }
 0x5fb   : > { %5956 = vrcp.f32 %v1654_v29 }
 0x5fc   : > { %v1657_v30 = vpop.xlane.xlu1 %1656 }
 0x5fd   : > { %5958 = vrcp.f32 %v1657_v30  ;;  %v5730_v30 = vld [vmem:[#allocation11 + $0xa0] ss:$8 sps:$4 sm:$0xff]  }
 0x5fe   : > { %v1660_v31 = vpop.xlane.xlu0 %1659 }
 0x5ff   : > { %5960 = vrcp.f32 %v1660_v31 }
 0x600   : > { %v1663_v32 = vpop.xlane.xlu1 %1662 }
 0x601   : > { %5962 = vrcp.f32 %v1663_v32 }
 0x604   : > { %v1682_v33 = vpop.trf.xlu0 }
 0x605   : > { %v5957_v34 = vpop.eup %5956  ;;  %5363 = vmatprep.mubr.msk.bf16.mxu0 %vm1627_vm2, %v1682_v33 }
 0x606   : > { %v1698_v39 = vpop.trf.xlu1  ;;  %v1665_v16 = vmul.f32 %v5957_v34, %v5949_v11 }
 0x607   : > { %v5959_v40 = vpop.eup %5958  ;;  %5381 = vmatprep.mubr.msk.bf16.mxu1 %vm1627_vm2, %v1698_v39  ;;  %v5735_v39 = vld [vmem:[#allocation11 + $0xb4] ss:$8 sps:$4 sm:$0xff]  }
 0x608   : > { %v1667_v18 = vmul.f32 %v5959_v40, %v5951_v14  ;;  %v1683_v22 = vpop.trf.xlu0 }
 0x609   : > { %v5961_v17 = vpop.eup %5960 }
 0x60a   : > { %v1672_v20 = vpack.c.bf16 %v1667_v18, %v1665_v16  ;;  %v1669_v42 = vmul.f32 %v5961_v17, %v5953_v25  ;;  %v1699_v45 = vpop.trf.xlu1  ;;  %v5733_v16 = vld [vmem:[#allocation11 + $0xb0] ss:$8 sps:$4 sm:$0xff]  }
 0x60b   : > { %v5963_v21 = vpop.eup %5962 }
 0x60c   : > { %5413 = vmatprep.subr.msk.bf16.mxu0 %vm1627_vm2, %v1672_v20  ;;  %v1731_v41 = vsel %vm1627_vm2, %v1672_v20, 0  ;;  %v1671_v43 = vmul.f32 %v5963_v21, %v5955_v27  ;;  %v1684_v46 = vpop.trf.xlu0  ;;  %v5738_v21 = vld [vmem:[#allocation11 + $0xc4] ss:$8 sps:$4 sm:$0xff]  }
 0x60d   : > { %5362 = vmatpush3.bf16.xpose.msra.mxu0 %v1731_v41  ;;  %v5736_v41 = vld [vmem:[#allocation11 + $0xc0] ss:$8 sps:$4 sm:$0xff]  }
 0x60e   : > { %v1673_v44 = vpack.c.bf16 %v1671_v43, %v1669_v42  ;;  %v1700_v49 = vpop.trf.xlu1  ;;  %2456 = vmatprep.subr.bf16.mxu0 %v5702_v47 }
 0x610   : > { %5414 = vmatprep.subr.msk.bf16.mxu1 %vm1627_vm2, %v1673_v44  ;;  %v1855_v36 = vsel %vm1627_vm2, %v1673_v44, 0  ;;  %v1685_v35 = vpop.trf.xlu0 }
 0x611   : > { %5380 = vmatpush3.bf16.xpose.msra.mxu1 %v1855_v36  ;;  %v5739_v36 = vld [vmem:[#allocation11 + $0xd0] ss:$8 sps:$4 sm:$0xff]  }
 0x612   : > { %v1701_v52 = vpop.trf.xlu1 }
 0x614   : > { %5364 = vmatmul.mubr.msk.bf16.vlgmr.msra.gmra.mrb[16].mxu0 %vm1627_vm2, %v1683_v22  ;;  %v1686_v53 = vpop.trf.xlu0 }
 0x615   : > { %5367 = vmatprep.mubr.msk.bf16.mxu0 %vm1627_vm2, %v1684_v46  ;;  %2457 = vmatpush1.bf16.msra.mxu0 %v5700_v59 }
 0x616   : > { %v1702_v54 = vpop.trf.xlu1  ;;  %2458 = vmatprep.subr.bf16.mxu0 %v5705_v60 }
 0x618   : > { %5382 = vmatmul.mubr.msk.bf16.vlgmr.msra.gmra.mrb[4].mxu1 %vm1627_vm2, %v1699_v45  ;;  %v1687_v55 = vpop.trf.xlu0  ;;  %v5741_v45 = vld [vmem:[#allocation11 + $0xd4] ss:$8 sps:$4 sm:$0xff]  }
 0x619   : > { %5385 = vmatprep.mubr.msk.bf16.mxu1 %vm1627_vm2, %v1700_v49  ;;  %2459 = vmatpush1.bf16.msra.mxu0 %v5703_v37 }
 0x61a   : > { %v1703_v56 = vpop.trf.xlu1  ;;  %2460 = vmatprep.subr.bf16.mxu0 %v5708_v61  ;;  %v6352_v61 = vmov 1983009808  }
 0x61c   : > { %5368 = vmatmul.mubr.msk.bf16.gmra.mrb[20].mxu0 %vm1627_vm2, %v1685_v35  ;;  %v1688_v57 = vpop.trf.xlu0 }
 0x61d   : > { %5371 = vmatprep.mubr.msk.bf16.mxu0 %vm1627_vm2, %v1686_v53  ;;  %2461 = vmatpush1.bf16.msra.mxu0 %v5706_v38  ;;  %v5742_v53 = vld [vmem:[#allocation11 + $0xe0] ss:$8 sps:$4 sm:$0xff]   ;;  %v2020_v38 = vunpack.c.l.s4 %v6352_v61 }
 0x61e   : > { %v1704_v58 = vpop.trf.xlu1  ;;  %2462 = vmatprep.subr.bf16.mxu0 %v5711_v62 }
 0x61f   : > { %v2021_v62 = vunpack.c.0.s8 %v2020_v38 }
 0x620   : > { %5386 = vmatmul.mubr.msk.bf16.gmra.mrb[8].mxu1 %vm1627_vm2, %v1701_v52  ;;  %v1689_v48 = vpop.trf.xlu0 }
 0x621   : > { %5389 = vmatprep.mubr.msk.bf16.mxu1 %vm1627_vm2, %v1702_v54  ;;  %2463 = vmatpush1.bf16.msra.mxu0 %v5709_v63  ;;  %v5744_v54 = vld [vmem:[#allocation11 + $0xe4] ss:$8 sps:$4 sm:$0xff]   ;;  %v6353_v63 = vmov 1934713408  }
 0x622   : > { %v1705_v12 = vpop.trf.xlu1  ;;  %2464 = vmatprep.subr.bf16.mxu0 %v5714_v0  ;;  %v2051_v0 = vunpack.c.l.s4 %v6353_v63 }
 0x624   : > { %5372 = vmatmul.mubr.msk.bf16.gmra.mrb[24].mxu0 %vm1627_vm2, %v1687_v55 }
 0x625   : > { %5375 = vmatprep.mubr.msk.bf16.mxu0 %vm1627_vm2, %v1688_v57  ;;  %2465 = vmatpush1.bf16.msra.mxu0 %v5712_v1  ;;  %v2024_v1 = vsub.s32 %v2021_v62, %v6849_v19 }
 0x626   : > { %2466 = vmatprep.subr.bf16.mxu0 %v5717_v2 }
 0x628   : > { %5390 = vmatmul.mubr.msk.bf16.gmra.mrb[12].mxu1 %vm1627_vm2, %v1703_v56  ;;  %v5747_v56 = vld [vmem:[#allocation11 + $0xf4] ss:$8 sps:$4 sm:$0xff]  }
 0x629   : > { %5393 = vmatprep.mubr.msk.bf16.mxu1 %vm1627_vm2, %v1704_v58  ;;  %2467 = vmatpush1.bf16.msra.mxu0 %v5715_v51 }
 0x62a   : > { %2468 = vmatprep.subr.bf16.mxu0 %v5720_v3  ;;  %v2052_v3 = vunpack.c.0.s8 %v2051_v0 }
 0x62c   : > { %5376 = vmatmul.mubr.msk.bf16.gmra.mrb[28].mxu0 %vm1627_vm2, %v1689_v48 }
 0x62d   : > { %2469 = vmatpush1.bf16.msra.mxu0 %v5718_v4 }
 0x62e   : > { %2470 = vmatprep.subr.bf16.mxu0 %v5723_v5 }
 0x630   : > { %5394 = vmatmul.mubr.msk.bf16.gmra.mrb[16].mxu1 %vm1627_vm2, %v1705_v12  ;;  %v5745_v12 = vld [vmem:[#allocation11 + $0xf0] ss:$8 sps:$4 sm:$0xff]  }
 0x631   : > { %2471 = vmatpush1.bf16.msra.mxu0 %v5721_v6 }
 0x632   : > { %2472 = vmatprep.subr.bf16.mxu0 %v5726_v7 }
 0x635   : > { %2473 = vmatpush1.bf16.msra.mxu0 %v5724_v8  ;;  %v2055_v8 = vsub.s32 %v2052_v3, %v6849_v19 }
 0x636   : > { %2474 = vmatprep.subr.bf16.mxu0 %v5729_v50 }
 0x639   : > { %2475 = vmatpush1.bf16.msra.mxu0 %v5727_v10 }
 0x63a   : > { %2476 = vmatprep.subr.bf16.mxu0 %v5732_v28 }
 0x63d   : > { %2477 = vmatpush1.bf16.msra.mxu0 %v5730_v30 }
 0x63e   : > { %2478 = vmatprep.subr.bf16.mxu0 %v5735_v39 }
 0x641   : > { %2479 = vmatpush1.bf16.msra.mxu0 %v5733_v16 }
 0x642   : > { %2480 = vmatprep.subr.bf16.mxu0 %v5738_v21 }
 0x645   : > { %2481 = vmatpush1.bf16.msra.mxu0 %v5736_v41 }
 0x646   : > { %2482 = vmatprep.subr.bf16.mxu0 %v5741_v45 }
 0x649   : > { %2483 = vmatpush1.bf16.msra.mxu0 %v5739_v36 }
 0x64a   : > { %2484 = vmatprep.subr.bf16.mxu0 %v5744_v54 }
 0x64d   : > { %2485 = vmatpush1.bf16.msra.mxu0 %v5742_v53 }
 0x64e   : > { %2486 = vmatprep.subr.bf16.mxu0 %v5747_v56 }
 0x651   : > { %2487 = vmatpush1.bf16.msra.mxu0 %v5745_v12 }
 0x6e7   : > { %v5365_v11 = vpop.f32.mrb[16].mxu0 }
 0x6e8   : > { %v1767_v13 = vpop.f32.mrb[17].mxu0 }
 0x6e9   : > { %1954 = vxpose.xlu0.b32.start [1/16] (narrow) %v1767_v13, 16  ;;  %v5366_v14 = vpop.f32.mrb[18].mxu0 }
 0x6ea   : > { %v1770_v15 = vpop.f32.mrb[19].mxu0 }
 0x6eb   : > { %v5383_v25 = vpop.f32.mrb[4].mxu1 }
 0x6ec   : > { %v1891_v26 = vpop.f32.mrb[5].mxu1 }
 0x6ed   : > { %1955 = vxpose.xlu0.b32.cont [2/16] (narrow) %v1770_v15, 16  ;;  %1986 = vxpose.xlu1.b32.start [1/16] (narrow) %v1891_v26, 16  ;;  %v5384_v27 = vpop.f32.mrb[6].mxu1 }
 0x6ee   : > { %v1894_v29 = vpop.f32.mrb[7].mxu1 }
 0x6ef   : > { %v5369_v31 = vpop.f32.mrb[20].mxu0 }
 0x6f0   : > { %v1783_v32 = vpop.f32.mrb[21].mxu0 }
 0x6f1   : > { %1956 = vxpose.xlu0.b32.cont [3/16] (narrow) %v5365_v11, 16  ;;  %1987 = vxpose.xlu1.b32.cont [2/16] (narrow) %v1894_v29, 16  ;;  %v5370_v33 = vpop.f32.mrb[22].mxu0 }
 0x6f2   : > { %v1786_v34 = vpop.f32.mrb[23].mxu0 }
 0x6f3   : > { %v5387_v40 = vpop.f32.mrb[8].mxu1 }
 0x6f4   : > { %v1907_v18 = vpop.f32.mrb[9].mxu1 }
 0x6f5   : > { %1957 = vxpose.xlu0.b32.cont [4/16] (narrow) %v5366_v14, 16  ;;  %1988 = vxpose.xlu1.b32.cont [3/16] (narrow) %v5383_v25, 16  ;;  %v5388_v17 = vpop.f32.mrb[10].mxu1 }
 0x6f6   : > { %v1910_v20 = vpop.f32.mrb[11].mxu1 }
 0x6f7   : > { %v5373_v22 = vpop.f32.mrb[24].mxu0 }
 0x6f8   : > { %v1799_v42 = vpop.f32.mrb[25].mxu0 }
 0x6f9   : > { %1958 = vxpose.xlu0.b32.cont [5/16] (narrow) %v1783_v32, 16  ;;  %1989 = vxpose.xlu1.b32.cont [4/16] (narrow) %v5384_v27, 16  ;;  %v5374_v43 = vpop.f32.mrb[26].mxu0 }
 0x6fa   : > { %v1802_v44 = vpop.f32.mrb[27].mxu0 }
 0x6fb   : > { %v5391_v46 = vpop.f32.mrb[12].mxu1 }
 0x6fc   : > { %v1923_v49 = vpop.f32.mrb[13].mxu1 }
 0x6fd   : > { %1959 = vxpose.xlu0.b32.cont [6/16] (narrow) %v1786_v34, 16  ;;  %1990 = vxpose.xlu1.b32.cont [5/16] (narrow) %v1907_v18, 16  ;;  %v5392_v35 = vpop.f32.mrb[14].mxu1 }
 0x6fe   : > { %v1926_v52 = vpop.f32.mrb[15].mxu1 }
 0x6ff   : > { %v5377_v55 = vpop.f32.mrb[28].mxu0 }
 0x700   : > { %v1815_v57 = vpop.f32.mrb[29].mxu0 }
 0x701   : > { %1960 = vxpose.xlu0.b32.cont [7/16] (narrow) %v5369_v31, 16  ;;  %1991 = vxpose.xlu1.b32.cont [6/16] (narrow) %v1910_v20, 16  ;;  %v5378_v58 = vpop.f32.mrb[30].mxu0 }
 0x702   : > { %v1818_v48 = vpop.f32.mrb[31].mxu0 }
 0x703   : > { %v5395_v59 = vpop.f32.mrb[16].mxu1 }
 0x704   : > { %v1939_v47 = vpop.f32.mrb[17].mxu1 }
 0x705   : > { %1961 = vxpose.xlu0.b32.cont [8/16] (narrow) %v5370_v33, 16  ;;  %1992 = vxpose.xlu1.b32.cont [7/16] (narrow) %v5387_v40, 16  ;;  %v5396_v60 = vpop.f32.mrb[18].mxu1 }
 0x706   : > { %v1942_v37 = vpop.f32.mrb[19].mxu1 }
 0x709   : > { %1962 = vxpose.xlu0.b32.cont [9/16] (narrow) %v1799_v42, 16  ;;  %1993 = vxpose.xlu1.b32.cont [8/16] (narrow) %v5388_v17, 16 }
 0x70d   : > { %1963 = vxpose.xlu0.b32.cont [10/16] (narrow) %v1802_v44, 16  ;;  %1994 = vxpose.xlu1.b32.cont [9/16] (narrow) %v1923_v49, 16 }
 0x711   : > { %1964 = vxpose.xlu0.b32.cont [11/16] (narrow) %v5373_v22, 16  ;;  %1995 = vxpose.xlu1.b32.cont [10/16] (narrow) %v1926_v52, 16 }
 0x715   : > { %1965 = vxpose.xlu0.b32.cont [12/16] (narrow) %v5374_v43, 16  ;;  %1996 = vxpose.xlu1.b32.cont [11/16] (narrow) %v5391_v46, 16 }
 0x719   : > { %1966 = vxpose.xlu0.b32.cont [13/16] (narrow) %v1815_v57, 16  ;;  %1997 = vxpose.xlu1.b32.cont [12/16] (narrow) %v5392_v35, 16 }
 0x71d   : > { %1967 = vxpose.xlu0.b32.cont [14/16] (narrow) %v1818_v48, 16  ;;  %1998 = vxpose.xlu1.b32.cont [13/16] (narrow) %v1939_v47, 16 }
 0x721   : > { %1968 = vxpose.xlu0.b32.cont [15/16] (narrow) %v5377_v55, 16  ;;  %1999 = vxpose.xlu1.b32.cont [14/16] (narrow) %v1942_v37, 16 }
 0x725   : > { %1969 = vxpose.xlu0.b32.end [16/16] (narrow) %v5378_v58, 16  ;;  %2000 = vxpose.xlu1.b32.cont [15/16] (narrow) %v5395_v59, 16 }
 0x729   : > { %2001 = vxpose.xlu1.b32.end [16/16] (narrow) %v5396_v60, 16 }
 0x769   : > { %v1970_v2 = vpop.trf.xlu0 }
 0x76a   : > { %v2018_v51 = vcombine.high %v1970_v2, %v6350_v9  ;;  %v2025_v4 = vrot.slane %v1970_v2, %v2024_v1 }
 0x76c   : > { %v2032_v7 = vrot.slane %v2018_v51, %v2024_v1 }
 0x76d   : > { %v2002_v5 = vpop.trf.xlu1  ;;  %v1971_v6 = vpop.trf.xlu0 }
 0x76e   : > { %v2033_v50 = vcombine.high %v2002_v5, %v6350_v9  ;;  %v2040_v10 = vrot.slane %v2002_v5, %v2024_v1  ;;  %v2084_v11 = vcombine.high %v1971_v6, %v6350_v9  ;;  %v2091_v25 = vrot.slane %v1971_v6, %v2024_v1 }
 0x770   : > { %v2047_v13 = vrot.slane %v2033_v50, %v2024_v1  ;;  %v2048_v14 = vcombine.low %v2025_v4, %v2040_v10  ;;  %v2049_v15 = vcombine.high %v2025_v4, %v2040_v10  ;;  %v2098_v31 = vrot.slane %v2084_v11, %v2024_v1 }
 0x771   : > { %v2003_v26 = vpop.trf.xlu1 }
 0x772   : > { %v2056_v27 = vrot.slane %v2048_v14, %v2055_v8  ;;  %v2063_v28 = vrot.slane %v2049_v15, %v2055_v8  ;;  %v2064_v29 = vcombine.low %v2032_v7, %v2047_v13  ;;  %v2065_v30 = vcombine.high %v2032_v7, %v2047_v13  ;;  %v6000_v13 = vld [vmem:[%s6768_s17] sm:$0xff] }
 0x773   : > { %v2099_v32 = vcombine.high %v2003_v26, %v6350_v9  ;;  %v2106_v33 = vrot.slane %v2003_v26, %v2024_v1  ;;  %v6001_v26 = vld [vmem:[%s6768_s17 + $0x8] sm:$0xff] }
 0x774   : > { %v2072_v34 = vrot.slane %v2064_v29, %v2055_v8  ;;  %v2079_v39 = vrot.slane %v2065_v30, %v2055_v8  ;;  %v2150_v40 = vcombine.low %v2056_v27, %v2063_v28  ;;  %v4985_v16 = vcombine.high %v2056_v27, %v2063_v28  ;;  %v6002_v29 = vld [vmem:[%s6768_s17 + $0x10] sm:$0xff] }
 0x775   : > { %v2113_v18 = vrot.slane %v2099_v32, %v2024_v1  ;;  %v2114_v17 = vcombine.low %v2091_v25, %v2106_v33  ;;  %v2115_v20 = vcombine.high %v2091_v25, %v2106_v33 }
 0x776   : > { %v2166_v21 = vcombine.low %v2072_v34, %v2079_v39  ;;  %v4986_v22 = vcombine.high %v2072_v34, %v2079_v39  ;;  %v2157_v45 = vrot.slane %v2150_v40, %v2024_v1  ;;  %v2165_v46 = vrot.slane %v4985_v16, %v2024_v1  ;;  %v2569_v39 = vld [vmem:[#allocation13] sm:$0xff]  ;;  %v2570_v16 = vld [vmem:[#allocation13 + $0x8] sm:$0xff] }
 0x777   : > { %v2122_v41 = vrot.slane %v2114_v17, %v2055_v8  ;;  %v2129_v42 = vrot.slane %v2115_v20, %v2055_v8  ;;  %v2130_v43 = vcombine.low %v2098_v31, %v2113_v18  ;;  %v2131_v44 = vcombine.high %v2098_v31, %v2113_v18  ;;  %v6003_v31 = vld [vmem:[%s6768_s17 + $0x18] sm:$0xff]  ;;  %v2573_v40 = vld [vmem:[#allocation13 + $0x20] sm:$0xff]  ;;  %v2574_v20 = vld [vmem:[#allocation13 + $0x28] sm:$0xff]  ;;  %s6354_s17 = smov [#allocation16]  }
 0x778   : > { %v2173_v36 = vrot.slane %v2166_v21, %v2024_v1  ;;  %v2181_v49 = vrot.slane %v4986_v22, %v2024_v1  ;;  %v2182_v59 = vcombine.low %v2157_v45, %v2165_v46  ;;  %v5021_v18 = vcombine.low %v2569_v39, %v2573_v40  ;;  %v2577_v21 = vld [vmem:[#allocation13 + $0x40] sm:$0xff]  ;;  %v2582_v45 = vld [vmem:[#allocation13 + $0x68] sm:$0xff] }
 0x779   : > { %v2138_v35 = vrot.slane %v2130_v43, %v2055_v8  ;;  %v2145_v9 = vrot.slane %v2131_v44, %v2055_v8  ;;  %v2200_v52 = vcombine.low %v2122_v41, %v2129_v42  ;;  %v4987_v53 = vcombine.high %v2122_v41, %v2129_v42  ;;  %v2581_v22 = vld [vmem:[#allocation13 + $0x60] sm:$0xff]  ;;  %v2578_v44 = vld [vmem:[#allocation13 + $0x48] sm:$0xff] }
 0x77a   : > { %v2190_v54 = vcombine.low %v2173_v36, %v2181_v49  ;;  %v2189_v61 = vrot.slane %v2182_v59, %v2055_v8  ;;  %v5022_v17 = vcombine.high %v2569_v39, %v2573_v40  ;;  %v5023_v41 = vcombine.low %v2570_v16, %v2574_v20  ;;  %v2585_v46 = vld [vmem:[#allocation13 + $0x80] sm:$0xff]  ;;  %v2630_v39 = vld [vmem:[#allocation13 + $0x1e8] sm:$0xff] }
 0x77b   : > { %v2207_v55 = vrot.slane %v2200_v52, %v2024_v1  ;;  %v2215_v56 = vrot.slane %v4987_v53, %v2024_v1  ;;  %v2216_v57 = vcombine.low %v2138_v35, %v2145_v9  ;;  %v4988_v58 = vcombine.high %v2138_v35, %v2145_v9  ;;  %v2589_v49 = vld [vmem:[#allocation13 + $0xa0] sm:$0xff]  ;;  %v2586_v35 = vld [vmem:[#allocation13 + $0x88] sm:$0xff] }
 0x77c   : > { %v2197_v60 = vrot.slane %v2190_v54, %v2055_v8  ;;  %v5024_v42 = vcombine.high %v2570_v16, %v2574_v20  ;;  %v5030_v43 = vcombine.high %v2577_v21, %v2581_v22  ;;  %3379 = vmatprep.subr.bf16.mxu1 %v5022_v17  ;;  %v5032_v36 = vcombine.high %v2578_v44, %v2582_v45  ;;  %v2590_v9 = vld [vmem:[#allocation13 + $0xa8] sm:$0xff]  ;;  %v2633_v20 = vld [vmem:[#allocation13 + $0x200] sm:$0xff] }
 0x77d   : > { %v2223_v48 = vrot.slane %v2216_v57, %v2024_v1  ;;  %v2231_v12 = vrot.slane %v4988_v58, %v2024_v1  ;;  %v2232_v47 = vcombine.low %v2207_v55, %v2215_v56  ;;  %v2284_v1 = vld [vmem:[%s7315_s5] sm:$0x3]  ;;  %3380 = vmatpush1.bf16.msra.mxu1 %v5021_v18  ;;  %v5029_v52 = vcombine.low %v2577_v21, %v2581_v22  ;;  %v2594_v58 = vld [vmem:[#allocation13 + $0xc8] sm:$0xff] }
 0x77e   : > { %v2198_v63 = vcombine.low %v2189_v61, %v2197_v60  ;;  %v2199_v0 = vcombine.high %v2189_v61, %v2197_v60  ;;  %v2289_v5 = vrot.slane %v2284_v1, %v6852_v23  ;;  %v2293_v6 = vrot.slane %v2284_v1, %v6855_v24  ;;  %3422 = vmatprep.subr.bf16.mxu0 %v5024_v42  ;;  %v2593_v56 = vld [vmem:[#allocation13 + $0xc0] sm:$0xff]  ;;  %v2610_v1 = vld [vmem:[#allocation13 + $0x148] sm:$0xff] }
 0x77f   : > { %v2240_v37 = vcombine.low %v2223_v48, %v2231_v12  ;;  %v2239_v38 = vrot.slane %v2232_v47, %v2055_v8  ;;  %3381 = vmatprep.subr.bf16.mxu1 %v5030_v43  ;;  %v5031_v53 = vcombine.low %v2578_v44, %v2582_v45  ;;  %v5038_v54 = vcombine.high %v2585_v46, %v2589_v49  ;;  %v2597_v57 = vld [vmem:[#allocation13 + $0xe0] sm:$0xff]  ;;  %v2598_v48 = vld [vmem:[#allocation13 + $0xe8] sm:$0xff] }
 0x780   : > { %v5040_v55 = vcombine.high %v2586_v35, %v2590_v9  ;;  %v5037_v12 = vcombine.low %v2585_v46, %v2589_v49  ;;  %v5039_v59 = vcombine.low %v2586_v35, %v2590_v9  ;;  %v5046_v47 = vcombine.high %v2593_v56, %v2597_v57  ;;  %v2605_v61 = vld [vmem:[#allocation13 + $0x120] sm:$0xff]  ;;  %v2634_v22 = vld [vmem:[#allocation13 + $0x208] sm:$0xff] }
 0x781   : > { %v2247_v62 = vrot.slane %v2240_v37, %v2055_v8  ;;  %3382 = vmatpush1.bf16.msra.mxu1 %v5029_v52  ;;  %v5048_v60 = vcombine.high %v2594_v58, %v2598_v48  ;;  %v2601_v37 = vld [vmem:[#allocation13 + $0x100] sm:$0xff]  ;;  %v2642_v49 = vld [vmem:[#allocation13 + $0x248] sm:$0xff] }
 0x782   : > { %3383 = vmatprep.subr.bf16.mxu1 %v5038_v54  ;;  %v2637_v21 = vld [vmem:[#allocation13 + $0x220] sm:$0xff]  ;;  %v2646_v35 = vld [vmem:[#allocation13 + $0x268] sm:$0xff] }
 0x783   : > { %v2248_v2 = vcombine.low %v2239_v38, %v2247_v62  ;;  %v2249_v51 = vcombine.high %v2239_v38, %v2247_v62  ;;  %v2602_v38 = vld [vmem:[#allocation13 + $0x108] sm:$0xff]  ;;  %v5086_v44 = vcombine.high %v2633_v20, %v2637_v21  ;;  %v2641_v46 = vld [vmem:[#allocation13 + $0x240] sm:$0xff]  ;;  %v5085_v9 = vcombine.low %v2633_v20, %v2637_v21 }
 0x784   : > { %v2606_v62 = vld [vmem:[#allocation13 + $0x128] sm:$0xff]  ;;  %v5096_v54 = vcombine.high %v2642_v49, %v2646_v35  ;;  %v2677_v20 = vld [vmem:[#allocation13 + $0x360] sm:$0xff] }
 0x785   : > { %v2251_v3 = vpack.c.bf16 %v2249_v51, %v2199_v0  ;;  %v2250_v4 = vpack.c.bf16 %v2248_v2, %v2198_v63  ;;  %3384 = vmatpush1.bf16.msra.mxu1 %v5037_v12  ;;  %v5045_v63 = vcombine.low %v2593_v56, %v2597_v57  ;;  %v5047_v0 = vcombine.low %v2594_v58, %v2598_v48  ;;  %v2674_v21 = vld [vmem:[#allocation13 + $0x348] sm:$0xff] }
 0x786   : > { %3385 = vmatprep.subr.bf16.mxu1 %v5046_v47  ;;  %v5054_v2 = vcombine.high %v2601_v37, %v2605_v61  ;;  %v5056_v51 = vcombine.high %v2602_v38, %v2606_v62  ;;  %v5095_v56 = vcombine.low %v2642_v49, %v2646_v35  ;;  %v2686_v35 = vld [vmem:[#allocation13 + $0x3a8] sm:$0xff] }
 0x787   : > { %2488 = vmatprep.mubr.bf16.mxu0 %v2251_v3  ;;  %v2609_v3 = vld [vmem:[#allocation13 + $0x140] sm:$0xff] }
 0x788   : > { %2489 = vmatmul.mubr.bf16.vlgmr.msra.gmra.mrb[32].mxu0 %v2250_v4  ;;  %v2613_v4 = vld [vmem:[#allocation13 + $0x160] sm:$0xff] }
 0x789   : > { %3423 = vmatpush1.bf16.msra.mxu0 %v5023_v41  ;;  %3386 = vmatpush1.bf16.msra.mxu1 %v5045_v63  ;;  %v2638_v41 = vld [vmem:[#allocation13 + $0x228] sm:$0xff] }
 0x78a   : > { %3424 = vmatprep.subr.bf16.mxu0 %v5032_v36  ;;  %3387 = vmatprep.subr.bf16.mxu1 %v5054_v2  ;;  %v5088_v45 = vcombine.high %v2634_v22, %v2638_v41  ;;  %v2645_v36 = vld [vmem:[#allocation13 + $0x260] sm:$0xff]  ;;  %v5087_v52 = vcombine.low %v2634_v22, %v2638_v41  ;;  %v2678_v41 = vld [vmem:[#allocation13 + $0x368] sm:$0xff] }
 0x78d   : > { %3425 = vmatpush1.bf16.msra.mxu0 %v5031_v53  ;;  %v5094_v53 = vcombine.high %v2641_v46, %v2645_v36 }
 0x78e   : > { %3426 = vmatprep.subr.bf16.mxu0 %v5040_v55  ;;  %v5093_v55 = vcombine.low %v2641_v46, %v2645_v36  ;;  %v2685_v46 = vld [vmem:[#allocation13 + $0x3a0] sm:$0xff]  ;;  %v2682_v36 = vld [vmem:[#allocation13 + $0x388] sm:$0xff] }
 0x791   : > { %3427 = vmatpush1.bf16.msra.mxu0 %v5039_v59 }
 0x792   : > { %3428 = vmatprep.subr.bf16.mxu0 %v5048_v60 }
 0x795   : > { %3429 = vmatpush1.bf16.msra.mxu0 %v5047_v0 }
 0x796   : > { %3430 = vmatprep.subr.bf16.mxu0 %v5056_v51  ;;  %v2649_v51 = vld [vmem:[#allocation13 + $0x280] sm:$0xff] }
 0x85b   : > { %v2490_v7 = vpop.f32.mrb[32].mxu0 }
 0x85c   : > { %v2491_v8 = vadd.f32 %v2490_v7, %v2289_v5  ;;  %v2492_v50 = vpop.f32.mrb[33].mxu0  ;;  %v5055_v7 = vcombine.low %v2602_v38, %v2606_v62 }
 0x85d   : > { %v2493_v10 = vadd.f32 %v2492_v50, %v2293_v6  ;;  %v2494_v11 = vpop.f32.mrb[34].mxu0 }
 0x85e   : > { %v6984_v14 = vadd.f32 %v6000_v13, %v2491_v8  ;;  %v2495_v15 = vadd.f32 %v2494_v11, %v2289_v5  ;;  %v2496_v25 = vpop.f32.mrb[35].mxu0  ;;  %v2614_v5 = vld [vmem:[#allocation13 + $0x168] sm:$0xff]  ;;  %v5062_v8 = vcombine.high %v2609_v3, %v2613_v4  ;;  %v2621_v11 = vld [vmem:[#allocation13 + $0x1a0] sm:$0xff]  ;;  %3431 = vmatpush1.bf16.msra.mxu0 %v5055_v7 }
 0x85f   : > { %v6987_v27 = vadd.f32 %v6001_v26, %v2493_v10  ;;  %v2497_v28 = vadd.f32 %v2496_v25, %v2293_v6  ;;  %v5053_v6 = vcombine.low %v2601_v37, %v2605_v61  ;;  %v5064_v50 = vcombine.high %v2610_v1, %v2614_v5  ;;  %v2617_v10 = vld [vmem:[#allocation13 + $0x180] sm:$0xff]  ;;  %v2618_v13 = vld [vmem:[#allocation13 + $0x188] sm:$0xff] }
 0x860   : > { %v6990_v30 = vadd.f32 %v6002_v29, %v2495_v15  ;;  %v2622_v15 = vld [vmem:[#allocation13 + $0x1a8] sm:$0xff]  ;;  %v5061_v25 = vcombine.low %v2609_v3, %v2613_v4  ;;  %v5063_v26 = vcombine.low %v2610_v1, %v2614_v5  ;;  %v5069_v40 = vcombine.low %v2617_v10, %v2621_v11  ;;  %v2653_v3 = vld [vmem:[#allocation13 + $0x2a0] sm:$0xff] }
 0x861   : > { %v6993_v32 = vadd.f32 %v6003_v31, %v2497_v28  ;;  %v2505_v33 = vadd.f32 %v6987_v27, %v6984_v14  ;;  %3388 = vmatpush1.bf16.msra.mxu1 %v5053_v6  ;;  %v5070_v28 = vcombine.high %v2617_v10, %v2621_v11  ;;  %3432 = vmatprep.subr.bf16.mxu0 %v5064_v50  ;;  %v2625_v31 = vld [vmem:[#allocation13 + $0x1c0] sm:$0xff]  ;;  %v2650_v4 = vld [vmem:[#allocation13 + $0x288] sm:$0xff] }
 0x862   : > { %3389 = vmatprep.subr.bf16.mxu1 %v5062_v8  ;;  %v5072_v29 = vcombine.high %v2618_v13, %v2622_v15  ;;  %3433 = vmatpush1.bf16.msra.mxu0 %v5063_v26  ;;  %v5071_v16 = vcombine.low %v2618_v13, %v2622_v15  ;;  %v5102_v1 = vcombine.high %v2649_v51, %v2653_v3  ;;  %v2654_v5 = vld [vmem:[#allocation13 + $0x2a8] sm:$0xff]  ;;  %v2657_v50 = vld [vmem:[#allocation13 + $0x2c0] sm:$0xff] }
 0x863   : > { %2506 = vadd.xlane.f32.xlu0 %v2505_v33  ;;  %v2508_v34 = vadd.f32 %v6993_v32, %v6990_v30  ;;  %v2629_v33 = vld [vmem:[#allocation13 + $0x1e0] sm:$0xff]  ;;  %v5101_v6 = vcombine.low %v2649_v51, %v2653_v3  ;;  %v5103_v7 = vcombine.low %v2650_v4, %v2654_v5  ;;  %v5104_v8 = vcombine.high %v2650_v4, %v2654_v5  ;;  %v2658_v11 = vld [vmem:[#allocation13 + $0x2c8] sm:$0xff] }
 0x864   : > { %v5078_v18 = vcombine.high %v2625_v31, %v2629_v33  ;;  %3434 = vmatprep.subr.bf16.mxu0 %v5072_v29  ;;  %v5077_v42 = vcombine.low %v2625_v31, %v2629_v33  ;;  %v2661_v10 = vld [vmem:[#allocation13 + $0x2e0] sm:$0xff]  ;;  %v2662_v15 = vld [vmem:[#allocation13 + $0x2e8] sm:$0xff] }
 0x865   : > { %2509 = vadd.xlane.f32.xlu1 %v2508_v34  ;;  %v2626_v34 = vld [vmem:[#allocation13 + $0x1c8] sm:$0xff]  ;;  %3390 = vmatpush1.bf16.msra.mxu1 %v5061_v25  ;;  %v5110_v13 = vcombine.high %v2657_v50, %v2661_v10  ;;  %v5109_v25 = vcombine.low %v2657_v50, %v2661_v10  ;;  %v5111_v26 = vcombine.low %v2658_v11, %v2662_v15  ;;  %v2665_v29 = vld [vmem:[#allocation13 + $0x300] sm:$0xff] }
 0x866   : > { %3391 = vmatprep.subr.bf16.mxu1 %v5070_v28  ;;  %v5080_v17 = vcombine.high %v2626_v34, %v2630_v39  ;;  %3435 = vmatpush1.bf16.msra.mxu0 %v5071_v16  ;;  %v5079_v43 = vcombine.low %v2626_v34, %v2630_v39  ;;  %v5112_v28 = vcombine.high %v2658_v11, %v2662_v15  ;;  %v2669_v31 = vld [vmem:[#allocation13 + $0x320] sm:$0xff]  ;;  %v2666_v33 = vld [vmem:[#allocation13 + $0x308] sm:$0xff] }
 0x867   : > { %v5118_v34 = vcombine.high %v2665_v29, %v2669_v31  ;;  %v2670_v39 = vld [vmem:[#allocation13 + $0x328] sm:$0xff]  ;;  %v2503_v10 = vld [vmem:[%s7316_s12] sm:$0x3]  ;;  %s4664_s12 = scalar_lea.sflag [#allocation4], %s6761_s7 }
 0x868   : > { %3436 = vmatprep.subr.bf16.mxu0 %v5080_v17  ;;  %v5119_v16 = vcombine.low %v2666_v33, %v2670_v39  ;;  %v2673_v17 = vld [vmem:[#allocation13 + $0x340] sm:$0xff]  ;;  %v2541_v11 = vrot.slane %v2503_v10, %v6852_v23  ;;  %v2545_v15 = vrot.slane %v2503_v10, %v6855_v24 }
 0x869   : > { %3392 = vmatpush1.bf16.msra.mxu1 %v5069_v40  ;;  %v5117_v40 = vcombine.low %v2665_v29, %v2669_v31  ;;  %v5126_v22 = vcombine.high %v2673_v17, %v2677_v20 }
 0x86a   : > { %3393 = vmatprep.subr.bf16.mxu1 %v5078_v18  ;;  %3437 = vmatpush1.bf16.msra.mxu0 %v5079_v43  ;;  %v5120_v18 = vcombine.high %v2666_v33, %v2670_v39  ;;  %v5127_v43 = vcombine.low %v2674_v21, %v2678_v41 }
 0x86b   : > { %3438 = vmatprep.subr.bf16.mxu0 %v5088_v45  ;;  %v2681_v45 = vld [vmem:[#allocation13 + $0x380] sm:$0xff] }
 0x86c   : > { %v5134_v49 = vcombine.high %v2681_v45, %v2685_v46 }
 0x86d   : > { %3394 = vmatpush1.bf16.msra.mxu1 %v5077_v42  ;;  %v5125_v42 = vcombine.low %v2673_v17, %v2677_v20 }
 0x86e   : > { %3395 = vmatprep.subr.bf16.mxu1 %v5086_v44  ;;  %3439 = vmatpush1.bf16.msra.mxu0 %v5087_v52  ;;  %v5128_v44 = vcombine.high %v2674_v21, %v2678_v41  ;;  %v5135_v52 = vcombine.low %v2682_v36, %v2686_v35 }
 0x86f   : > { %3440 = vmatprep.subr.bf16.mxu0 %v5096_v54  ;;  %v2689_v54 = vld [vmem:[#allocation13 + $0x3c0] sm:$0xff] }
 0x871   : > { %3396 = vmatpush1.bf16.msra.mxu1 %v5085_v9  ;;  %v5133_v9 = vcombine.low %v2681_v45, %v2685_v46  ;;  %v2587_v46 = vld [vmem:[#allocation13 + $0x90] sm:$0xff] }
 0x872   : > { %3397 = vmatprep.subr.bf16.mxu1 %v5094_v53  ;;  %3441 = vmatpush1.bf16.msra.mxu0 %v5095_v56  ;;  %v5136_v53 = vcombine.high %v2682_v36, %v2686_v35  ;;  %v2690_v56 = vld [vmem:[#allocation13 + $0x3c8] sm:$0xff]  ;;  %v2592_v35 = vld [vmem:[#allocation13 + $0xb8] sm:$0xff] }
 0x873   : > { %3442 = vmatprep.subr.bf16.mxu0 %v5104_v8 }
 0x875   : > { %3398 = vmatpush1.bf16.msra.mxu1 %v5093_v55  ;;  %v2693_v55 = vld [vmem:[#allocation13 + $0x3e0] sm:$0xff] }
 0x876   : > { %3399 = vmatprep.subr.bf16.mxu1 %v5102_v1  ;;  %3443 = vmatpush1.bf16.msra.mxu0 %v5103_v7 }
 0x877   : > { %3444 = vmatprep.subr.bf16.mxu0 %v5112_v28 }
 0x879   : > { %3400 = vmatpush1.bf16.msra.mxu1 %v5101_v6 }
 0x87a   : > { %3401 = vmatprep.subr.bf16.mxu1 %v5110_v13  ;;  %3445 = vmatpush1.bf16.msra.mxu0 %v5111_v26  ;;  %v2504_v13 = vld [vmem:[%s7317_s0] sm:$0x3]  ;;  %s6236_s0 = sshll.u32 %s6354_s17, 4  ;;  %s6237_s0 = int_to_ptr.vmem [resolvable:$false] %s6236_s0 }
 0x87b   : > { %3446 = vmatprep.subr.bf16.mxu0 %v5120_v18  ;;  %v2556_v31 = vrot.slane %v2504_v13, %v6852_v23  ;;  %v2560_v33 = vrot.slane %v2504_v13, %v6855_v24  ;;  %s6238_s6 = scalar_lea.vmem %s6237_s0, 1024  ;;  %p6239_p5 = scmp.lt.s32.totalorder %s7195_s15, %s6237_s0 }
 0x87c   : > { %p6240_p1 = scmp.lt.s32.totalorder %s6238_s6, %s6232_s10 }
 0x87d   : > { %3402 = vmatpush1.bf16.msra.mxu1 %v5109_v25 }
 0x87e   : > { %3403 = vmatprep.subr.bf16.mxu1 %v5118_v34  ;;  %3447 = vmatpush1.bf16.msra.mxu0 %v5119_v16  ;;  %p6241_p10 = por %p6240_p1, %p6239_p5 }
 0x87f   : > { %3448 = vmatprep.subr.bf16.mxu0 %v5128_v44 }
 0x880   : > { %p6242_p12 = pnand %p6241_p10, %p6235_p7 }
 0x881   : > { %3404 = vmatpush1.bf16.msra.mxu1 %v5117_v40 }
 0x882   : > { %3405 = vmatprep.subr.bf16.mxu1 %v5126_v22  ;;  %3449 = vmatpush1.bf16.msra.mxu0 %v5127_v43  ;;  %v2584_v43 = vld [vmem:[#allocation13 + $0x78] sm:$0xff] }
 0x883   : > { %3450 = vmatprep.subr.bf16.mxu0 %v5136_v53 }
 0x885   : > { %3406 = vmatpush1.bf16.msra.mxu1 %v5125_v42  ;;  %v2583_v42 = vld [vmem:[#allocation13 + $0x70] sm:$0xff] }
 0x886   : > { %3407 = vmatprep.subr.bf16.mxu1 %v5134_v49  ;;  %3451 = vmatpush1.bf16.msra.mxu0 %v5135_v52  ;;  %v2588_v49 = vld [vmem:[#allocation13 + $0x98] sm:$0xff] }
 0x889   : > { %3408 = vmatpush1.bf16.msra.mxu1 %v5133_v9 }
 0x8f0   : > { %v2507_v57 = vpop.xlane.xlu0 %2506 }
 0x8f1   : > { %v2511_v58 = vmul.f32 0.00390625, %v2507_v57  ;;  %v5141_v57 = vcombine.low %v2689_v54, %v2693_v55 }
 0x8f2   : > { %v2510_v48 = vpop.xlane.xlu1 %2509 }
 0x8f3   : > { %v7000_v12 = vsub.f32 %v6984_v14, %v2511_v58  ;;  %v7003_v59 = vsub.f32 %v6987_v27, %v2511_v58  ;;  %v2512_v47 = vmul.f32 0.00390625, %v2510_v48  ;;  %v5142_v58 = vcombine.high %v2689_v54, %v2693_v55  ;;  %v2694_v48 = vld [vmem:[#allocation13 + $0x3e8] sm:$0xff]  ;;  %v2595_v55 = vld [vmem:[#allocation13 + $0xd0] sm:$0xff] }
 0x8f4   : > { %v5044_v54 = vcombine.high %v2588_v49, %v2592_v35 }
 0x8f5   : > { %v7006_v60 = vsub.f32 %v6990_v30, %v2512_v47  ;;  %v7009_v37 = vsub.f32 %v6993_v32, %v2512_v47  ;;  %v2517_v61 = vmul.f32 %v7000_v12, %v7000_v12  ;;  %v2518_v38 = vmul.f32 %v7003_v59, %v7003_v59  ;;  %3409 = vmatprep.subr.bf16.mxu1 %v5142_v58  ;;  %v2600_v58 = vld [vmem:[#allocation13 + $0xf8] sm:$0xff] }
 0x8f6   : > { %v5143_v47 = vcombine.low %v2690_v56, %v2694_v48  ;;  %3410 = vmatpush1.bf16.msra.mxu1 %v5141_v57  ;;  %v2596_v57 = vld [vmem:[#allocation13 + $0xd8] sm:$0xff] }
 0x8f7   : > { %v2521_v62 = vadd.f32 %v2518_v38, %v2517_v61  ;;  %v2519_v63 = vmul.f32 %v7006_v60, %v7006_v60  ;;  %v2520_v0 = vmul.f32 %v7009_v37, %v7009_v37  ;;  %v5144_v61 = vcombine.high %v2690_v56, %v2694_v48  ;;  %v2571_v38 = vld [vmem:[#allocation13 + $0x10] sm:$0xff] }
 0x8f8   : > { %v2599_v56 = vld [vmem:[#allocation13 + $0xf0] sm:$0xff] }
 0x8f9   : > { %2522 = vadd.xlane.f32.xlu0 %v2521_v62  ;;  %v2524_v2 = vadd.f32 %v2520_v0, %v2519_v63  ;;  %3452 = vmatprep.subr.bf16.mxu0 %v5144_v61  ;;  %v2575_v62 = vld [vmem:[#allocation13 + $0x30] sm:$0xff]  ;;  %v2572_v63 = vld [vmem:[#allocation13 + $0x18] sm:$0xff]  ;;  %v5050_v61 = vcombine.high %v2595_v55, %v2599_v56 }
 0x8fa   : > { %3453 = vmatpush1.bf16.msra.mxu0 %v5143_v47  ;;  %v5026_v0 = vcombine.high %v2571_v38, %v2575_v62  ;;  %v5025_v51 = vcombine.low %v2571_v38, %v2575_v62  ;;  %v5043_v47 = vcombine.low %v2588_v49, %v2592_v35  ;;  %v5052_v38 = vcombine.high %v2596_v57, %v2600_v58  ;;  %v2603_v62 = vld [vmem:[#allocation13 + $0x110] sm:$0xff]  ;;  %v2644_v49 = vld [vmem:[#allocation13 + $0x258] sm:$0xff] }
 0x8fb   : > { %2525 = vadd.xlane.f32.xlu1 %v2524_v2  ;;  %v2576_v2 = vld [vmem:[#allocation13 + $0x38] sm:$0xff] }
 0x8fc   : > { %v5027_v3 = vcombine.low %v2572_v63, %v2576_v2  ;;  %v5028_v4 = vcombine.high %v2572_v63, %v2576_v2  ;;  %3465 = vmatprep.subr.bf16.mxu1 %v5026_v0  ;;  %v2607_v63 = vld [vmem:[#allocation13 + $0x130] sm:$0xff]  ;;  %v2604_v0 = vld [vmem:[#allocation13 + $0x118] sm:$0xff] }
 0x8fd   : > { %v2608_v2 = vld [vmem:[#allocation13 + $0x138] sm:$0xff] }
 0x8fe   : > { %3508 = vmatprep.subr.bf16.mxu0 %v5028_v4  ;;  %v5058_v4 = vcombine.high %v2603_v62, %v2607_v63  ;;  %v5059_v10 = vcombine.low %v2604_v0, %v2608_v2  ;;  %v2648_v35 = vld [vmem:[#allocation13 + $0x278] sm:$0xff] }
 0x986   : > { %v2523_v1 = vpop.xlane.xlu0 %2522 }
 0x987   : > { %v2527_v5 = vmul.f32 0.00390625, %v2523_v1  ;;  %v5060_v1 = vcombine.high %v2604_v0, %v2608_v2  ;;  %v2660_v0 = vld [vmem:[#allocation13 + $0x2d8] sm:$0xff] }
 0x988   : > { %v2526_v6 = vpop.xlane.xlu1 %2525  ;;  %v2664_v2 = vld [vmem:[#allocation13 + $0x2f8] sm:$0xff] }
 0x989   : > { %v2529_v7 = vadd.f32 1e-05, %v2527_v5  ;;  %v2528_v8 = vmul.f32 0.00390625, %v2526_v6  ;;  %v2611_v5 = vld [vmem:[#allocation13 + $0x150] sm:$0xff] }
 0x98a   : > { %v2615_v6 = vld [vmem:[#allocation13 + $0x170] sm:$0xff] }
 0x98b   : > { %5964 = vrsqrt.f32 %v2529_v7  ;;  %v2530_v50 = vadd.f32 1e-05, %v2528_v8  ;;  %v2612_v7 = vld [vmem:[#allocation13 + $0x158] sm:$0xff] }
 0x98c   : > { %v2616_v8 = vld [vmem:[#allocation13 + $0x178] sm:$0xff] }
 0x98d   : > { %5966 = vrsqrt.f32 %v2530_v50  ;;  %v5057_v50 = vcombine.low %v2603_v62, %v2607_v63  ;;  %v5068_v13 = vcombine.high %v2612_v7, %v2616_v8  ;;  %v2659_v62 = vld [vmem:[#allocation13 + $0x2d0] sm:$0xff] }
 0x98e   : > { %v2663_v63 = vld [vmem:[#allocation13 + $0x2f0] sm:$0xff] }
 0x995   : > { %v5965_v25 = vpop.eup %5964 }
 0x996   : > { %v2533_v26 = vmul.f32 %v5965_v25, %v7000_v12  ;;  %v2534_v28 = vmul.f32 %v5965_v25, %v7003_v59  ;;  %v2579_v12 = vld [vmem:[#allocation13 + $0x50] sm:$0xff]  ;;  %v2580_v59 = vld [vmem:[#allocation13 + $0x58] sm:$0xff] }
 0x997   : > { %v5967_v29 = vpop.eup %5966  ;;  %v5036_v36 = vcombine.high %v2580_v59, %v2584_v43  ;;  %v5033_v9 = vcombine.low %v2579_v12, %v2583_v42  ;;  %v5035_v52 = vcombine.low %v2580_v59, %v2584_v43  ;;  %v2623_v25 = vld [vmem:[#allocation13 + $0x1b0] sm:$0xff]  ;;  %v2640_v59 = vld [vmem:[#allocation13 + $0x238] sm:$0xff] }
 0x998   : > { %v2548_v34 = vmul.f32 %v2541_v11, %v2533_v26  ;;  %v2535_v39 = vmul.f32 %v5967_v29, %v7006_v60  ;;  %v2536_v40 = vmul.f32 %v5967_v29, %v7009_v37  ;;  %v2549_v16 = vmul.f32 %v2545_v15, %v2534_v28  ;;  %v2591_v37 = vld [vmem:[#allocation13 + $0xb0] sm:$0xff]  ;;  %v2620_v26 = vld [vmem:[#allocation13 + $0x198] sm:$0xff] }
 0x999   : > { %v5034_v60 = vcombine.high %v2579_v12, %v2583_v42  ;;  %v5042_v53 = vcombine.high %v2587_v46, %v2591_v37  ;;  %v5041_v48 = vcombine.low %v2587_v46, %v2591_v37  ;;  %v2624_v28 = vld [vmem:[#allocation13 + $0x1b8] sm:$0xff]  ;;  %v5065_v29 = vcombine.low %v2611_v5, %v2615_v6  ;;  %v2639_v12 = vld [vmem:[#allocation13 + $0x230] sm:$0xff] }
 0x99a   : > { %v2550_v18 = vmul.f32 %v2541_v11, %v2535_v39  ;;  %v2551_v17 = vmul.f32 %v2545_v15, %v2536_v40  ;;  %v2564_v20 = vadd.f32 %v2560_v33, %v2549_v16  ;;  %v2563_v22 = vadd.f32 %v2556_v31, %v2548_v34  ;;  %v2619_v15 = vld [vmem:[#allocation13 + $0x190] sm:$0xff]  ;;  %v2628_v16 = vld [vmem:[#allocation13 + $0x1d8] sm:$0xff] }
 0x99b   : > { %v5066_v11 = vcombine.high %v2611_v5, %v2615_v6  ;;  %v5076_v34 = vcombine.high %v2620_v26, %v2624_v28  ;;  %v2627_v39 = vld [vmem:[#allocation13 + $0x1d0] sm:$0xff]  ;;  %v2636_v42 = vld [vmem:[#allocation13 + $0x218] sm:$0xff] }
 0x99c   : > { %v2566_v21 = vadd.f32 %v2560_v33, %v2551_v17  ;;  %v2565_v41 = vadd.f32 %v2556_v31, %v2550_v18  ;;  %v5067_v31 = vcombine.low %v2612_v7, %v2616_v8  ;;  %v5074_v33 = vcombine.high %v2619_v15, %v2623_v25  ;;  %v2631_v40 = vld [vmem:[#allocation13 + $0x1f0] sm:$0xff]  ;;  %v2632_v18 = vld [vmem:[#allocation13 + $0x1f8] sm:$0xff] }
 0x99d   : > { %v5073_v17 = vcombine.low %v2619_v15, %v2623_v25  ;;  %v5081_v43 = vcombine.low %v2627_v39, %v2631_v40  ;;  %v2647_v37 = vld [vmem:[#allocation13 + $0x270] sm:$0xff]  ;;  %v2668_v7 = vld [vmem:[#allocation13 + $0x318] sm:$0xff] }
 0x99e   : > { %v2568_v44 = vpack.c.bf16 %v2566_v21, %v2564_v20  ;;  %v7033_v45 = vpack.c.bf16 %v2565_v41, %v2563_v22  ;;  %v5075_v20 = vcombine.low %v2620_v26, %v2624_v28  ;;  %v5082_v21 = vcombine.high %v2627_v39, %v2631_v40  ;;  %v2635_v41 = vld [vmem:[#allocation13 + $0x210] sm:$0xff]  ;;  %v2672_v8 = vld [vmem:[#allocation13 + $0x338] sm:$0xff] }
 0x99f   : > { %v5084_v22 = vcombine.high %v2628_v16, %v2632_v18  ;;  %v5090_v46 = vcombine.high %v2635_v41, %v2639_v12  ;;  %v2667_v5 = vld [vmem:[#allocation13 + $0x310] sm:$0xff]  ;;  %v2676_v26 = vld [vmem:[#allocation13 + $0x358] sm:$0xff] }
 0x9a0   : > { %3411 = vmatprep.mubr.bf16.mxu1 %v2568_v44  ;;  %3454 = vmatprep.mubr.bf16.mxu0 %v2568_v44  ;;  %v2671_v6 = vld [vmem:[#allocation13 + $0x330] sm:$0xff]  ;;  %v2680_v28 = vld [vmem:[#allocation13 + $0x378] sm:$0xff] }
 0x9a1   : > { %3412 = vmatmul.mubr.bf16.vlgmr.msra.gmra.mrb[20].mxu1 %v7033_v45  ;;  %3455 = vmatmul.mubr.bf16.vlgmr.msra.gmra.mrb[36].mxu0 %v7033_v45  ;;  %v2675_v15 = vld [vmem:[#allocation13 + $0x350] sm:$0xff] }
 0x9a2   : > { %3466 = vmatpush1.bf16.msra.mxu1 %v5025_v51  ;;  %3509 = vmatpush1.bf16.msra.mxu0 %v5027_v3  ;;  %v5049_v51 = vcombine.low %v2595_v55, %v2599_v56  ;;  %v5051_v3 = vcombine.low %v2596_v57, %v2600_v58  ;;  %v2651_v55 = vld [vmem:[#allocation13 + $0x290] sm:$0xff]  ;;  %v2652_v57 = vld [vmem:[#allocation13 + $0x298] sm:$0xff] }
 0x9a3   : > { %3497 = vmatprep.mubr.bf16.mxu1 %v2568_v44  ;;  %3540 = vmatprep.mubr.bf16.mxu0 %v2568_v44  ;;  %v5083_v44 = vcombine.low %v2628_v16, %v2632_v18  ;;  %v2655_v56 = vld [vmem:[#allocation13 + $0x2b0] sm:$0xff]  ;;  %v2656_v58 = vld [vmem:[#allocation13 + $0x2b8] sm:$0xff] }
 0x9a4   : > { %3467 = vmatprep.subr.bf16.mxu1 %v5034_v60  ;;  %3510 = vmatprep.subr.bf16.mxu0 %v5036_v36  ;;  %v5092_v60 = vcombine.high %v2636_v42, %v2640_v59  ;;  %v2643_v36 = vld [vmem:[#allocation13 + $0x250] sm:$0xff]  ;;  %v2684_v16 = vld [vmem:[#allocation13 + $0x398] sm:$0xff] }
 0x9a5   : > { %v2679_v25 = vld [vmem:[#allocation13 + $0x370] sm:$0xff]  ;;  %v2688_v18 = vld [vmem:[#allocation13 + $0x3b8] sm:$0xff] }
 0x9a6   : > { %3468 = vmatpush1.bf16.msra.mxu1 %v5033_v9  ;;  %3511 = vmatpush1.bf16.msra.mxu0 %v5035_v52  ;;  %v5089_v9 = vcombine.low %v2635_v41, %v2639_v12  ;;  %v5091_v52 = vcombine.low %v2636_v42, %v2640_v59  ;;  %v2683_v39 = vld [vmem:[#allocation13 + $0x390] sm:$0xff]  ;;  %v2692_v42 = vld [vmem:[#allocation13 + $0x3d8] sm:$0xff] }
 0x9a7   : > { %3469 = vmatprep.subr.bf16.mxu1 %v5042_v53  ;;  %3512 = vmatprep.subr.bf16.mxu0 %v5044_v54  ;;  %v5098_v53 = vcombine.high %v2643_v36, %v2647_v37  ;;  %v5100_v54 = vcombine.high %v2644_v49, %v2648_v35  ;;  %v2687_v40 = vld [vmem:[#allocation13 + $0x3b0] sm:$0xff]  ;;  %v2696_v59 = vld [vmem:[#allocation13 + $0x3f8] sm:$0xff] }
 0x9a8   : > { %v2691_v41 = vld [vmem:[#allocation13 + $0x3d0] sm:$0xff] }
 0x9a9   : > { %v2695_v12 = vld [vmem:[#allocation13 + $0x3f0] sm:$0xff] }
 0x9aa   : > { %3470 = vmatpush1.bf16.msra.mxu1 %v5041_v48  ;;  %3513 = vmatpush1.bf16.msra.mxu0 %v5043_v47  ;;  %v5097_v48 = vcombine.low %v2643_v36, %v2647_v37  ;;  %v5099_v47 = vcombine.low %v2644_v49, %v2648_v35  ;;  %v5145_v36 = vcombine.low %v2691_v41, %v2695_v12  ;;  %v5750_v49 = vld [vmem:[#allocation14 + $0x4] ss:$8 sps:$4 sm:$0xff]   ;;  %v5748_v35 = vld [vmem:[#allocation14] ss:$8 sps:$4 sm:$0xff]  }
 0x9ab   : > { %3471 = vmatprep.subr.bf16.mxu1 %v5050_v61  ;;  %3514 = vmatprep.subr.bf16.mxu0 %v5052_v38  ;;  %v5106_v61 = vcombine.high %v2651_v55, %v2655_v56  ;;  %v5108_v38 = vcombine.high %v2652_v57, %v2656_v58  ;;  %v5147_v37 = vcombine.low %v2692_v42, %v2696_v59 }
 0x9ae   : > { %3472 = vmatpush1.bf16.msra.mxu1 %v5049_v51  ;;  %3515 = vmatpush1.bf16.msra.mxu0 %v5051_v3  ;;  %v5105_v51 = vcombine.low %v2651_v55, %v2655_v56  ;;  %v5107_v3 = vcombine.low %v2652_v57, %v2656_v58  ;;  %v5759_v55 = vld [vmem:[#allocation14 + $0x34] ss:$8 sps:$4 sm:$0xff]   ;;  %v5757_v56 = vld [vmem:[#allocation14 + $0x30] ss:$8 sps:$4 sm:$0xff]   ;;  %v5762_v57 = vld [vmem:[#allocation14 + $0x44] ss:$8 sps:$4 sm:$0xff]  }
 0x9af   : > { %3473 = vmatprep.subr.bf16.mxu1 %v5058_v4  ;;  %3516 = vmatprep.subr.bf16.mxu0 %v5060_v1  ;;  %v5114_v4 = vcombine.high %v2659_v62, %v2663_v63  ;;  %v5116_v1 = vcombine.high %v2660_v0, %v2664_v2  ;;  %v5760_v58 = vld [vmem:[#allocation14 + $0x40] ss:$8 sps:$4 sm:$0xff]  }
 0x9b2   : > { %3474 = vmatpush1.bf16.msra.mxu1 %v5057_v50  ;;  %3517 = vmatpush1.bf16.msra.mxu0 %v5059_v10  ;;  %v5113_v50 = vcombine.low %v2659_v62, %v2663_v63  ;;  %v5115_v10 = vcombine.low %v2660_v0, %v2664_v2  ;;  %v5769_v62 = vld [vmem:[#allocation14 + $0x70] ss:$8 sps:$4 sm:$0xff]   ;;  %v5774_v63 = vld [vmem:[#allocation14 + $0x84] ss:$8 sps:$4 sm:$0xff]   ;;  %v5772_v0 = vld [vmem:[#allocation14 + $0x80] ss:$8 sps:$4 sm:$0xff]  }
 0x9b3   : > { %3475 = vmatprep.subr.bf16.mxu1 %v5066_v11  ;;  %3518 = vmatprep.subr.bf16.mxu0 %v5068_v13  ;;  %v5122_v11 = vcombine.high %v2667_v5, %v2671_v6  ;;  %v5124_v13 = vcombine.high %v2668_v7, %v2672_v8  ;;  %v5777_v2 = vld [vmem:[#allocation14 + $0x94] ss:$8 sps:$4 sm:$0xff]  }
 0x9b6   : > { %3476 = vmatpush1.bf16.msra.mxu1 %v5065_v29  ;;  %3519 = vmatpush1.bf16.msra.mxu0 %v5067_v31  ;;  %v5121_v29 = vcombine.low %v2667_v5, %v2671_v6  ;;  %v5123_v31 = vcombine.low %v2668_v7, %v2672_v8  ;;  %v5781_v5 = vld [vmem:[#allocation14 + $0xb0] ss:$8 sps:$4 sm:$0xff]   ;;  %v5786_v6 = vld [vmem:[#allocation14 + $0xc4] ss:$8 sps:$4 sm:$0xff]   ;;  %v5784_v7 = vld [vmem:[#allocation14 + $0xc0] ss:$8 sps:$4 sm:$0xff]  }
 0x9b7   : > { %3477 = vmatprep.subr.bf16.mxu1 %v5074_v33  ;;  %3520 = vmatprep.subr.bf16.mxu0 %v5076_v34  ;;  %v5130_v33 = vcombine.high %v2675_v15, %v2679_v25  ;;  %v5132_v34 = vcombine.high %v2676_v26, %v2680_v28  ;;  %v5789_v8 = vld [vmem:[#allocation14 + $0xd4] ss:$8 sps:$4 sm:$0xff]  }
 0x9ba   : > { %3478 = vmatpush1.bf16.msra.mxu1 %v5073_v17  ;;  %3521 = vmatpush1.bf16.msra.mxu0 %v5075_v20  ;;  %v5129_v17 = vcombine.low %v2675_v15, %v2679_v25  ;;  %v5131_v20 = vcombine.low %v2676_v26, %v2680_v28  ;;  %v5793_v15 = vld [vmem:[#allocation14 + $0xf0] ss:$8 sps:$4 sm:$0xff]   ;;  %v5798_v25 = vld [vmem:[#allocation14 + $0x104] ss:$8 sps:$4 sm:$0xff]   ;;  %v2709_v26 = vsub.s32 2, %v6849_v19 }
 0x9bb   : > { %3479 = vmatprep.subr.bf16.mxu1 %v5082_v21  ;;  %3522 = vmatprep.subr.bf16.mxu0 %v5084_v22  ;;  %v5138_v21 = vcombine.high %v2683_v39, %v2687_v40  ;;  %v5140_v22 = vcombine.high %v2684_v16, %v2688_v18  ;;  %v7043_v28 = vld [vmem:[%s7318_s24] sm:$0xff] }
 0x9be   : > { %3480 = vmatpush1.bf16.msra.mxu1 %v5081_v43  ;;  %3523 = vmatpush1.bf16.msra.mxu0 %v5083_v44  ;;  %v5137_v43 = vcombine.low %v2683_v39, %v2687_v40  ;;  %v5139_v44 = vcombine.low %v2684_v16, %v2688_v18 }
 0x9bf   : > { %3481 = vmatprep.subr.bf16.mxu1 %v5090_v46  ;;  %3524 = vmatprep.subr.bf16.mxu0 %v5092_v60  ;;  %v5146_v46 = vcombine.high %v2691_v41, %v2695_v12  ;;  %v5148_v60 = vcombine.high %v2692_v42, %v2696_v59 }
 0x9c2   : > { %3482 = vmatpush1.bf16.msra.mxu1 %v5089_v9  ;;  %3525 = vmatpush1.bf16.msra.mxu0 %v5091_v52  ;;  %v5753_v9 = vld [vmem:[#allocation14 + $0x14] ss:$8 sps:$4 sm:$0xff]   ;;  %v5751_v52 = vld [vmem:[#allocation14 + $0x10] ss:$8 sps:$4 sm:$0xff]  }
 0x9c3   : > { %3483 = vmatprep.subr.bf16.mxu1 %v5098_v53  ;;  %3526 = vmatprep.subr.bf16.mxu0 %v5100_v54  ;;  %v5756_v53 = vld [vmem:[#allocation14 + $0x24] ss:$8 sps:$4 sm:$0xff]   ;;  %v5754_v54 = vld [vmem:[#allocation14 + $0x20] ss:$8 sps:$4 sm:$0xff]  }
 0x9c6   : > { %3484 = vmatpush1.bf16.msra.mxu1 %v5097_v48  ;;  %3527 = vmatpush1.bf16.msra.mxu0 %v5099_v47  ;;  %v5765_v48 = vld [vmem:[#allocation14 + $0x54] ss:$8 sps:$4 sm:$0xff]   ;;  %v5763_v47 = vld [vmem:[#allocation14 + $0x50] ss:$8 sps:$4 sm:$0xff]  }
 0x9c7   : > { %3485 = vmatprep.subr.bf16.mxu1 %v5106_v61  ;;  %3528 = vmatprep.subr.bf16.mxu0 %v5108_v38  ;;  %v5766_v61 = vld [vmem:[#allocation14 + $0x60] ss:$8 sps:$4 sm:$0xff]   ;;  %v5771_v38 = vld [vmem:[#allocation14 + $0x74] ss:$8 sps:$4 sm:$0xff]  }
 0x9ca   : > { %3486 = vmatpush1.bf16.msra.mxu1 %v5105_v51  ;;  %3529 = vmatpush1.bf16.msra.mxu0 %v5107_v3  ;;  %v5775_v51 = vld [vmem:[#allocation14 + $0x90] ss:$8 sps:$4 sm:$0xff]   ;;  %v5780_v3 = vld [vmem:[#allocation14 + $0xa4] ss:$8 sps:$4 sm:$0xff]  }
 0x9cb   : > { %3487 = vmatprep.subr.bf16.mxu1 %v5114_v4  ;;  %3530 = vmatprep.subr.bf16.mxu0 %v5116_v1  ;;  %v5778_v4 = vld [vmem:[#allocation14 + $0xa0] ss:$8 sps:$4 sm:$0xff]   ;;  %v5783_v1 = vld [vmem:[#allocation14 + $0xb4] ss:$8 sps:$4 sm:$0xff]  }
 0x9ce   : > { %3488 = vmatpush1.bf16.msra.mxu1 %v5113_v50  ;;  %3531 = vmatpush1.bf16.msra.mxu0 %v5115_v10  ;;  %v5787_v50 = vld [vmem:[#allocation14 + $0xd0] ss:$8 sps:$4 sm:$0xff]   ;;  %v5792_v10 = vld [vmem:[#allocation14 + $0xe4] ss:$8 sps:$4 sm:$0xff]  }
 0x9cf   : > { %3489 = vmatprep.subr.bf16.mxu1 %v5122_v11  ;;  %3532 = vmatprep.subr.bf16.mxu0 %v5124_v13  ;;  %v5790_v11 = vld [vmem:[#allocation14 + $0xe0] ss:$8 sps:$4 sm:$0xff]   ;;  %v5795_v13 = vld [vmem:[#allocation14 + $0xf4] ss:$8 sps:$4 sm:$0xff]  }
 0x9d2   : > { %3490 = vmatpush1.bf16.msra.mxu1 %v5121_v29  ;;  %3533 = vmatpush1.bf16.msra.mxu0 %v5123_v31  ;;  %v2713_v29 = vsub.s32 3, %v6849_v19  ;;  %v2702_v31 = vrot.slane %v7043_v28, %v6852_v23 }
 0x9d3   : > { %3491 = vmatprep.subr.bf16.mxu1 %v5130_v33  ;;  %3534 = vmatprep.subr.bf16.mxu0 %v5132_v34  ;;  %v2710_v33 = vrot.slane %v7043_v28, %v2709_v26  ;;  %v2706_v34 = vrot.slane %v7043_v28, %v6855_v24 }
 0x9d4   : > { %v2714_v39 = vrot.slane %v7043_v28, %v2713_v29 }
 0x9d6   : > { %3492 = vmatpush1.bf16.msra.mxu1 %v5129_v17  ;;  %3535 = vmatpush1.bf16.msra.mxu0 %v5131_v20 }
 0x9d7   : > { %3493 = vmatprep.subr.bf16.mxu1 %v5138_v21  ;;  %3536 = vmatprep.subr.bf16.mxu0 %v5140_v22 }
 0x9da   : > { %3494 = vmatpush1.bf16.msra.mxu1 %v5137_v43  ;;  %3537 = vmatpush1.bf16.msra.mxu0 %v5139_v44 }
 0x9db   : > { %3495 = vmatprep.subr.bf16.mxu1 %v5146_v46  ;;  %3538 = vmatprep.subr.bf16.mxu0 %v5148_v60 }
 0x9de   : > { %3496 = vmatpush1.bf16.msra.mxu1 %v5145_v36  ;;  %3539 = vmatpush1.bf16.msra.mxu0 %v5147_v37 }
 0x9df   : > { %4483 = vmatprep.subr.bf16.mxu1 %v5750_v49 }
 0x9e1   : > { %3498 = vmatmul.mubr.bf16.vlgmr.msra.gmra.mrb[24].mxu1 %v7033_v45  ;;  %3541 = vmatmul.mubr.bf16.vlgmr.msra.gmra.mrb[40].mxu0 %v7033_v45  ;;  %v5768_v45 = vld [vmem:[#allocation14 + $0x64] ss:$8 sps:$4 sm:$0xff]  }
 0x9e2   : > { %4484 = vmatpush1.bf16.msra.mxu1 %v5748_v35 }
 0x9e3   : > { %4485 = vmatprep.subr.bf16.mxu1 %v5753_v9 }
 0x9e6   : > { %4486 = vmatpush1.bf16.msra.mxu1 %v5751_v52 }
 0x9e7   : > { %4487 = vmatprep.subr.bf16.mxu1 %v5756_v53 }
 0x9ea   : > { %4488 = vmatpush1.bf16.msra.mxu1 %v5754_v54 }
 0x9eb   : > { %4489 = vmatprep.subr.bf16.mxu1 %v5759_v55 }
 0x9ee   : > { %4490 = vmatpush1.bf16.msra.mxu1 %v5757_v56 }
 0x9ef   : > { %4491 = vmatprep.subr.bf16.mxu1 %v5762_v57 }
 0x9f2   : > { %4492 = vmatpush1.bf16.msra.mxu1 %v5760_v58 }
 0x9f3   : > { %4493 = vmatprep.subr.bf16.mxu1 %v5765_v48 }
 0x9f6   : > { %4494 = vmatpush1.bf16.msra.mxu1 %v5763_v47 }
 0x9f7   : > { %4495 = vmatprep.subr.bf16.mxu1 %v5768_v45 }
 0x9fa   : > { %4496 = vmatpush1.bf16.msra.mxu1 %v5766_v61 }
 0x9fb   : > { %4497 = vmatprep.subr.bf16.mxu1 %v5771_v38 }
 0x9fe   : > { %4498 = vmatpush1.bf16.msra.mxu1 %v5769_v62 }
 0x9ff   : > { %4499 = vmatprep.subr.bf16.mxu1 %v5774_v63 }
 0xa02   : > { %4500 = vmatpush1.bf16.msra.mxu1 %v5772_v0 }
 0xa03   : > { %4501 = vmatprep.subr.bf16.mxu1 %v5777_v2 }
 0xa06   : > { %4502 = vmatpush1.bf16.msra.mxu1 %v5775_v51 }
 0xa07   : > { %4503 = vmatprep.subr.bf16.mxu1 %v5780_v3 }
 0xa0a   : > { %4504 = vmatpush1.bf16.msra.mxu1 %v5778_v4 }
 0xa0b   : > { %4505 = vmatprep.subr.bf16.mxu1 %v5783_v1 }
 0xa0e   : > { %4506 = vmatpush1.bf16.msra.mxu1 %v5781_v5 }
 0xa0f   : > { %4507 = vmatprep.subr.bf16.mxu1 %v5786_v6 }
 0xa12   : > { %4508 = vmatpush1.bf16.msra.mxu1 %v5784_v7 }
 0xa13   : > { %4509 = vmatprep.subr.bf16.mxu1 %v5789_v8 }
 0xa16   : > { %4510 = vmatpush1.bf16.msra.mxu1 %v5787_v50 }
 0xa17   : > { %4511 = vmatprep.subr.bf16.mxu1 %v5792_v10 }
 0xa1a   : > { %4512 = vmatpush1.bf16.msra.mxu1 %v5790_v11 }
 0xa1b   : > { %4513 = vmatprep.subr.bf16.mxu1 %v5795_v13 }
 0xa1e   : > { %4514 = vmatpush1.bf16.msra.mxu1 %v5793_v15 }
 0xa1f   : > { %4526 = vmatprep.subr.bf16.mxu1 %v5798_v25 }
 0xa74   : > { %v3413_v40 = vpop.f32.mrb[20].mxu1  ;;  %v3456_v16 = vpop.f32.mrb[36].mxu0 }
 0xa75   : > { %v7052_v18 = vadd.f32 %v3413_v40, %v2702_v31  ;;  %v7054_v17 = vadd.f32 %v3456_v16, %v2710_v33  ;;  %v3415_v20 = vpop.f32.mrb[21].mxu1  ;;  %v3458_v21 = vpop.f32.mrb[37].mxu0 }
 0xa76   : > { %v7056_v22 = vadd.f32 %v3415_v20, %v2706_v34  ;;  %v7058_v41 = vadd.f32 %v3458_v21, %v2714_v39  ;;  %v3417_v12 = vpop.f32.mrb[22].mxu1  ;;  %v3460_v42 = vpop.f32.mrb[38].mxu0 }
 0xa77   : > { %v3567_v59 = vmul.f32 %v7052_v18, %v7052_v18  ;;  %v3569_v43 = vmul.f32 %v7054_v17, %v7054_v17  ;;  %v3419_v44 = vpop.f32.mrb[23].mxu1  ;;  %v3462_v46 = vpop.f32.mrb[39].mxu0  ;;  %v3418_v37 = vadd.f32 %v3417_v12, %v2702_v31  ;;  %v3461_v49 = vadd.f32 %v3460_v42, %v2710_v33 }
 0xa78   : > { %v3568_v60 = vmul.f32 %v7056_v22, %v7056_v22  ;;  %v3570_v36 = vmul.f32 %v7058_v41, %v7058_v41  ;;  %v3420_v52 = vadd.f32 %v3419_v44, %v2706_v34  ;;  %v7070_v53 = vadd.f32 %v3462_v46, %v2714_v39 }
 0xa79   : > { %v3583_v35 = vmul.f32 %v3567_v59, %v7052_v18  ;;  %v3585_v9 = vmul.f32 %v3569_v43, %v7054_v17  ;;  %v3575_v56 = vmul.f32 %v3418_v37, %v3418_v37  ;;  %v3577_v48 = vmul.f32 %v3461_v49, %v3461_v49 }
 0xa7a   : > { %v3584_v54 = vmul.f32 %v3568_v60, %v7056_v22  ;;  %v3586_v55 = vmul.f32 %v3570_v36, %v7058_v41  ;;  %v3576_v38 = vmul.f32 %v3420_v52, %v3420_v52  ;;  %v3578_v2 = vmul.f32 %v7070_v53, %v7070_v53 }
 0xa7b   : > { %v3599_v57 = vmul.f32 0.044715, %v3583_v35  ;;  %v3601_v58 = vmul.f32 0.044715, %v3585_v9  ;;  %v3591_v61 = vmul.f32 %v3575_v56, %v3418_v37  ;;  %v3593_v0 = vmul.f32 %v3577_v48, %v3461_v49 }
 0xa7c   : > { %v3600_v47 = vmul.f32 0.044715, %v3584_v54  ;;  %v3602_v45 = vmul.f32 0.044715, %v3586_v55  ;;  %v3592_v1 = vmul.f32 %v3576_v38, %v3420_v52  ;;  %v3594_v8 = vmul.f32 %v3578_v2, %v7070_v53 }
 0xa7d   : > { %v3615_v62 = vadd.f32 %v3599_v57, %v7052_v18  ;;  %v3617_v63 = vadd.f32 %v3601_v58, %v7054_v17  ;;  %v3607_v4 = vmul.f32 0.044715, %v3591_v61  ;;  %v3609_v7 = vmul.f32 0.044715, %v3593_v0 }
 0xa7e   : > { %v3616_v51 = vadd.f32 %v3600_v47, %v7056_v22  ;;  %v3618_v3 = vadd.f32 %v3602_v45, %v7058_v41  ;;  %v3608_v13 = vmul.f32 0.044715, %v3592_v1  ;;  %v3610_v25 = vmul.f32 0.044715, %v3594_v8  ;;  %v5801_v1 = vld [vmem:[#allocation14 + $0x114] ss:$8 sps:$4 sm:$0xff]  }
 0xa7f   : > { %v3631_v5 = vmul.f32 0.7978846, %v3615_v62  ;;  %v3633_v6 = vmul.f32 0.7978846, %v3617_v63  ;;  %v3623_v11 = vadd.f32 %v3607_v4, %v3418_v37  ;;  %v3625_v15 = vadd.f32 %v3609_v7, %v3461_v49  ;;  %v5805_v7 = vld [vmem:[#allocation14 + $0x130] ss:$8 sps:$4 sm:$0xff]  }
 0xa80   : > { %v3632_v50 = vmul.f32 0.7978846, %v3616_v51  ;;  %v3634_v10 = vmul.f32 0.7978846, %v3618_v3  ;;  %v3624_v29 = vadd.f32 %v3608_v13, %v3420_v52  ;;  %v3626_v33 = vadd.f32 %v3610_v25, %v7070_v53  ;;  %v5796_v3 = vld [vmem:[#allocation14 + $0x100] ss:$8 sps:$4 sm:$0xff]  }
 0xa81   : > { %5968 = vtanh.f32 %v3631_v5  ;;  %v3639_v26 = vmul.f32 0.7978846, %v3623_v11  ;;  %v3641_v31 = vmul.f32 0.7978846, %v3625_v15  ;;  %v3551_v59 = vmul.f32 0.5, %v7052_v18 }
 0xa82   : > { %5970 = vtanh.f32 %v3633_v6  ;;  %v3640_v34 = vmul.f32 0.7978846, %v3624_v29  ;;  %v3642_v39 = vmul.f32 0.7978846, %v3626_v33  ;;  %v3553_v43 = vmul.f32 0.5, %v7054_v17 }
 0xa83   : > { %5972 = vtanh.f32 %v3632_v50  ;;  %v3559_v60 = vmul.f32 0.5, %v3418_v37  ;;  %v3561_v36 = vmul.f32 0.5, %v3461_v49  ;;  %v3552_v55 = vmul.f32 0.5, %v7056_v22  ;;  %v5802_v5 = vld [vmem:[#allocation14 + $0x120] ss:$8 sps:$4 sm:$0xff]  }
 0xa84   : > { %5974 = vtanh.f32 %v3634_v10  ;;  %v3560_v56 = vmul.f32 0.5, %v3420_v52  ;;  %v3554_v18 = vmul.f32 0.5, %v7058_v41  ;;  %v3562_v17 = vmul.f32 0.5, %v7070_v53  ;;  %v5799_v41 = vld [vmem:[#allocation14 + $0x110] ss:$8 sps:$4 sm:$0xff]  }
 0xa85   : > { %5976 = vtanh.f32 %v3639_v26  ;;  %v5804_v53 = vld [vmem:[#allocation14 + $0x124] ss:$8 sps:$4 sm:$0xff]   ;;  %v5807_v6 = vld [vmem:[#allocation14 + $0x134] ss:$8 sps:$4 sm:$0xff]   ;;  %v5808_v50 = vld [vmem:[#allocation14 + $0x140] ss:$8 sps:$4 sm:$0xff]  }
 0xa86   : > { %5978 = vtanh.f32 %v3641_v31  ;;  %v5810_v8 = vld [vmem:[#allocation14 + $0x144] ss:$8 sps:$4 sm:$0xff]   ;;  %v5813_v10 = vld [vmem:[#allocation14 + $0x154] ss:$8 sps:$4 sm:$0xff]   ;;  %v5811_v11 = vld [vmem:[#allocation14 + $0x150] ss:$8 sps:$4 sm:$0xff]  }
 0xa87   : > { %5980 = vtanh.f32 %v3640_v34  ;;  %v5816_v13 = vld [vmem:[#allocation14 + $0x164] ss:$8 sps:$4 sm:$0xff]   ;;  %v2717_v15 = vsub.s32 4, %v6849_v19  ;;  %v2725_v25 = vsub.s32 6, %v6849_v19  ;;  %v5814_v26 = vld [vmem:[#allocation14 + $0x160] ss:$8 sps:$4 sm:$0xff]  }
 0xa88   : > { %5982 = vtanh.f32 %v3642_v39  ;;  %v2721_v29 = vsub.s32 5, %v6849_v19  ;;  %v2729_v31 = vsub.s32 7, %v6849_v19  ;;  %v5819_v33 = vld [vmem:[#allocation14 + $0x174] ss:$8 sps:$4 sm:$0xff]  }
 0xa89   : > { %v2718_v34 = vrot.slane %v7043_v28, %v2717_v15  ;;  %v2726_v39 = vrot.slane %v7043_v28, %v2725_v25  ;;  %v5826_v25 = vld [vmem:[#allocation14 + $0x1a0] ss:$8 sps:$4 sm:$0xff]  }
 0xa8b   : > { %v5969_v40 = vpop.eup %5968 }
 0xa8c   : > { %v5971_v16 = vpop.eup %5970  ;;  %v3663_v12 = vadd.f32 1.0, %v5969_v40  ;;  %v5817_v40 = vld [vmem:[#allocation14 + $0x170] ss:$8 sps:$4 sm:$0xff]  }
 0xa8d   : > { %v5973_v20 = vpop.eup %5972  ;;  %v3665_v44 = vadd.f32 1.0, %v5971_v16  ;;  %v2722_v16 = vrot.slane %v7043_v28, %v2721_v29 }
 0xa8e   : > { %v5975_v21 = vpop.eup %5974  ;;  %v3664_v35 = vadd.f32 1.0, %v5973_v20  ;;  %v3679_v45 = vmul.f32 %v3663_v12, %v3551_v59  ;;  %v2730_v20 = vrot.slane %v7043_v28, %v2729_v31 }
 0xa8f   : > { %v5977_v42 = vpop.eup %5976  ;;  %v3666_v57 = vadd.f32 1.0, %v5975_v21  ;;  %v7087_v62 = vmul.f32 %v3665_v44, %v3553_v43  ;;  %v5822_v21 = vld [vmem:[#allocation14 + $0x184] ss:$8 sps:$4 sm:$0xff]  }
 0xa90   : > { %v5979_v46 = vpop.eup %5978  ;;  %v3671_v9 = vadd.f32 1.0, %v5977_v42  ;;  %v3680_v49 = vmul.f32 %v3664_v35, %v3552_v55 }
 0xa91   : > { %v5981_v54 = vpop.eup %5980  ;;  %v3673_v58 = vadd.f32 1.0, %v5979_v46  ;;  %v3682_v22 = vmul.f32 %v3666_v57, %v3554_v18  ;;  %v5825_v57 = vld [vmem:[#allocation14 + $0x194] ss:$8 sps:$4 sm:$0xff]  }
 0xa92   : > { %v5983_v48 = vpop.eup %5982  ;;  %v3672_v47 = vadd.f32 1.0, %v5981_v54  ;;  %v3687_v61 = vmul.f32 %v3671_v9, %v3559_v60  ;;  %v5820_v9 = vld [vmem:[#allocation14 + $0x180] ss:$8 sps:$4 sm:$0xff]  }
 0xa93   : > { %v3674_v38 = vadd.f32 1.0, %v5983_v48  ;;  %v7089_v37 = vmul.f32 %v3673_v58, %v3561_v36 }
 0xa94   : > { %v3688_v63 = vmul.f32 %v3672_v47, %v3560_v56  ;;  %v3695_v0 = vpack.c.bf16 %v3687_v61, %v3679_v45 }
 0xa95   : > { %v3690_v52 = vmul.f32 %v3674_v38, %v3562_v17  ;;  %v3697_v2 = vpack.c.bf16 %v7089_v37, %v7087_v62  ;;  %v5859_v62 = vld [vmem:[#allocation14 + $0x250] ss:$8 sps:$4 sm:$0xff]   ;;  %v5864_v37 = vld [vmem:[#allocation14 + $0x264] ss:$8 sps:$4 sm:$0xff]  }
 0xa96   : > { %v3696_v51 = vpack.c.bf16 %v3688_v63, %v3680_v49 }
 0xa97   : > { %v3698_v4 = vpack.c.bf16 %v3690_v52, %v3682_v22  ;;  %v5823_v22 = vld [vmem:[#allocation14 + $0x190] ss:$8 sps:$4 sm:$0xff]  }
 0xa98   : > { %4515 = vmatprep.mubr.bf16.mxu1 %v3696_v51 }
 0xa99   : > { %4516 = vmatmul.mubr.bf16.vlgmr.msra.gmra.mrb[28].mxu1 %v3695_v0 }
 0xa9a   : > { %4527 = vmatpush1.bf16.msra.mxu1 %v5796_v3  ;;  %4558 = vmatprep.mubr.bf16.mxu1 %v3698_v4  ;;  %v5828_v4 = vld [vmem:[#allocation14 + $0x1a4] ss:$8 sps:$4 sm:$0xff]  }
 0xa9b   : > { %4528 = vmatprep.subr.bf16.mxu1 %v5801_v1 }
 0xa9e   : > { %4529 = vmatpush1.bf16.msra.mxu1 %v5799_v41 }
 0xa9f   : > { %4530 = vmatprep.subr.bf16.mxu1 %v5804_v53 }
 0xaa2   : > { %4531 = vmatpush1.bf16.msra.mxu1 %v5802_v5 }
 0xaa3   : > { %4532 = vmatprep.subr.bf16.mxu1 %v5807_v6 }
 0xaa6   : > { %4533 = vmatpush1.bf16.msra.mxu1 %v5805_v7 }
 0xaa7   : > { %4534 = vmatprep.subr.bf16.mxu1 %v5810_v8 }
 0xaaa   : > { %4535 = vmatpush1.bf16.msra.mxu1 %v5808_v50 }
 0xaab   : > { %4536 = vmatprep.subr.bf16.mxu1 %v5813_v10 }
 0xaae   : > { %4537 = vmatpush1.bf16.msra.mxu1 %v5811_v11 }
 0xaaf   : > { %4538 = vmatprep.subr.bf16.mxu1 %v5816_v13 }
 0xab2   : > { %4539 = vmatpush1.bf16.msra.mxu1 %v5814_v26  ;;  %v5831_v26 = vld [vmem:[#allocation14 + $0x1b4] ss:$8 sps:$4 sm:$0xff]  }
 0xab3   : > { %4540 = vmatprep.subr.bf16.mxu1 %v5819_v33 }
 0xab4   : > { %v3499_v12 = vpop.f32.mrb[24].mxu1  ;;  %v3542_v42 = vpop.f32.mrb[40].mxu0 }
 0xab5   : > { %v7101_v59 = vadd.f32 %v3499_v12, %v2718_v34  ;;  %v7103_v43 = vadd.f32 %v3542_v42, %v2726_v39  ;;  %v3501_v19 = vpop.f32.mrb[25].mxu1  ;;  %v3544_v44 = vpop.f32.mrb[41].mxu0 }
 0xab6   : > { %4541 = vmatpush1.bf16.msra.mxu1 %v5817_v40  ;;  %v7105_v46 = vadd.f32 %v3501_v19, %v2722_v16  ;;  %v7107_v60 = vadd.f32 %v3544_v44, %v2730_v20  ;;  %v3503_v36 = vpop.f32.mrb[26].mxu1  ;;  %v3546_v35 = vpop.f32.mrb[42].mxu0  ;;  %v5829_v44 = vld [vmem:[#allocation14 + $0x1b0] ss:$8 sps:$4 sm:$0xff]  }
 0xab7   : > { %v3571_v28 = vmul.f32 %v7101_v59, %v7101_v59  ;;  %v3573_v54 = vmul.f32 %v7103_v43, %v7103_v43  ;;  %4542 = vmatprep.subr.bf16.mxu1 %v5822_v21  ;;  %v3505_v55 = vpop.f32.mrb[27].mxu1  ;;  %v3548_v56 = vpop.f32.mrb[43].mxu0  ;;  %v7117_v47 = vadd.f32 %v3503_v36, %v2718_v34  ;;  %v7119_v45 = vadd.f32 %v3546_v35, %v2726_v39 }
 0xab8   : > { %v3572_v58 = vmul.f32 %v7105_v46, %v7105_v46  ;;  %v3574_v48 = vmul.f32 %v7107_v60, %v7107_v60  ;;  %v7123_v17 = vadd.f32 %v3505_v55, %v2722_v16  ;;  %v7125_v38 = vadd.f32 %v3548_v56, %v2730_v20  ;;  %v5832_v55 = vld [vmem:[#allocation14 + $0x1c0] ss:$8 sps:$4 sm:$0xff]   ;;  %v5837_v56 = vld [vmem:[#allocation14 + $0x1d4] ss:$8 sps:$4 sm:$0xff]  }
 0xab9   : > { %v3587_v61 = vmul.f32 %v3571_v28, %v7101_v59  ;;  %v3589_v18 = vmul.f32 %v3573_v54, %v7103_v43  ;;  %v3579_v0 = vmul.f32 %v7117_v47, %v7117_v47  ;;  %v3581_v3 = vmul.f32 %v7119_v45, %v7119_v45 }
 0xaba   : > { %v3588_v49 = vmul.f32 %v3572_v58, %v7105_v46  ;;  %v3590_v63 = vmul.f32 %v3574_v48, %v7107_v60  ;;  %4543 = vmatpush1.bf16.msra.mxu1 %v5820_v9  ;;  %v3580_v5 = vmul.f32 %v7123_v17, %v7123_v17  ;;  %v3582_v50 = vmul.f32 %v7125_v38, %v7125_v38  ;;  %v5834_v9 = vld [vmem:[#allocation14 + $0x1c4] ss:$8 sps:$4 sm:$0xff]  }
 0xabb   : > { %v3603_v52 = vmul.f32 0.044715, %v3587_v61  ;;  %v3605_v51 = vmul.f32 0.044715, %v3589_v18  ;;  %4544 = vmatprep.subr.bf16.mxu1 %v5825_v57  ;;  %v3595_v53 = vmul.f32 %v3579_v0, %v7117_v47  ;;  %v3597_v8 = vmul.f32 %v3581_v3, %v7119_v45  ;;  %v5835_v57 = vld [vmem:[#allocation14 + $0x1d0] ss:$8 sps:$4 sm:$0xff]  }
 0xabc   : > { %v3604_v1 = vmul.f32 0.044715, %v3588_v49  ;;  %v3606_v41 = vmul.f32 0.044715, %v3590_v63  ;;  %v3596_v15 = vmul.f32 %v3580_v5, %v7123_v17  ;;  %v3598_v34 = vmul.f32 %v3582_v50, %v7125_v38  ;;  %v5840_v48 = vld [vmem:[#allocation14 + $0x1e4] ss:$8 sps:$4 sm:$0xff]  }
 0xabd   : > { %v3619_v6 = vadd.f32 %v3603_v52, %v7101_v59  ;;  %v3621_v7 = vadd.f32 %v3605_v51, %v7103_v43  ;;  %v3611_v13 = vmul.f32 0.044715, %v3595_v53  ;;  %v3613_v33 = vmul.f32 0.044715, %v3597_v8  ;;  %v5838_v63 = vld [vmem:[#allocation14 + $0x1e0] ss:$8 sps:$4 sm:$0xff]  }
 0xabe   : > { %v3620_v10 = vadd.f32 %v3604_v1, %v7105_v46  ;;  %v3622_v11 = vadd.f32 %v3606_v41, %v7107_v60  ;;  %4545 = vmatpush1.bf16.msra.mxu1 %v5823_v22  ;;  %v3612_v20 = vmul.f32 0.044715, %v3596_v15  ;;  %v3614_v12 = vmul.f32 0.044715, %v3598_v34  ;;  %v5843_v3 = vld [vmem:[#allocation14 + $0x1f4] ss:$8 sps:$4 sm:$0xff]  }
 0xabf   : > { %v3635_v29 = vmul.f32 0.7978846, %v3619_v6  ;;  %v3637_v31 = vmul.f32 0.7978846, %v3621_v7  ;;  %4546 = vmatprep.subr.bf16.mxu1 %v5828_v4  ;;  %v3627_v16 = vadd.f32 %v3611_v13, %v7117_v47  ;;  %v3629_v21 = vadd.f32 %v3613_v33, %v7119_v45 }
 0xac0   : > { %v3636_v39 = vmul.f32 0.7978846, %v3620_v10  ;;  %v3638_v40 = vmul.f32 0.7978846, %v3622_v11  ;;  %v3628_v19 = vadd.f32 %v3612_v20, %v7123_v17  ;;  %v3630_v35 = vadd.f32 %v3614_v12, %v7125_v38  ;;  %v5849_v20 = vld [vmem:[#allocation14 + $0x214] ss:$8 sps:$4 sm:$0xff]  }
 0xac1   : > { %5984 = vtanh.f32 %v3635_v29  ;;  %v3643_v42 = vmul.f32 0.7978846, %v3627_v16  ;;  %v3645_v36 = vmul.f32 0.7978846, %v3629_v21  ;;  %v3555_v52 = vmul.f32 0.5, %v7101_v59 }
 0xac2   : > { %5986 = vtanh.f32 %v3637_v31  ;;  %4547 = vmatpush1.bf16.msra.mxu1 %v5826_v25  ;;  %v3644_v28 = vmul.f32 0.7978846, %v3628_v19  ;;  %v3646_v54 = vmul.f32 0.7978846, %v3630_v35  ;;  %v3557_v51 = vmul.f32 0.5, %v7103_v43 }
 0xac3   : > { %5988 = vtanh.f32 %v3636_v39  ;;  %4548 = vmatprep.subr.bf16.mxu1 %v5831_v26  ;;  %v3563_v41 = vmul.f32 0.5, %v7117_v47  ;;  %v3565_v53 = vmul.f32 0.5, %v7119_v45  ;;  %v3556_v8 = vmul.f32 0.5, %v7105_v46  ;;  %v5841_v43 = vld [vmem:[#allocation14 + $0x1f0] ss:$8 sps:$4 sm:$0xff]  }
 0xac4   : > { %5990 = vtanh.f32 %v3638_v40  ;;  %v3564_v50 = vmul.f32 0.5, %v7123_v17  ;;  %v3558_v47 = vmul.f32 0.5, %v7107_v60  ;;  %v5846_v45 = vld [vmem:[#allocation14 + $0x204] ss:$8 sps:$4 sm:$0xff]   ;;  %v3566_v26 = vmul.f32 0.5, %v7125_v38 }
 0xac5   : > { %5992 = vtanh.f32 %v3643_v42  ;;  %v5844_v16 = vld [vmem:[#allocation14 + $0x200] ss:$8 sps:$4 sm:$0xff]   ;;  %v5847_v12 = vld [vmem:[#allocation14 + $0x210] ss:$8 sps:$4 sm:$0xff]   ;;  %v5852_v42 = vld [vmem:[#allocation14 + $0x224] ss:$8 sps:$4 sm:$0xff]  }
 0xac6   : > { %5994 = vtanh.f32 %v3645_v36  ;;  %4549 = vmatpush1.bf16.msra.mxu1 %v5829_v44  ;;  %v5850_v19 = vld [vmem:[#allocation14 + $0x220] ss:$8 sps:$4 sm:$0xff]   ;;  %v5855_v44 = vld [vmem:[#allocation14 + $0x234] ss:$8 sps:$4 sm:$0xff]   ;;  %v5853_v36 = vld [vmem:[#allocation14 + $0x230] ss:$8 sps:$4 sm:$0xff]  }
 0xac7   : > { %5996 = vtanh.f32 %v3644_v28  ;;  %4550 = vmatprep.subr.bf16.mxu1 %v5834_v9  ;;  %v5858_v35 = vld [vmem:[#allocation14 + $0x244] ss:$8 sps:$4 sm:$0xff]   ;;  %v5856_v9 = vld [vmem:[#allocation14 + $0x240] ss:$8 sps:$4 sm:$0xff]   ;;  %v5861_v28 = vld [vmem:[#allocation14 + $0x254] ss:$8 sps:$4 sm:$0xff]  }
 0xac8   : > { %5998 = vtanh.f32 %v3646_v54  ;;  %v5867_v54 = vld [vmem:[#allocation14 + $0x274] ss:$8 sps:$4 sm:$0xff]  }
 0xaca   : > { %4551 = vmatpush1.bf16.msra.mxu1 %v5832_v55  ;;  %v5865_v55 = vld [vmem:[#allocation14 + $0x270] ss:$8 sps:$4 sm:$0xff]  }
 0xacb   : > { %v5985_v58 = vpop.eup %5984  ;;  %4552 = vmatprep.subr.bf16.mxu1 %v5837_v56  ;;  %v5870_v56 = vld [vmem:[#allocation14 + $0x284] ss:$8 sps:$4 sm:$0xff]  }
 0xacc   : > { %v5987_v61 = vpop.eup %5986  ;;  %v3667_v0 = vadd.f32 1.0, %v5985_v58  ;;  %v5873_v58 = vld [vmem:[#allocation14 + $0x294] ss:$8 sps:$4 sm:$0xff]  }
 0xacd   : > { %v5989_v18 = vpop.eup %5988  ;;  %v3669_v4 = vadd.f32 1.0, %v5987_v61  ;;  %v5876_v61 = vld [vmem:[#allocation14 + $0x2a4] ss:$8 sps:$4 sm:$0xff]  }
 0xace   : > { %v5991_v49 = vpop.eup %5990  ;;  %4553 = vmatpush1.bf16.msra.mxu1 %v5835_v57  ;;  %v3668_v5 = vadd.f32 1.0, %v5989_v18  ;;  %v7155_v15 = vmul.f32 %v3667_v0, %v3555_v52  ;;  %v5868_v57 = vld [vmem:[#allocation14 + $0x280] ss:$8 sps:$4 sm:$0xff]   ;;  %v5882_v0 = vld [vmem:[#allocation14 + $0x2c4] ss:$8 sps:$4 sm:$0xff]  }
 0xacf   : > { %v5993_v22 = vpop.eup %5992  ;;  %4554 = vmatprep.subr.bf16.mxu1 %v5840_v48  ;;  %v3670_v10 = vadd.f32 1.0, %v5991_v49  ;;  %v7161_v46 = vmul.f32 %v3669_v4, %v3557_v51  ;;  %v5871_v48 = vld [vmem:[#allocation14 + $0x290] ss:$8 sps:$4 sm:$0xff]   ;;  %v5874_v18 = vld [vmem:[#allocation14 + $0x2a0] ss:$8 sps:$4 sm:$0xff]  }
 0xad0   : > { %v5995_v1 = vpop.eup %5994  ;;  %v3675_v6 = vadd.f32 1.0, %v5993_v22  ;;  %v3684_v31 = vmul.f32 %v3668_v5, %v3556_v8  ;;  %v5879_v49 = vld [vmem:[#allocation14 + $0x2b4] ss:$8 sps:$4 sm:$0xff]   ;;  %v5880_v22 = vld [vmem:[#allocation14 + $0x2c0] ss:$8 sps:$4 sm:$0xff]  }
 0xad1   : > { %v5997_v7 = vpop.eup %5996  ;;  %v3677_v11 = vadd.f32 1.0, %v5995_v1  ;;  %v7167_v39 = vmul.f32 %v3670_v10, %v3558_v47  ;;  %v5885_v52 = vld [vmem:[#allocation14 + $0x2d4] ss:$8 sps:$4 sm:$0xff]   ;;  %v5883_v51 = vld [vmem:[#allocation14 + $0x2d0] ss:$8 sps:$4 sm:$0xff]  }
 0xad2   : > { %v5999_v59 = vpop.eup %5998  ;;  %4555 = vmatpush1.bf16.msra.mxu1 %v5838_v63  ;;  %v3676_v13 = vadd.f32 1.0, %v5997_v7  ;;  %v7157_v25 = vmul.f32 %v3675_v6, %v3563_v41  ;;  %v5877_v63 = vld [vmem:[#allocation14 + $0x2b0] ss:$8 sps:$4 sm:$0xff]   ;;  %v5886_v4 = vld [vmem:[#allocation14 + $0x2e0] ss:$8 sps:$4 sm:$0xff]  }
 0xad3   : > { %4556 = vmatprep.subr.bf16.mxu1 %v5843_v3  ;;  %v3678_v29 = vadd.f32 1.0, %v5999_v59  ;;  %v7163_v17 = vmul.f32 %v3677_v11, %v3565_v53  ;;  %v5888_v3 = vld [vmem:[#allocation14 + $0x2e4] ss:$8 sps:$4 sm:$0xff]   ;;  %v5891_v1 = vld [vmem:[#allocation14 + $0x2f4] ss:$8 sps:$4 sm:$0xff]  }
 0xad4   : > { %v3692_v33 = vmul.f32 %v3676_v13, %v3564_v50  ;;  %v3699_v34 = vpack.c.bf16 %v7157_v25, %v7155_v15  ;;  %v5889_v41 = vld [vmem:[#allocation14 + $0x2f0] ss:$8 sps:$4 sm:$0xff]   ;;  %v5894_v53 = vld [vmem:[#allocation14 + $0x304] ss:$8 sps:$4 sm:$0xff]   ;;  %v5892_v5 = vld [vmem:[#allocation14 + $0x300] ss:$8 sps:$4 sm:$0xff]  }
 0xad5   : > { %v7169_v40 = vmul.f32 %v3678_v29, %v3566_v26  ;;  %v3701_v60 = vpack.c.bf16 %v7163_v17, %v7161_v46  ;;  %v5897_v6 = vld [vmem:[#allocation14 + $0x314] ss:$8 sps:$4 sm:$0xff]   ;;  %v5895_v7 = vld [vmem:[#allocation14 + $0x310] ss:$8 sps:$4 sm:$0xff]   ;;  %v5900_v8 = vld [vmem:[#allocation14 + $0x324] ss:$8 sps:$4 sm:$0xff]  }
 0xad6   : > { %4557 = vmatpush1.bf16.msra.mxu1 %v5841_v43  ;;  %v3700_v38 = vpack.c.bf16 %v3692_v33, %v3684_v31  ;;  %v5898_v50 = vld [vmem:[#allocation14 + $0x320] ss:$8 sps:$4 sm:$0xff]   ;;  %v5903_v10 = vld [vmem:[#allocation14 + $0x334] ss:$8 sps:$4 sm:$0xff]   ;;  %v5901_v11 = vld [vmem:[#allocation14 + $0x330] ss:$8 sps:$4 sm:$0xff]  }
 0xad7   : > { %4569 = vmatprep.subr.bf16.mxu1 %v5846_v45  ;;  %v3702_v21 = vpack.c.bf16 %v7169_v40, %v7167_v39  ;;  %v5906_v59 = vld [vmem:[#allocation14 + $0x344] ss:$8 sps:$4 sm:$0xff]   ;;  %v5904_v43 = vld [vmem:[#allocation14 + $0x340] ss:$8 sps:$4 sm:$0xff]   ;;  %v5909_v13 = vld [vmem:[#allocation14 + $0x354] ss:$8 sps:$4 sm:$0xff]  }
 0xad8   : > { %v5907_v15 = vld [vmem:[#allocation14 + $0x350] ss:$8 sps:$4 sm:$0xff]   ;;  %v5912_v25 = vld [vmem:[#allocation14 + $0x364] ss:$8 sps:$4 sm:$0xff]   ;;  %v5910_v47 = vld [vmem:[#allocation14 + $0x360] ss:$8 sps:$4 sm:$0xff]  }
 0xad9   : > { %4559 = vmatmul.mubr.bf16.vlgmr.msra.gmra.mrb[28].mxu1 %v3697_v2  ;;  %v5862_v2 = vld [vmem:[#allocation14 + $0x260] ss:$8 sps:$4 sm:$0xff]   ;;  %v5915_v45 = vld [vmem:[#allocation14 + $0x374] ss:$8 sps:$4 sm:$0xff]   ;;  %v5913_v26 = vld [vmem:[#allocation14 + $0x370] ss:$8 sps:$4 sm:$0xff]  }
 0xada   : > { %4570 = vmatpush1.bf16.msra.mxu1 %v5844_v16  ;;  %4601 = vmatprep.mubr.bf16.mxu1 %v3700_v38  ;;  %v5918_v29 = vld [vmem:[#allocation14 + $0x384] ss:$8 sps:$4 sm:$0xff]   ;;  %v5916_v31 = vld [vmem:[#allocation14 + $0x380] ss:$8 sps:$4 sm:$0xff]   ;;  %v5921_v33 = vld [vmem:[#allocation14 + $0x394] ss:$8 sps:$4 sm:$0xff]  }
 0xadb   : > { %4571 = vmatprep.subr.bf16.mxu1 %v5849_v20  ;;  %v5924_v39 = vld [vmem:[#allocation14 + $0x3a4] ss:$8 sps:$4 sm:$0xff]   ;;  %v5922_v40 = vld [vmem:[#allocation14 + $0x3a0] ss:$8 sps:$4 sm:$0xff]   ;;  %v5927_v16 = vld [vmem:[#allocation14 + $0x3b4] ss:$8 sps:$4 sm:$0xff]  }
 0xadc   : > { %v5925_v38 = vld [vmem:[#allocation14 + $0x3b0] ss:$8 sps:$4 sm:$0xff]   ;;  %v5930_v20 = vld [vmem:[#allocation14 + $0x3c4] ss:$8 sps:$4 sm:$0xff]  }
 0xade   : > { %4572 = vmatpush1.bf16.msra.mxu1 %v5847_v12  ;;  %v5933_v12 = vld [vmem:[#allocation14 + $0x3d4] ss:$8 sps:$4 sm:$0xff]  }
 0xadf   : > { %4573 = vmatprep.subr.bf16.mxu1 %v5852_v42  ;;  %v5931_v42 = vld [vmem:[#allocation14 + $0x3d0] ss:$8 sps:$4 sm:$0xff]  }
 0xae2   : > { %4574 = vmatpush1.bf16.msra.mxu1 %v5850_v19  ;;  %v5936_v19 = vld [vmem:[#allocation14 + $0x3e4] ss:$8 sps:$4 sm:$0xff]  }
 0xae3   : > { %4575 = vmatprep.subr.bf16.mxu1 %v5855_v44  ;;  %v5934_v44 = vld [vmem:[#allocation14 + $0x3e0] ss:$8 sps:$4 sm:$0xff]  }
 0xae6   : > { %4576 = vmatpush1.bf16.msra.mxu1 %v5853_v36  ;;  %v5939_v36 = vld [vmem:[#allocation14 + $0x3f4] ss:$8 sps:$4 sm:$0xff]  }
 0xae7   : > { %4577 = vmatprep.subr.bf16.mxu1 %v5858_v35  ;;  %v5937_v35 = vld [vmem:[#allocation14 + $0x3f0] ss:$8 sps:$4 sm:$0xff]  }
 0xaea   : > { %4578 = vmatpush1.bf16.msra.mxu1 %v5856_v9  ;;  %v3831_v9 = vld [vmem:[%s7320_s2] sm:$0x3] }
 0xaeb   : > { %4579 = vmatprep.subr.bf16.mxu1 %v5861_v28  ;;  %v3836_v28 = vrot.slane %v3831_v9, %v6852_v23 }
 0xaee   : > { %4580 = vmatpush1.bf16.msra.mxu1 %v5859_v62  ;;  %v3840_v62 = vrot.slane %v3831_v9, %v6855_v24 }
 0xaef   : > { %4581 = vmatprep.subr.bf16.mxu1 %v5864_v37 }
 0xaf2   : > { %4582 = vmatpush1.bf16.msra.mxu1 %v5862_v2 }
 0xaf3   : > { %4583 = vmatprep.subr.bf16.mxu1 %v5867_v54 }
 0xaf6   : > { %4584 = vmatpush1.bf16.msra.mxu1 %v5865_v55 }
 0xaf7   : > { %4585 = vmatprep.subr.bf16.mxu1 %v5870_v56 }
 0xafa   : > { %4586 = vmatpush1.bf16.msra.mxu1 %v5868_v57 }
 0xafb   : > { %4587 = vmatprep.subr.bf16.mxu1 %v5873_v58 }
 0xafe   : > { %4588 = vmatpush1.bf16.msra.mxu1 %v5871_v48 }
 0xaff   : > { %4589 = vmatprep.subr.bf16.mxu1 %v5876_v61 }
 0xb02   : > { %4590 = vmatpush1.bf16.msra.mxu1 %v5874_v18 }
 0xb03   : > { %4591 = vmatprep.subr.bf16.mxu1 %v5879_v49 }
 0xb06   : > { %4592 = vmatpush1.bf16.msra.mxu1 %v5877_v63 }
 0xb07   : > { %4593 = vmatprep.subr.bf16.mxu1 %v5882_v0 }
 0xb0a   : > { %4594 = vmatpush1.bf16.msra.mxu1 %v5880_v22 }
 0xb0b   : > { %4595 = vmatprep.subr.bf16.mxu1 %v5885_v52 }
 0xb0e   : > { %4596 = vmatpush1.bf16.msra.mxu1 %v5883_v51 }
 0xb0f   : > { %4597 = vmatprep.subr.bf16.mxu1 %v5888_v3 }
 0xb12   : > { %4598 = vmatpush1.bf16.msra.mxu1 %v5886_v4 }
 0xb13   : > { %4599 = vmatprep.subr.bf16.mxu1 %v5891_v1 }
 0xb16   : > { %4600 = vmatpush1.bf16.msra.mxu1 %v5889_v41 }
 0xb17   : > { %4612 = vmatprep.subr.bf16.mxu1 %v5894_v53 }
 0xb19   : > { %4602 = vmatmul.mubr.bf16.vlgmr.msra.gmra.mrb[28].mxu1 %v3699_v34  ;;  %v5919_v34 = vld [vmem:[#allocation14 + $0x390] ss:$8 sps:$4 sm:$0xff]  }
 0xb1a   : > { %4613 = vmatpush1.bf16.msra.mxu1 %v5892_v5  ;;  %4644 = vmatprep.mubr.bf16.mxu1 %v3702_v21  ;;  %v5928_v21 = vld [vmem:[#allocation14 + $0x3c0] ss:$8 sps:$4 sm:$0xff]  }
 0xb1b   : > { %4614 = vmatprep.subr.bf16.mxu1 %v5897_v6 }
 0xb1e   : > { %4615 = vmatpush1.bf16.msra.mxu1 %v5895_v7 }
 0xb1f   : > { %4616 = vmatprep.subr.bf16.mxu1 %v5900_v8 }
 0xb22   : > { %4617 = vmatpush1.bf16.msra.mxu1 %v5898_v50 }
 0xb23   : > { %4618 = vmatprep.subr.bf16.mxu1 %v5903_v10 }
 0xb26   : > { %4619 = vmatpush1.bf16.msra.mxu1 %v5901_v11 }
 0xb27   : > { %4620 = vmatprep.subr.bf16.mxu1 %v5906_v59 }
 0xb2a   : > { %4621 = vmatpush1.bf16.msra.mxu1 %v5904_v43 }
 0xb2b   : > { %4622 = vmatprep.subr.bf16.mxu1 %v5909_v13 }
 0xb2e   : > { %4623 = vmatpush1.bf16.msra.mxu1 %v5907_v15 }
 0xb2f   : > { %4624 = vmatprep.subr.bf16.mxu1 %v5912_v25 }
 0xb32   : > { %4625 = vmatpush1.bf16.msra.mxu1 %v5910_v47 }
 0xb33   : > { %4626 = vmatprep.subr.bf16.mxu1 %v5915_v45 }
 0xb36   : > { %4627 = vmatpush1.bf16.msra.mxu1 %v5913_v26 }
 0xb37   : > { %4628 = vmatprep.subr.bf16.mxu1 %v5918_v29 }
 0xb3a   : > { %4629 = vmatpush1.bf16.msra.mxu1 %v5916_v31 }
 0xb3b   : > { %4630 = vmatprep.subr.bf16.mxu1 %v5921_v33 }
 0xb3e   : > { %4631 = vmatpush1.bf16.msra.mxu1 %v5919_v34 }
 0xb3f   : > { %4632 = vmatprep.subr.bf16.mxu1 %v5924_v39 }
 0xb42   : > { %4633 = vmatpush1.bf16.msra.mxu1 %v5922_v40 }
 0xb43   : > { %4634 = vmatprep.subr.bf16.mxu1 %v5927_v16 }
 0xb46   : > { %4635 = vmatpush1.bf16.msra.mxu1 %v5925_v38 }
 0xb47   : > { %4636 = vmatprep.subr.bf16.mxu1 %v5930_v20 }
 0xb4a   : > { %4637 = vmatpush1.bf16.msra.mxu1 %v5928_v21 }
 0xb4b   : > { %4638 = vmatprep.subr.bf16.mxu1 %v5933_v12 }
 0xb4e   : > { %4639 = vmatpush1.bf16.msra.mxu1 %v5931_v42 }
 0xb4f   : > { %4640 = vmatprep.subr.bf16.mxu1 %v5936_v19 }
 0xb52   : > { %4641 = vmatpush1.bf16.msra.mxu1 %v5934_v44 }
 0xb53   : > { %4642 = vmatprep.subr.bf16.mxu1 %v5939_v36 }
 0xb56   : > { %4643 = vmatpush1.bf16.msra.mxu1 %v5937_v35 }
 0xb59   : > { %4645 = vmatmul.mubr.bf16.vlgmr.msra.gmra.mrb[28].mxu1 %v3701_v60 }
 0xc2c   : > { %v4646_v37 = vpop.f32.mrb[28].mxu1 }
 0xc2d   : > { %v5397_v2 = vadd.f32 %v4646_v37, %v3836_v28  ;;  %v4648_v54 = vpop.f32.mrb[29].mxu1 }
 0xc2e   : > { %v5398_v55 = vadd.f32 %v4648_v54, %v3840_v62  ;;  %v4650_v56 = vpop.f32.mrb[30].mxu1 }
 0xc2f   : > { %v4655_v46 = vadd.f32 %v5397_v2, %v6984_v14  ;;  %v5399_v17 = vadd.f32 %v4650_v56, %v3836_v28  ;;  %v4652_v60 = vpop.f32.mrb[31].mxu1 }
 0xc30   : > { %v4656_v23 = vadd.f32 %v5398_v55, %v6987_v27  ;;  %v5400_v24 = vadd.f32 %v4652_v60, %v3840_v62 }
 0xc31   : > { %4659 = vst [vmem:[%s658_s4] sm:$0xff] %v4655_v46  ;;  %v4657_v57 = vadd.f32 %v5399_v17, %v6990_v30 }
 0xc32   : > { %4660 = vst [vmem:[%s658_s4 + $0x8] sm:$0xff] %v4656_v23  ;;  %v4658_v14 = vadd.f32 %v5400_v24, %v6993_v32 }
 0xc33   : > { %4661 = vst [vmem:[%s658_s4 + $0x10] sm:$0xff] %v4657_v57 }
 0xc34   : > { %4662 = vst [vmem:[%s658_s4 + $0x18] sm:$0xff] %v4658_v14 }
 0xc35   : > { %6245 = shalt.err (!%p6242_p12)
}
 0xc36   : > { %s6246_s25 = scalar_lea.hbm %s7202_s30, 512  ;;  %s6250_s14 = scalar_lea.hbm %s7321_s27, 1024 }
 0xc37   : > { %p6247_p8 = scmp.ne.s32.totalorder %s7202_s30, %s6246_s25  ;;  %p6251_p6 = scmp.lt.u32.totalorder %s7202_s30, %s7321_s27 }
 0xc38   : > { %p6252_p2 = scmp.lt.u32.totalorder %s6250_s14, %s6246_s25  ;;  %p6254_p4 = scmp.lt.u32.totalorder %s6246_s25, %s7202_s30 }
 0xc39   : > { %p6248_p3 = pnand %p6247_p8, %p7322_p9 }
 0xc3a   : > { %p6253_p13 = por %p6252_p2, %p6251_p6 }
 0xc3b   : > { %p6249_p11 = pneg %p6248_p3 }
 0xc3c   : > { %p6255_p0 = por %p6254_p4, %p6253_p13 }
 0xc3e   : > { %p6256_p7 = pnand %p6255_p0, %p6249_p11 }
 0xc40   : > { %6259 = shalt.err (!%p6256_p7)
}
 0xc41   : > { %s6355_s4 = smov 256   ;;  %s6356_s16 = smov 16  }
 0xc42   : > { %5443 = dma.vmem_to_hbm [thread:$0]  (%p7322_p9), %s7195_s15, 512, %s7202_s30, %s4664_s12, %s6355_s4, %s6355_s4, %s6356_s16  }
 0xc43 PF: > { %s4695_s8 = sand.u32 1, %s6314_s18   ;;  %p7323_p5 = scmp.ne.s32.totalorder %s7300_s29, 0 }
 0xc44   : > { %p7324_p1 = scmp.ge.s32.totalorder %s6334_s23, 2  ;;  %s4696_s5 = scalar_lea.sflag [#allocation4], %s4695_s8 }
 0xc46   : > { %p5472_p10 = pnand %p7324_p1, %p7323_p5 }
 0xc48   : > { %6309 = dma.done.wait (!%p5472_p10), %s4696_s5, 512  }
 0xc49   : > { %6311 = vsyncadd (!%p5472_p10), %s4696_s5, 4294966784  ;;  %s37_s23 = sadd.s32 1, %s6334_s23   ;;  %s7325_s18 = smov %s6318_s19 }
 0xc4a   : > { %p34_p12 = scmp.ge.s32.totalorder %s37_s23, 4   ;;  %s7326_s19 = smov %s6322_s20 }
 0xc4b   : > { %s7327_s20 = smov %s6660_s26  ;;  %s7328_s21 = smov %s6330_s22 }
 0xc4c   : > { %s7329_s22 = smov %s7331_s28  ;;  %36 = sbr.rel (!%p34_p12) target bundleno = 25 (0x19), region = 162 }
 0xc53   :  { %4701 = vsyncpa [#allocation3], 1 }
 0xc54   :  { %4703 = vsyncpa [#allocation3 + $0x1], 1 }
 0xc55   :  { %4704 = vsyncpa [#allocation6], 1 }
 0xc56   :  { %4706 = vsyncpa [#allocation6 + $0x1], 1 }
 0xc57   :  { %4707 = vsyncpa [#allocation9], 1 }
 0xc58   :  { %4708 = vsyncpa [#allocation12], 1 }
 0xc59   :  { %4709 = vsyncpa [#allocation15], 1 }
 0xc5a   :  { %4710 = vsyncpa [#allocation4], 1 }
 0xc5b   :  { %4712 = vsyncpa [#allocation4 + $0x1], 1 }

</bundles_post_ra>
